<compile_context>
chip_gen: v7x
topology: tpu7x:2x2x1
jax: 0.10.0
libtpu: 0.0.40
codegen_flags: <defaults>
</compile_context>

<pallas_src>
import jax
import jax.numpy as jnp
from jax import lax
from jax.experimental import pallas as pl
from jax.experimental.pallas import tpu as pltpu

EPS = 1e-5
LANE = 128
_VMEM_BUDGET = 10 * 1024 * 1024      # budget for one double-buffered row stream
_VMEM_LIMIT = 48 * 1024 * 1024       # safe on v5e/v6e (128 MiB) and v7x (64 MiB)


# --------------------------------------------------------------------------- #
# Small helpers
# --------------------------------------------------------------------------- #
def _round_up(x, m):
    return (x + m - 1) // m * m


def _pick_tile_rows(m, row_bytes, max_tm=1024):
    """Largest multiple-of-16 tile (<= max_tm) whose double-buffered blocks fit."""
    tm = max_tm
    while tm > 16 and 2 * tm * row_bytes > _VMEM_BUDGET:
        tm //= 2
    tm = min(tm, _round_up(m, 16))
    return max(tm, 16)


def _compiler_params():
    return pltpu.CompilerParams(
        dimension_semantics=("parallel",),      # every tile independent
        vmem_limit_bytes=_VMEM_LIMIT,
    )


def _pad_rows(x, rows):
    return jnp.pad(x, ((0, rows - x.shape[0]), (0, 0)))


def _pad_cols(x, cols):
    return jnp.pad(x, ((0, 0), (0, cols - x.shape[1])))


# --------------------------------------------------------------------------- #
# Pallas kernels
# --------------------------------------------------------------------------- #
def _matmul_bias_kernel(x_ref, w_ref, b_ref, o_ref):
    # ConvTranspose3d(kernel=2, stride=2) hot path: per-voxel matmul + bias.
    o_ref[...] = (
        jnp.dot(x_ref[...], w_ref[...], preferred_element_type=jnp.float32)
        + b_ref[...]
    )


def _conv_stats_kernel(p_ref, w_ref, o_ref, s_ref, q_ref):
    # Conv3d(3x3x3) tile matmul (bias dropped: cancelled by train-mode BN)
    # + per-tile partial moments (sum, sum of squares) for the batch stats.
    acc = jnp.dot(p_ref[...], w_ref[...], preferred_element_type=jnp.float32)
    o_ref[...] = acc
    s_ref[0] = jnp.sum(acc, axis=0, keepdims=True)
    q_ref[0] = jnp.sum(acc * acc, axis=0, keepdims=True)


def _scale_shift_relu_kernel(x_ref, sc_ref, sh_ref, o_ref):
    # BatchNorm (folded into scale/shift) + ReLU, tiled elementwise.
    o_ref[...] = jnp.maximum(x_ref[...] * sc_ref[...] + sh_ref[...], 0.0)


# --------------------------------------------------------------------------- #
# Kernel wrappers
# --------------------------------------------------------------------------- #
def matmul_bias(x2d, w2d, b_row):
    """(M, K)bf16 @ (K, P)bf16 + (1, P)f32 -> (M, P)f32, tiled over M."""
    m, k = x2d.shape
    p = w2d.shape[1]
    tm = _pick_tile_rows(m, k * 2 + p * 4)
    nb = pl.cdiv(m, tm)
    mp = nb * tm
    x2d = _pad_rows(x2d, mp)
    out = pl.pallas_call(
        _matmul_bias_kernel,
        out_shape=jax.ShapeDtypeStruct((mp, p), jnp.float32),
        grid=(nb,),
        in_specs=[
            pl.BlockSpec((tm, k), lambda i: (i, 0)),
            pl.BlockSpec((k, p), lambda i: (0, 0)),
            pl.BlockSpec((1, p), lambda i: (0, 0)),
        ],
        out_specs=pl.BlockSpec((tm, p), lambda i: (i, 0)),
        compiler_params=_compiler_params(),
    )(x2d, w2d, b_row)
    return out[:m]


def _im2col_3x3x3(x_ndhwc):
    n, d, h, w, c = x_ndhwc.shape
    xp = jnp.pad(x_ndhwc, ((0, 0), (1, 1), (1, 1), (1, 1), (0, 0)))
    cols = []
    for kd in range(3):
        for kh in range(3):
            for kw in range(3):
                cols.append(xp[:, kd:kd + d, kh:kh + h, kw:kw + w, :])
    patches = jnp.stack(cols, axis=-2)               # (n, d, h, w, 27, c)
    return patches.reshape(n * d * h * w, 27 * c)


def conv3d_bn_relu(h_ndhwc, w_oidhw, gamma, beta):
    """Conv3d(3x3x3, pad=1) + train-mode BatchNorm3d + ReLU (channels last)."""
    n, dd, hh, ww, c = h_ndhwc.shape
    cout = w_oidhw.shape[0]
    cp = _round_up(cout, LANE)
    m = n * dd * hh * ww
    k = 27 * c

    # Wrapper-side im2col, emitted in bf16 (halves HBM traffic vs f32).
    # TODO(synk): in-kernel halo accumulation would remove this 27x inflation.
    patches = _im2col_3x3x3(h_ndhwc.astype(jnp.bfloat16))          # (m, k)

    w2d = jnp.transpose(w_oidhw, (2, 3, 4, 1, 0)).reshape(k, cout)
    w2d = _pad_cols(w2d, cp).astype(jnp.bfloat16)                  # (k, cp)

    tm = _pick_tile_rows(m, k * 2 + cp * 4)
    nb = pl.cdiv(m, tm)
    mp = nb * tm
    patches = _pad_rows(patches, mp)

    # ---- pass 1: conv matmul + per-tile partial moments ----
    conv, psum, psq = pl.pallas_call(
        _conv_stats_kernel,
        out_shape=(
            jax.ShapeDtypeStruct((mp, cp), jnp.float32),
            jax.ShapeDtypeStruct((nb, 1, cp), jnp.float32),
            jax.ShapeDtypeStruct((nb, 1, cp), jnp.float32),
        ),
        grid=(nb,),
        in_specs=[
            pl.BlockSpec((tm, k), lambda i: (i, 0)),
            pl.BlockSpec((k, cp), lambda i: (0, 0)),
        ],
        out_specs=(
            pl.BlockSpec((tm, cp), lambda i: (i, 0)),
            pl.BlockSpec((1, 1, cp), lambda i: (i, 0, 0)),
            pl.BlockSpec((1, 1, cp), lambda i: (i, 0, 0)),
        ),
        compiler_params=_compiler_params(),
    )(patches, w2d)

    # ---- finalize batch statistics (tiny, O(Cout)) ----
    # Zero-padded rows contribute exactly 0 to both sums (no conv bias), so
    # dividing by the real voxel count m gives the true batch moments.
    total = jnp.sum(psum[:, 0, :], axis=0)
    totsq = jnp.sum(psq[:, 0, :], axis=0)
    mean = total / m
    var = jnp.maximum(totsq / m - mean * mean, 0.0)
    gamma_p = _pad_cols(gamma[None, :], cp)
    beta_p = _pad_cols(beta[None, :], cp)
    scale = gamma_p * lax.rsqrt(var[None, :] + EPS)
    shift = beta_p - mean[None, :] * scale

    # ---- pass 2: normalize + ReLU, tiled elementwise ----
    out = pl.pallas_call(
        _scale_shift_relu_kernel,
        out_shape=jax.ShapeDtypeStruct((mp, cp), jnp.float32),
        grid=(nb,),
        in_specs=[
            pl.BlockSpec((tm, cp), lambda i: (i, 0)),
            pl.BlockSpec((1, cp), lambda i: (0, 0)),
            pl.BlockSpec((1, cp), lambda i: (0, 0)),
        ],
        out_specs=pl.BlockSpec((tm, cp), lambda i: (i, 0)),
        compiler_params=_compiler_params(),
    )(conv, scale, shift)

    return out[:m, :cout].reshape(n, dd, hh, ww, cout)


# --------------------------------------------------------------------------- #
# Forward pass (wrapper = layout plumbing only)
# --------------------------------------------------------------------------- #
def decoder_block_forward(params, x, enc):
    # x:   (N, Cin,    D,  H,  W)   NCDHW (PyTorch convention)
    # enc: (N, Cin//2, De, He, We)
    n, cin, d, h, w = x.shape
    cup = cin // 2

    # ---- up: ConvTranspose3d(Cin, Cin//2, kernel=2, stride=2) ----
    m0 = n * d * h * w
    p0 = _round_up(cup * 8, LANE)                              # lane-dense cols
    x2d = jnp.transpose(x, (0, 2, 3, 4, 1)).reshape(m0, cin).astype(jnp.bfloat16)
    w_up = _pad_cols(params["w_up"].reshape(cin, cup * 8), p0).astype(jnp.bfloat16)
    b_up = _pad_cols(jnp.repeat(params["b_up"], 8)[None, :], p0)    # f32 (1, p0)
    y2d = matmul_bias(x2d, w_up, b_up)[:, :cup * 8]
    y = y2d.reshape(n, d, h, w, cup, 2, 2, 2)
    y = jnp.transpose(y, (0, 1, 5, 2, 6, 3, 7, 4))             # (N,D,2,H,2,W,2,C)
    up = y.reshape(n, 2 * d, 2 * h, 2 * w, cup)

    # ---- F.pad to encoder spatial size + channel concat (XLA plumbing) ----
    # TODO(synk): fold these extra HBM passes into the conv1 patch construction.
    enc_ndhwc = jnp.transpose(enc, (0, 2, 3, 4, 1))
    de, he, we = enc_ndhwc.shape[1:4]
    dz, dyy, dxx = de - 2 * d, he - 2 * h, we - 2 * w
    up = jnp.pad(
        up,
        ((0, 0),
         (dz // 2, dz - dz // 2),
         (dyy // 2, dyy - dyy // 2),
         (dxx // 2, dxx - dxx // 2),
         (0, 0)),
    )
    cat = jnp.concatenate([enc_ndhwc, up], axis=-1)            # (N, De, He, We, Cin)

    # ---- conv block: (Conv3d -> BN -> ReLU) x 2 ----
    h1 = conv3d_bn_relu(cat, params["w_c1"], params["g_bn1"], params["b_bn1"])
    h2 = conv3d_bn_relu(h1, params["w_c2"], params["g_bn2"], params["b_bn2"])
    return jnp.transpose(h2, (0, 4, 1, 2, 3))                  # back to NCDHW


# --------------------------------------------------------------------------- #
# Deterministic parameter init (shapes from the module's __init__)
# --------------------------------------------------------------------------- #
def init_params(key, in_channels, out_channels):
    cup = in_channels // 2
    ks = jax.random.split(key, 10)

    def rnd(k, shape, scale):
        return scale * jax.random.normal(k, shape, dtype=jnp.float32)

    return dict(
        w_up=rnd(ks[0], (in_channels, cup, 2, 2, 2), 0.2),
        b_up=rnd(ks[1], (cup,), 0.1),
        w_c1=rnd(ks[2], (out_channels, in_channels, 3, 3, 3), 0.1),
        b_c1=rnd(ks[3], (out_channels,), 0.1),      # cancelled by train-mode BN
        g_bn1=1.0 + 0.1 * jax.random.normal(ks[4], (out_channels,), dtype=jnp.float32),
        b_bn1=rnd(ks[5], (out_channels,), 0.1),
        w_c2=rnd(ks[6], (out_channels, out_channels, 3, 3, 3), 0.1),
        b_c2=rnd(ks[7], (out_channels,), 0.1),      # cancelled by train-mode BN
        g_bn2=1.0 + 0.1 * jax.random.normal(ks[8], (out_channels,), dtype=jnp.float32),
        b_bn2=rnd(ks[9], (out_channels,), 0.1),
    )


# --------------------------------------------------------------------------- #
# Pure-JAX reference (PyTorch semantics, bf16 matmul inputs like the kernels)
# --------------------------------------------------------------------------- #
def reference_forward(params, x, enc):
    n, cin, d, h, w = x.shape
    cup = cin // 2
    up = jnp.einsum("ncdhw,coxyz->nodxhywz",
                    x.astype(jnp.bfloat16), params["w_up"].astype(jnp.bfloat16),
                    preferred_element_type=jnp.float32)
    up = up.reshape(n, cup, 2 * d, 2 * h, 2 * w) + params["b_up"][None, :, None, None, None]
    de, he, we = enc.shape[2:]
    dz, dyy, dxx = de - 2 * d, he - 2 * h, we - 2 * w
    up = jnp.pad(
        up,
        ((0, 0), (0, 0),
         (dz // 2, dz - dz // 2),
         (dyy // 2, dyy - dyy // 2),
         (dxx // 2, dxx - dxx // 2)),
    )
    hcur = jnp.concatenate([enc, up], axis=1)
    for wi, bi, gi, bti in (("w_c1", "b_c1", "g_bn1", "b_bn1"),
                            ("w_c2", "b_c2", "g_bn2", "b_bn2")):
        conv = lax.conv_general_dilated(
            hcur.astype(jnp.bfloat16), params[wi].astype(jnp.bfloat16),
            (1, 1, 1), ((1, 1), (1, 1), (1, 1)),
            dimension_numbers=("NCDHW", "OIDHW", "NCDHW"),
            preferred_element_type=jnp.float32,
        )
        conv = conv + params[bi][None, :, None, None, None]
        mean = jnp.mean(conv, axis=(0, 2, 3, 4), keepdims=True)
        var = jnp.mean((conv - mean) ** 2, axis=(0, 2, 3, 4), keepdims=True)
        hcur = (conv - mean) * lax.rsqrt(var + EPS)
        hcur = hcur * params[gi][None, :, None, None, None] + params[bti][None, :, None, None, None]
        hcur = jnp.maximum(hcur, 0.0)
    return hcur


# --------------------------------------------------------------------------- #
if __name__ == "__main__":
    in_channels, out_channels = 8, 8
    N, D, H, W = 2, 4, 4, 4            # x spatial; upsampled to 8^3
    De, He, We = 10, 10, 10            # encoder spatial (exercises the F.pad path)

    key = jax.random.PRNGKey(0)
    kp, kx, ke = jax.random.split(key, 3)
    params = init_params(kp, in_channels, out_channels)
    x = jax.random.normal(kx, (N, in_channels, D, H, W), dtype=jnp.float32)
    enc = jax.random.normal(ke, (N, in_channels // 2, De, He, We), dtype=jnp.float32)

    out = jax.jit(decoder_block_forward)(params, x, enc)
    out = jax.block_until_ready(out)

    assert out.shape == (N, out_channels, De, He, We), out.shape
    ref = reference_forward(params, x, enc)
    max_err = float(jnp.max(jnp.abs(out - ref)))
    if max_err > 2e-2:   # bf16 MXU operands -> bf16-appropriate tolerance
        raise AssertionError(f"mismatch vs reference, max_err={max_err}")
    print("KERNEL_OK")
</pallas_src>

<mosaic_0001>
module attributes {stable_mosaic.version = 11 : i64} {
  func.func @_matmul_bias_kernel(%arg0: i32, %arg1: memref<128x8xbf16, #tpu.memory_space<vmem>>, %arg2: memref<8x128xbf16, #tpu.memory_space<vmem>>, %arg3: memref<1x128xf32, #tpu.memory_space<vmem>>, %arg4: memref<128x128xf32, #tpu.memory_space<vmem>>) attributes {dimension_semantics = [#tpu.dimension_semantics<parallel>], iteration_bounds = array<i64: 1>, scalar_prefetch = 0 : i64, scratch_operands = 0 : i64, tpu.core_type = #tpu.core_type<tc>, window_params = [{transform_indices = @transform_0, window_bounds = array<i64: 128, 8>}, {pipeline_mode = #tpu.pipeline_mode<synchronous>, transform_indices = @transform_1, window_bounds = array<i64: 8, 128>}, {pipeline_mode = #tpu.pipeline_mode<synchronous>, transform_indices = @transform_2, window_bounds = array<i64: 1, 128>}, {transform_indices = @transform_3, window_bounds = array<i64: 128, 128>}]} {
    %c0 = arith.constant 0 : index
    %c0_0 = arith.constant 0 : index
    %0 = vector.load %arg1[%c0, %c0_0] : memref<128x8xbf16, #tpu.memory_space<vmem>>, vector<128x8xbf16>
    %c0_1 = arith.constant 0 : index
    %c0_2 = arith.constant 0 : index
    %1 = vector.load %arg2[%c0_1, %c0_2] : memref<8x128xbf16, #tpu.memory_space<vmem>>, vector<8x128xbf16>
    %cst = arith.constant dense<0.000000e+00> : vector<128x128xf32>
    %2 = tpu.matmul %0, %1, %cst {dimension_numbers = #tpu.dot_dimension_numbers<[1], [0], [0], [1], [0, 0, 1, 1], [], []>} : vector<128x8xbf16>, vector<8x128xbf16>, vector<128x128xf32> -> vector<128x128xf32>
    %c0_3 = arith.constant 0 : index
    %c0_4 = arith.constant 0 : index
    %3 = vector.load %arg3[%c0_3, %c0_4] : memref<1x128xf32, #tpu.memory_space<vmem>>, vector<1x128xf32>
    %4 = vector.broadcast %3 : vector<1x128xf32> to vector<128x128xf32>
    %5 = arith.addf %2, %4 : vector<128x128xf32>
    %c0_5 = arith.constant 0 : index
    %c0_6 = arith.constant 0 : index
    %6 = vector.load %arg4[%c0_5, %c0_6] : memref<128x128xf32, #tpu.memory_space<vmem>>, vector<128x128xf32>
    tpu.vector_store %arg4[%c0_5, %c0_6], %5 {strides = array<i32>} : memref<128x128xf32, #tpu.memory_space<vmem>>, vector<128x128xf32>,
    return
  }
  func.func @transform_0(%arg0: i32) -> (i32, i32) {
    %c0_i32 = arith.constant 0 : i32
    %c0_i32_0 = arith.constant 0 : i32
    return %arg0, %c0_i32 : i32, i32
  }
  func.func @transform_1(%arg0: i32) -> (i32, i32) {
    %c0_i32 = arith.constant 0 : i32
    %c0_i32_0 = arith.constant 0 : i32
    %c0_i32_1 = arith.constant 0 : i32
    return %c0_i32, %c0_i32_0 : i32, i32
  }
  func.func @transform_2(%arg0: i32) -> (i32, i32) {
    %c0_i32 = arith.constant 0 : i32
    %c0_i32_0 = arith.constant 0 : i32
    %c0_i32_1 = arith.constant 0 : i32
    return %c0_i32, %c0_i32_0 : i32, i32
  }
  func.func @transform_3(%arg0: i32) -> (i32, i32) {
    %c0_i32 = arith.constant 0 : i32
    %c0_i32_0 = arith.constant 0 : i32
    return %arg0, %c0_i32 : i32, i32
  }
}

module attributes {stable_mosaic.version = 11 : i64} {
  func.func @_conv_stats_kernel(%arg0: i32, %arg1: memref<1024x216xbf16, #tpu.memory_space<vmem>>, %arg2: memref<216x128xbf16, #tpu.memory_space<vmem>>, %arg3: memref<1024x128xf32, #tpu.memory_space<vmem>>, %arg4: memref<1x1x128xf32, #tpu.memory_space<vmem>>, %arg5: memref<1x1x128xf32, #tpu.memory_space<vmem>>) attributes {dimension_semantics = [#tpu.dimension_semantics<parallel>], iteration_bounds = array<i64: 2>, scalar_prefetch = 0 : i64, scratch_operands = 0 : i64, tpu.core_type = #tpu.core_type<tc>, window_params = [{transform_indices = @transform_0, window_bounds = array<i64: 1024, 216>}, {pipeline_mode = #tpu.pipeline_mode<synchronous>, transform_indices = @transform_1, window_bounds = array<i64: 216, 128>}, {transform_indices = @transform_2, window_bounds = array<i64: 1024, 128>}, {transform_indices = @transform_3, window_bounds = array<i64: 1, 1, 128>}, {transform_indices = @transform_4, window_bounds = array<i64: 1, 1, 128>}]} {
    %c0 = arith.constant 0 : index
    %c0_0 = arith.constant 0 : index
    %0 = vector.load %arg1[%c0, %c0_0] : memref<1024x216xbf16, #tpu.memory_space<vmem>>, vector<1024x216xbf16>
    %c0_1 = arith.constant 0 : index
    %c0_2 = arith.constant 0 : index
    %1 = vector.load %arg2[%c0_1, %c0_2] : memref<216x128xbf16, #tpu.memory_space<vmem>>, vector<216x128xbf16>
    %cst = arith.constant dense<0.000000e+00> : vector<1024x128xf32>
    %2 = tpu.matmul %0, %1, %cst {dimension_numbers = #tpu.dot_dimension_numbers<[1], [0], [0], [1], [0, 0, 1, 1], [], []>} : vector<1024x216xbf16>, vector<216x128xbf16>, vector<1024x128xf32> -> vector<1024x128xf32>
    %c0_3 = arith.constant 0 : index
    %c0_4 = arith.constant 0 : index
    %3 = vector.load %arg3[%c0_3, %c0_4] : memref<1024x128xf32, #tpu.memory_space<vmem>>, vector<1024x128xf32>
    tpu.vector_store %arg3[%c0_3, %c0_4], %2 {strides = array<i32>} : memref<1024x128xf32, #tpu.memory_space<vmem>>, vector<1024x128xf32>,
    %cst_5 = arith.constant dense<0.000000e+00> : vector<128xf32>
    %4 = vector.multi_reduction <add>, %2, %cst_5 [0] : vector<1024x128xf32> to vector<128xf32>
    %5 = vector.shape_cast %4 : vector<128xf32> to vector<1x128xf32>
    %c0_6 = arith.constant 0 : index
    %c0_7 = arith.constant 0 : index
    %c0_8 = arith.constant 0 : index
    %6 = vector.load %arg4[%c0_6, %c0_7, %c0_8] : memref<1x1x128xf32, #tpu.memory_space<vmem>>, vector<1x1x128xf32>
    %7 = vector.shape_cast %6 : vector<1x1x128xf32> to vector<1x128xf32>
    %8 = vector.shape_cast %5 : vector<1x128xf32> to vector<1x1x128xf32>
    tpu.vector_store %arg4[%c0_6, %c0_7, %c0_8], %8 {strides = array<i32>} : memref<1x1x128xf32, #tpu.memory_space<vmem>>, vector<1x1x128xf32>,
    %9 = arith.mulf %2, %2 : vector<1024x128xf32>
    %cst_9 = arith.constant dense<0.000000e+00> : vector<128xf32>
    %10 = vector.multi_reduction <add>, %9, %cst_9 [0] : vector<1024x128xf32> to vector<128xf32>
    %11 = vector.shape_cast %10 : vector<128xf32> to vector<1x128xf32>
    %c0_10 = arith.constant 0 : index
    %c0_11 = arith.constant 0 : index
    %c0_12 = arith.constant 0 : index
    %12 = vector.load %arg5[%c0_10, %c0_11, %c0_12] : memref<1x1x128xf32, #tpu.memory_space<vmem>>, vector<1x1x128xf32>
    %13 = vector.shape_cast %12 : vector<1x1x128xf32> to vector<1x128xf32>
    %14 = vector.shape_cast %11 : vector<1x128xf32> to vector<1x1x128xf32>
    tpu.vector_store %arg5[%c0_10, %c0_11, %c0_12], %14 {strides = array<i32>} : memref<1x1x128xf32, #tpu.memory_space<vmem>>, vector<1x1x128xf32>,
    return
  }
  func.func @transform_0(%arg0: i32) -> (i32, i32) {
    %c0_i32 = arith.constant 0 : i32
    %c0_i32_0 = arith.constant 0 : i32
    return %arg0, %c0_i32 : i32, i32
  }
  func.func @transform_1(%arg0: i32) -> (i32, i32) {
    %c0_i32 = arith.constant 0 : i32
    %c0_i32_0 = arith.constant 0 : i32
    %c0_i32_1 = arith.constant 0 : i32
    return %c0_i32, %c0_i32_0 : i32, i32
  }
  func.func @transform_2(%arg0: i32) -> (i32, i32) {
    %c0_i32 = arith.constant 0 : i32
    %c0_i32_0 = arith.constant 0 : i32
    return %arg0, %c0_i32 : i32, i32
  }
  func.func @transform_3(%arg0: i32) -> (i32, i32, i32) {
    %c0_i32 = arith.constant 0 : i32
    %c0_i32_0 = arith.constant 0 : i32
    %c0_i32_1 = arith.constant 0 : i32
    return %arg0, %c0_i32, %c0_i32_0 : i32, i32, i32
  }
  func.func @transform_4(%arg0: i32) -> (i32, i32, i32) {
    %c0_i32 = arith.constant 0 : i32
    %c0_i32_0 = arith.constant 0 : i32
    %c0_i32_1 = arith.constant 0 : i32
    return %arg0, %c0_i32, %c0_i32_0 : i32, i32, i32
  }
}

module attributes {stable_mosaic.version = 11 : i64} {
  func.func @_scale_shift_relu_kernel(%arg0: i32, %arg1: memref<1024x128xf32, #tpu.memory_space<vmem>>, %arg2: memref<1x128xf32, #tpu.memory_space<vmem>>, %arg3: memref<1x128xf32, #tpu.memory_space<vmem>>, %arg4: memref<1024x128xf32, #tpu.memory_space<vmem>>) attributes {dimension_semantics = [#tpu.dimension_semantics<parallel>], iteration_bounds = array<i64: 2>, scalar_prefetch = 0 : i64, scratch_operands = 0 : i64, tpu.core_type = #tpu.core_type<tc>, window_params = [{transform_indices = @transform_0, window_bounds = array<i64: 1024, 128>}, {pipeline_mode = #tpu.pipeline_mode<synchronous>, transform_indices = @transform_1, window_bounds = array<i64: 1, 128>}, {pipeline_mode = #tpu.pipeline_mode<synchronous>, transform_indices = @transform_2, window_bounds = array<i64: 1, 128>}, {transform_indices = @transform_3, window_bounds = array<i64: 1024, 128>}]} {
    %c0 = arith.constant 0 : index
    %c0_0 = arith.constant 0 : index
    %0 = vector.load %arg1[%c0, %c0_0] : memref<1024x128xf32, #tpu.memory_space<vmem>>, vector<1024x128xf32>
    %c0_1 = arith.constant 0 : index
    %c0_2 = arith.constant 0 : index
    %1 = vector.load %arg2[%c0_1, %c0_2] : memref<1x128xf32, #tpu.memory_space<vmem>>, vector<1x128xf32>
    %2 = vector.broadcast %1 : vector<1x128xf32> to vector<1024x128xf32>
    %3 = arith.mulf %0, %2 : vector<1024x128xf32>
    %c0_3 = arith.constant 0 : index
    %c0_4 = arith.constant 0 : index
    %4 = vector.load %arg3[%c0_3, %c0_4] : memref<1x128xf32, #tpu.memory_space<vmem>>, vector<1x128xf32>
    %5 = vector.broadcast %4 : vector<1x128xf32> to vector<1024x128xf32>
    %6 = arith.addf %3, %5 : vector<1024x128xf32>
    %cst = arith.constant 0.000000e+00 : f32
    %7 = vector.broadcast %cst : f32 to vector<1024x128xf32>
    %8 = arith.maximumf %6, %7 : vector<1024x128xf32>
    %c0_5 = arith.constant 0 : index
    %c0_6 = arith.constant 0 : index
    %9 = vector.load %arg4[%c0_5, %c0_6] : memref<1024x128xf32, #tpu.memory_space<vmem>>, vector<1024x128xf32>
    tpu.vector_store %arg4[%c0_5, %c0_6], %8 {strides = array<i32>} : memref<1024x128xf32, #tpu.memory_space<vmem>>, vector<1024x128xf32>,
    return
  }
  func.func @transform_0(%arg0: i32) -> (i32, i32) {
    %c0_i32 = arith.constant 0 : i32
    %c0_i32_0 = arith.constant 0 : i32
    return %arg0, %c0_i32 : i32, i32
  }
  func.func @transform_1(%arg0: i32) -> (i32, i32) {
    %c0_i32 = arith.constant 0 : i32
    %c0_i32_0 = arith.constant 0 : i32
    %c0_i32_1 = arith.constant 0 : i32
    return %c0_i32, %c0_i32_0 : i32, i32
  }
  func.func @transform_2(%arg0: i32) -> (i32, i32) {
    %c0_i32 = arith.constant 0 : i32
    %c0_i32_0 = arith.constant 0 : i32
    %c0_i32_1 = arith.constant 0 : i32
    return %c0_i32, %c0_i32_0 : i32, i32
  }
  func.func @transform_3(%arg0: i32) -> (i32, i32) {
    %c0_i32 = arith.constant 0 : i32
    %c0_i32_0 = arith.constant 0 : i32
    return %arg0, %c0_i32 : i32, i32
  }
}

</mosaic_0001>

<bundles_post_ra>
// kernel: decoder_block_forward.5
= control target key start
LH: loop header
LB: loop body
LE: loop exit
PB: predicated region body
PF: predicated region fallthrough
CT: control target
= control target key end

     0   :  { %vm104_vm0 = vcmask 1043456   ;;  %vm79_vm1 = vcmask 64512   ;;  %s387_s1 = inlined_call_operand.vmem [shape: bf16[8,128], index: 1, kind: input, shape index: {}]   ;;  %s388_s0 = inlined_call_operand.vmem [shape: bf16[128,8], index: 0, kind: input, shape index: {}]   ;;  %s389_s2 = inlined_call_operand.vmem [shape: f32[1,128], index: 2, kind: input, shape index: {}]   ;;  %s390_s3 = inlined_call_operand.vmem [shape: f32[128,128], index: 3, kind: output, shape index: {}]  }
   0x1   :  { %v31_v0 = vld [vmem:[%s387_s1] sm:$0xf]  ;;  %v275_v4 = vld [vmem:[%s388_s0 + $0x8] sm:$0xff]   ;;  %v277_v6 = vld [vmem:[%s388_s0 + $0x10] sm:$0xff]  }
   0x2   :  { %271 = vmatprep.subr.msk.bf16.mxu0 %vm104_vm0, %v31_v0  ;;  %272 = vmatprep.subr.msk.bf16.mxu1 %vm104_vm0, %v31_v0  ;;  %v106_v1 = vsel %vm104_vm0, %v31_v0, 0  ;;  %v273_v2 = vld [vmem:[%s388_s0] sm:$0xff]   ;;  %v276_v5 = vld [vmem:[%s388_s0 + $0x28] sm:$0xff]   ;;  %v278_v7 = vld [vmem:[%s388_s0 + $0x30] sm:$0xff]  }
   0x3   :  { %252 = vmatpush3.bf16.msra.mxu0 %v106_v1  ;;  %270 = vmatpush3.bf16.msra.mxu1 %v106_v1  ;;  %v274_v3 = vld [vmem:[%s388_s0 + $0x20] sm:$0xff]   ;;  %v279_v8 = vld [vmem:[%s388_s0 + $0x18] sm:$0xff]  }
   0x4   :  { %253 = vmatprep.mubr.msk.bf16.mxu0 %vm79_vm1, %v273_v2  ;;  %261 = vmatprep.mubr.msk.bf16.mxu1 %vm79_vm1, %v274_v3  ;;  %v280_v9 = vld [vmem:[%s388_s0 + $0x38] sm:$0xff]   ;;  %v225_v10 = vld [vmem:[%s389_s2] ss:$0 sm:$0xff] }
   0x6   :  { %254 = vmatmul.mubr.msk.bf16.vlgmr.msra.gmra.mrb[0].mxu0 %vm79_vm1, %v275_v4  ;;  %262 = vmatmul.mubr.msk.bf16.vlgmr.msra.gmra.mrb[0].mxu1 %vm79_vm1, %v276_v5 }
   0x7   :  { %257 = vmatprep.mubr.msk.bf16.mxu0 %vm79_vm1, %v277_v6  ;;  %265 = vmatprep.mubr.msk.bf16.mxu1 %vm79_vm1, %v278_v7 }
   0xe   :  { %258 = vmatmul.mubr.msk.bf16.gmra.mrb[4].mxu0 %vm79_vm1, %v279_v8  ;;  %266 = vmatmul.mubr.msk.bf16.gmra.mrb[4].mxu1 %vm79_vm1, %v280_v9 }
  0xd9   :  { %v255_v11 = vpop.f32.mrb[0].mxu0  ;;  %v263_v13 = vpop.f32.mrb[0].mxu1 }
  0xda   :  { %v151_v12 = vadd.f32 %v255_v11, %v225_v10  ;;  %v142_v14 = vpop.f32.mrb[1].mxu0  ;;  %v183_v15 = vadd.f32 %v263_v13, %v225_v10  ;;  %v174_v17 = vpop.f32.mrb[1].mxu1 }
  0xdb   :  { %v143_v16 = vadd.f32 %v225_v10, %v142_v14  ;;  %v256_v18 = vpop.f32.mrb[2].mxu0  ;;  %v175_v19 = vadd.f32 %v225_v10, %v174_v17  ;;  %v264_v21 = vpop.f32.mrb[2].mxu1 }
  0xdc   :  { %207 = vst [vmem:[%s390_s3 + $0x10] sm:$0xff] %v151_v12  ;;  %v154_v20 = vadd.f32 %v256_v18, %v225_v10  ;;  %v145_v22 = vpop.f32.mrb[3].mxu0  ;;  %215 = vst [vmem:[%s390_s3 + $0x50] sm:$0xff] %v183_v15  ;;  %v186_v23 = vadd.f32 %v264_v21, %v225_v10  ;;  %v177_v25 = vpop.f32.mrb[3].mxu1 }
  0xdd   :  { %205 = vst [vmem:[%s390_s3] sm:$0xff] %v143_v16  ;;  %v146_v24 = vadd.f32 %v225_v10, %v145_v22  ;;  %213 = vst [vmem:[%s390_s3 + $0x40] sm:$0xff] %v175_v19  ;;  %v178_v26 = vadd.f32 %v225_v10, %v177_v25 }
  0xde   :  { %208 = vst [vmem:[%s390_s3 + $0x18] sm:$0xff] %v154_v20  ;;  %216 = vst [vmem:[%s390_s3 + $0x58] sm:$0xff] %v186_v23 }
  0xdf   :  { %206 = vst [vmem:[%s390_s3 + $0x8] sm:$0xff] %v146_v24  ;;  %214 = vst [vmem:[%s390_s3 + $0x48] sm:$0xff] %v178_v26 }
  0xe1   :  { %v259_v27 = vpop.f32.mrb[4].mxu0  ;;  %v267_v29 = vpop.f32.mrb[4].mxu1 }
  0xe2   :  { %v167_v28 = vadd.f32 %v259_v27, %v225_v10  ;;  %v158_v30 = vpop.f32.mrb[5].mxu0  ;;  %v199_v31 = vadd.f32 %v267_v29, %v225_v10  ;;  %v190_v33 = vpop.f32.mrb[5].mxu1 }
  0xe3   :  { %v159_v32 = vadd.f32 %v225_v10, %v158_v30  ;;  %v260_v34 = vpop.f32.mrb[6].mxu0  ;;  %v191_v35 = vadd.f32 %v225_v10, %v190_v33  ;;  %v268_v37 = vpop.f32.mrb[6].mxu1 }
  0xe4   :  { %211 = vst [vmem:[%s390_s3 + $0x30] sm:$0xff] %v167_v28  ;;  %v170_v36 = vadd.f32 %v260_v34, %v225_v10  ;;  %v161_v38 = vpop.f32.mrb[7].mxu0  ;;  %219 = vst [vmem:[%s390_s3 + $0x70] sm:$0xff] %v199_v31  ;;  %v202_v39 = vadd.f32 %v268_v37, %v225_v10  ;;  %v193_v41 = vpop.f32.mrb[7].mxu1 }
  0xe5   :  { %209 = vst [vmem:[%s390_s3 + $0x20] sm:$0xff] %v159_v32  ;;  %v162_v40 = vadd.f32 %v225_v10, %v161_v38  ;;  %217 = vst [vmem:[%s390_s3 + $0x60] sm:$0xff] %v191_v35  ;;  %v194_v42 = vadd.f32 %v225_v10, %v193_v41 }
  0xe6   :  { %212 = vst [vmem:[%s390_s3 + $0x38] sm:$0xff] %v170_v36  ;;  %220 = vst [vmem:[%s390_s3 + $0x78] sm:$0xff] %v202_v39 }
  0xe7   :  { %210 = vst [vmem:[%s390_s3 + $0x28] sm:$0xff] %v162_v40  ;;  %218 = vst [vmem:[%s390_s3 + $0x68] sm:$0xff] %v194_v42 }

// kernel: decoder_block_forward.6
= control target key start
LH: loop header
LB: loop body
LE: loop exit
PB: predicated region body
PF: predicated region fallthrough
CT: control target
= control target key end

     0   :  { %s2912_s15 = smov 0   ;;  %s3675_s0 = inlined_call_operand.vmem [shape: bf16[2048,216], index: 0, kind: input, shape index: {}]   ;;  %s3676_s1 = inlined_call_operand.vmem [shape: bf16[216,128], index: 1, kind: input, shape index: {}]   ;;  %s3677_s2 = inlined_call_operand.vmem [shape: f32[2048,128], index: 2, kind: output, shape index: {0}]   ;;  %s3678_s3 = inlined_call_operand.vmem [shape: f32[2,1,128], index: 3, kind: output, shape index: {1}]   ;;  %s3679_s4 = inlined_call_operand.vmem [shape: f32[2,1,128], index: 4, kind: output, shape index: {2}]  }
   0x1 LB: > { %s2918_s16 = sadd.s32 4294967295, %s2884_s15   ;;  %p2410_p0 = scmp.ge.s32.totalorder %s2884_s15, 1  ;;  %s2884_s15 = sphi %s2912_s15, %s15_s15  }
   0x2   : > { %p169_p1 = scmp.lt.s32.totalorder %s2884_s15, 3 }
   0x4   : > { %p170_p2 = pnand %p2410_p0, %p169_p1 }
   0x6   : > { %173 = sbr.rel (%p170_p2) target bundleno = 677 (0x2a5), region = 28 }
   0xd   : > { %v2662_v0 = vld [vmem:[%s3676_s1] sm:$0xff]   ;;  %v2886_v1 = vmov 0   ;;  %v2663_v2 = vld [vmem:[%s3676_s1 + $0x8] sm:$0xff]   ;;  %s2411_s21 = sshll.u32 %s2918_s16, 7  ;;  %v2664_v3 = vld [vmem:[%s3676_s1 + $0x10] sm:$0xff]   ;;  %vm1034_vm0 = vcmask 719872  }
   0xe   : > { %1231 = vmatprep.subr.bf16.mxu0 %v2886_v1  ;;  %2625 = vmatprep.subr.bf16.mxu1 %v2886_v1  ;;  %p203_p3 = scmp.lt.s32.totalorder %s2411_s21, 255  ;;  %v2665_v4 = vld [vmem:[%s3676_s1 + $0x18] sm:$0xff]   ;;  %v2666_v5 = vld [vmem:[%s3676_s1 + $0x20] sm:$0xff]   ;;  %v2667_v7 = vld [vmem:[%s3676_s1 + $0x28] sm:$0xff]   ;;  %vm1227_vm1 = vcmask 1043456   ;;  %p215_p4 = scmp.lt.s32.totalorder %s2918_s16, 1 }
   0xf   : > { %1232 = vmatpush1.bf16.msra.mxu0 %v2662_v0  ;;  %2639 = vmatpush1.bf16.msra.mxu1 %v2662_v0  ;;  %v2668_v8 = vld [vmem:[%s3676_s1 + $0x30] sm:$0xff]   ;;  %v2669_v9 = vld [vmem:[%s3676_s1 + $0x38] sm:$0xff]   ;;  %v2670_v10 = vld [vmem:[%s3676_s1 + $0x40] sm:$0xff]  }
  0x10   : > { %1233 = vmatprep.subr.bf16.mxu0 %v2886_v1  ;;  %2626 = vmatprep.subr.bf16.mxu1 %v2886_v1  ;;  %s3737_s21 = smov (!%p203_p3, %s2411_s21), 255  ;;  %v2671_v11 = vld [vmem:[%s3676_s1 + $0x48] sm:$0xff]   ;;  %v2672_v12 = vld [vmem:[%s3676_s1 + $0x50] sm:$0xff]   ;;  %v2673_v13 = vld [vmem:[%s3676_s1 + $0x58] sm:$0xff]   ;;  %s3739_s16 = smov (!%p215_p4, %s2918_s16), 1 }
  0x11   : > { %s2624_s24 = sshll.u32 %s3737_s21, 3  ;;  %v2674_v14 = vld [vmem:[%s3676_s1 + $0x60] sm:$0xff]   ;;  %v2675_v15 = vld [vmem:[%s3676_s1 + $0x68] ss:$0 sps:$4 sm:$0xff]   ;;  %s220_s8 = scalar_lea.vmem %s3679_s4, %s3739_s16 }
  0x12   : > { %s2950_s29 = scalar_lea.vmem %s3675_s0, %s2624_s24  ;;  %v1229_v17 = vsel %vm1227_vm1, %v2675_v15, 0  ;;  %s3171_s5 = scalar_lea.vmem %s3677_s2, %s2624_s24 }
  0x13   : > { %1234 = vmatpush1.bf16.msra.mxu0 %v2663_v2  ;;  %2640 = vmatpush1.bf16.msra.mxu1 %v2663_v2  ;;  %v2678_v6 = vld [vmem:[%s2950_s29 + $0x4] ss:$8 sps:$4 sm:$0xff]   ;;  %v2676_v18 = vld [vmem:[%s2950_s29] ss:$8 sps:$4 sm:$0xff]   ;;  %v2679_v20 = vld [vmem:[%s2950_s29 + $0x14] ss:$8 sps:$4 sm:$0xff]  }
  0x14   : > { %1235 = vmatprep.subr.bf16.mxu0 %v2886_v1  ;;  %2627 = vmatprep.subr.bf16.mxu1 %v2886_v1  ;;  %v2726_v16 = vld [vmem:[%s2950_s29 + $0x204] ss:$8 sps:$4 sm:$0xff]   ;;  %v2724_v19 = vld [vmem:[%s2950_s29 + $0x200] ss:$8 sps:$4 sm:$0xff]   ;;  %v2730_v21 = vld [vmem:[%s2950_s29 + $0x214] ss:$8 sps:$4 sm:$0xff]  }
  0x15   : > { %2558 = vmatprep.mubr.msk.bf16.mxu0 %vm1034_vm0, %v2678_v6  ;;  %2590 = vmatprep.mubr.msk.bf16.mxu1 %vm1034_vm0, %v2726_v16  ;;  %v2681_v22 = vld [vmem:[%s2950_s29 + $0x10] ss:$8 sps:$4 sm:$0xff]   ;;  %v2682_v24 = vld [vmem:[%s2950_s29 + $0x24] ss:$8 sps:$4 sm:$0xff]   ;;  %v2684_v26 = vld [vmem:[%s2950_s29 + $0x20] ss:$8 sps:$4 sm:$0xff]  }
  0x16   : > { %v2732_v23 = vld [vmem:[%s2950_s29 + $0x210] ss:$8 sps:$4 sm:$0xff]   ;;  %v2736_v25 = vld [vmem:[%s2950_s29 + $0x224] ss:$8 sps:$4 sm:$0xff]   ;;  %v2738_v27 = vld [vmem:[%s2950_s29 + $0x220] ss:$8 sps:$4 sm:$0xff]  }
  0x17   : > { %1236 = vmatpush1.bf16.msra.mxu0 %v2664_v3  ;;  %2641 = vmatpush1.bf16.msra.mxu1 %v2664_v3  ;;  %v2685_v28 = vld [vmem:[%s2950_s29 + $0x34] ss:$8 sps:$4 sm:$0xff]   ;;  %v2687_v30 = vld [vmem:[%s2950_s29 + $0x30] ss:$8 sps:$4 sm:$0xff]   ;;  %v2688_v32 = vld [vmem:[%s2950_s29 + $0x44] ss:$8 sps:$4 sm:$0xff]  }
  0x18   : > { %1237 = vmatprep.subr.bf16.mxu0 %v2886_v1  ;;  %2628 = vmatprep.subr.bf16.mxu1 %v2886_v1  ;;  %v2742_v29 = vld [vmem:[%s2950_s29 + $0x234] ss:$8 sps:$4 sm:$0xff]   ;;  %v2744_v31 = vld [vmem:[%s2950_s29 + $0x230] ss:$8 sps:$4 sm:$0xff]   ;;  %v2748_v33 = vld [vmem:[%s2950_s29 + $0x244] ss:$8 sps:$4 sm:$0xff]  }
  0x19   : > { %v2690_v34 = vld [vmem:[%s2950_s29 + $0x40] ss:$8 sps:$4 sm:$0xff]   ;;  %v2691_v36 = vld [vmem:[%s2950_s29 + $0x54] ss:$8 sps:$4 sm:$0xff]   ;;  %v2693_v38 = vld [vmem:[%s2950_s29 + $0x50] ss:$8 sps:$4 sm:$0xff]  }
  0x1a   : > { %v2750_v35 = vld [vmem:[%s2950_s29 + $0x240] ss:$8 sps:$4 sm:$0xff]   ;;  %v2754_v37 = vld [vmem:[%s2950_s29 + $0x254] ss:$8 sps:$4 sm:$0xff]   ;;  %v2756_v39 = vld [vmem:[%s2950_s29 + $0x250] ss:$8 sps:$4 sm:$0xff]  }
  0x1b   : > { %1238 = vmatpush1.bf16.msra.mxu0 %v2665_v4  ;;  %2642 = vmatpush1.bf16.msra.mxu1 %v2665_v4  ;;  %v2694_v40 = vld [vmem:[%s2950_s29 + $0x64] ss:$8 sps:$4 sm:$0xff]   ;;  %v2696_v42 = vld [vmem:[%s2950_s29 + $0x60] ss:$8 sps:$4 sm:$0xff]   ;;  %v2697_v44 = vld [vmem:[%s2950_s29 + $0x74] ss:$8 sps:$4 sm:$0xff]  }
  0x1c   : > { %1239 = vmatprep.subr.bf16.mxu0 %v2886_v1  ;;  %2629 = vmatprep.subr.bf16.mxu1 %v2886_v1  ;;  %v2760_v41 = vld [vmem:[%s2950_s29 + $0x264] ss:$8 sps:$4 sm:$0xff]   ;;  %v2762_v43 = vld [vmem:[%s2950_s29 + $0x260] ss:$8 sps:$4 sm:$0xff]   ;;  %v2766_v45 = vld [vmem:[%s2950_s29 + $0x274] ss:$8 sps:$4 sm:$0xff]  }
  0x1d   : > { %v2699_v46 = vld [vmem:[%s2950_s29 + $0x70] ss:$8 sps:$4 sm:$0xff]   ;;  %v2700_v48 = vld [vmem:[%s2950_s29 + $0x84] ss:$8 sps:$4 sm:$0xff]   ;;  %v2702_v50 = vld [vmem:[%s2950_s29 + $0x80] ss:$8 sps:$4 sm:$0xff]  }
  0x1e   : > { %v2768_v47 = vld [vmem:[%s2950_s29 + $0x270] ss:$8 sps:$4 sm:$0xff]   ;;  %v2772_v49 = vld [vmem:[%s2950_s29 + $0x284] ss:$8 sps:$4 sm:$0xff]   ;;  %v2774_v51 = vld [vmem:[%s2950_s29 + $0x280] ss:$8 sps:$4 sm:$0xff]  }
  0x1f   : > { %1240 = vmatpush1.bf16.msra.mxu0 %v2666_v5  ;;  %2643 = vmatpush1.bf16.msra.mxu1 %v2666_v5  ;;  %v2703_v52 = vld [vmem:[%s2950_s29 + $0x94] ss:$8 sps:$4 sm:$0xff]   ;;  %v2705_v54 = vld [vmem:[%s2950_s29 + $0x90] ss:$8 sps:$4 sm:$0xff]   ;;  %v2706_v56 = vld [vmem:[%s2950_s29 + $0xa4] ss:$8 sps:$4 sm:$0xff]  }
  0x20   : > { %1241 = vmatprep.subr.bf16.mxu0 %v2886_v1  ;;  %2630 = vmatprep.subr.bf16.mxu1 %v2886_v1  ;;  %v2778_v53 = vld [vmem:[%s2950_s29 + $0x294] ss:$8 sps:$4 sm:$0xff]   ;;  %v2780_v55 = vld [vmem:[%s2950_s29 + $0x290] ss:$8 sps:$4 sm:$0xff]   ;;  %v2784_v57 = vld [vmem:[%s2950_s29 + $0x2a4] ss:$8 sps:$4 sm:$0xff]  }
  0x21   : > { %v2708_v58 = vld [vmem:[%s2950_s29 + $0xa0] ss:$8 sps:$4 sm:$0xff]   ;;  %v2709_v60 = vld [vmem:[%s2950_s29 + $0xb4] ss:$8 sps:$4 sm:$0xff]   ;;  %v2711_v62 = vld [vmem:[%s2950_s29 + $0xb0] ss:$8 sps:$4 sm:$0xff]  }
  0x22   : > { %v2786_v59 = vld [vmem:[%s2950_s29 + $0x2a0] ss:$8 sps:$4 sm:$0xff]   ;;  %v2790_v61 = vld [vmem:[%s2950_s29 + $0x2b4] ss:$8 sps:$4 sm:$0xff]   ;;  %v2792_v63 = vld [vmem:[%s2950_s29 + $0x2b0] ss:$8 sps:$4 sm:$0xff]  }
  0x23   : > { %1242 = vmatpush1.bf16.msra.mxu0 %v2667_v7  ;;  %2644 = vmatpush1.bf16.msra.mxu1 %v2667_v7  ;;  %v2712_v0 = vld [vmem:[%s2950_s29 + $0xc4] ss:$8 sps:$4 sm:$0xff]   ;;  %v2714_v2 = vld [vmem:[%s2950_s29 + $0xc0] ss:$8 sps:$4 sm:$0xff]   ;;  %v2715_v4 = vld [vmem:[%s2950_s29 + $0xd4] ss:$8 sps:$4 sm:$0xff]  }
  0x24   : > { %1243 = vmatprep.subr.bf16.mxu0 %v2886_v1  ;;  %2631 = vmatprep.subr.bf16.mxu1 %v2886_v1  ;;  %v2798_v3 = vld [vmem:[%s2950_s29 + $0x2c0] ss:$8 sps:$4 sm:$0xff]   ;;  %v2802_v5 = vld [vmem:[%s2950_s29 + $0x2d4] ss:$8 sps:$4 sm:$0xff]   ;;  %v2717_v6 = vld [vmem:[%s2950_s29 + $0xd0] ss:$8 sps:$4 sm:$0xff]  }
  0x25   : > { %v2804_v7 = vld [vmem:[%s2950_s29 + $0x2d0] ss:$8 sps:$4 sm:$0xff]   ;;  %v2727_v16 = vld [vmem:[%s2950_s29 + $0x104] ss:$8 sps:$4 sm:$0xff]  }
  0x26   : > { %v2816_v15 = vld [vmem:[%s2950_s29 + $0x2f0] ss:$8 sps:$4 sm:$0xff]  }
  0x27   : > { %1244 = vmatpush1.bf16.msra.mxu0 %v2668_v8  ;;  %2645 = vmatpush1.bf16.msra.mxu1 %v2668_v8  ;;  %v2718_v8 = vld [vmem:[%s2950_s29 + $0xe4] ss:$8 sps:$4 sm:$0xff]  }
  0x28   : > { %1245 = vmatprep.subr.bf16.mxu0 %v2886_v1  ;;  %2632 = vmatprep.subr.bf16.mxu1 %v2886_v1 }
  0x2b   : > { %1246 = vmatpush1.bf16.msra.mxu0 %v2669_v9  ;;  %2646 = vmatpush1.bf16.msra.mxu1 %v2669_v9  ;;  %v2808_v9 = vld [vmem:[%s2950_s29 + $0x2e4] ss:$8 sps:$4 sm:$0xff]  }
  0x2c   : > { %1247 = vmatprep.subr.bf16.mxu0 %v2886_v1  ;;  %2633 = vmatprep.subr.bf16.mxu1 %v2886_v1 }
  0x2f   : > { %1248 = vmatpush1.bf16.msra.mxu0 %v2670_v10  ;;  %2647 = vmatpush1.bf16.msra.mxu1 %v2670_v10  ;;  %v2720_v10 = vld [vmem:[%s2950_s29 + $0xe0] ss:$8 sps:$4 sm:$0xff]  }
  0x30   : > { %1249 = vmatprep.subr.bf16.mxu0 %v2886_v1  ;;  %2634 = vmatprep.subr.bf16.mxu1 %v2886_v1 }
  0x33   : > { %1250 = vmatpush1.bf16.msra.mxu0 %v2671_v11  ;;  %2648 = vmatpush1.bf16.msra.mxu1 %v2671_v11  ;;  %v2810_v11 = vld [vmem:[%s2950_s29 + $0x2e0] ss:$8 sps:$4 sm:$0xff]  }
  0x34   : > { %1251 = vmatprep.subr.bf16.mxu0 %v2886_v1  ;;  %2635 = vmatprep.subr.bf16.mxu1 %v2886_v1 }
  0x37   : > { %1252 = vmatpush1.bf16.msra.mxu0 %v2672_v12  ;;  %2649 = vmatpush1.bf16.msra.mxu1 %v2672_v12  ;;  %v2721_v12 = vld [vmem:[%s2950_s29 + $0xf4] ss:$8 sps:$4 sm:$0xff]  }
  0x38   : > { %1253 = vmatprep.subr.bf16.mxu0 %v2886_v1  ;;  %2636 = vmatprep.subr.bf16.mxu1 %v2886_v1 }
  0x3b   : > { %1254 = vmatpush1.bf16.msra.mxu0 %v2673_v13  ;;  %2650 = vmatpush1.bf16.msra.mxu1 %v2673_v13  ;;  %v2814_v13 = vld [vmem:[%s2950_s29 + $0x2f4] ss:$8 sps:$4 sm:$0xff]  }
  0x3c   : > { %1255 = vmatprep.subr.bf16.mxu0 %v2886_v1  ;;  %2637 = vmatprep.subr.bf16.mxu1 %v2886_v1 }
  0x3f   : > { %1256 = vmatpush1.bf16.msra.mxu0 %v2674_v14  ;;  %2651 = vmatpush1.bf16.msra.mxu1 %v2674_v14  ;;  %v2723_v14 = vld [vmem:[%s2950_s29 + $0xf0] ss:$8 sps:$4 sm:$0xff]  }
  0x40   : > { %1257 = vmatprep.subr.bf16.mxu0 %v2886_v1  ;;  %2638 = vmatprep.subr.bf16.mxu1 %v2886_v1  ;;  %v2796_v1 = vld [vmem:[%s2950_s29 + $0x2c4] ss:$8 sps:$4 sm:$0xff]  }
  0x43   : > { %1258 = vmatpush1.bf16.msra.mxu0 %v1229_v17  ;;  %2652 = vmatpush1.bf16.msra.mxu1 %v1229_v17  ;;  %v2820_v17 = vld [vmem:[%s2950_s29 + $0x304] ss:$8 sps:$4 sm:$0xff]  }
  0x46   : > { %1264 = vmatmul.mubr.bf16.vlgmr.msra.gmra.mrb[0].mxu0 %v2676_v18  ;;  %1520 = vmatmul.mubr.bf16.vlgmr.msra.gmra.mrb[0].mxu1 %v2724_v19  ;;  %v2729_v18 = vld [vmem:[%s2950_s29 + $0x100] ss:$8 sps:$4 sm:$0xff]  }
  0x47   : > { %2559 = vmatprep.mubr.msk.bf16.mxu0 %vm1034_vm0, %v2679_v20  ;;  %2591 = vmatprep.mubr.msk.bf16.mxu1 %vm1034_vm0, %v2730_v21  ;;  %v2822_v19 = vld [vmem:[%s2950_s29 + $0x300] ss:$8 sps:$4 sm:$0xff]   ;;  %v2733_v20 = vld [vmem:[%s2950_s29 + $0x114] ss:$8 sps:$4 sm:$0xff]  }
  0x48   : > { %v2823_v21 = vld [vmem:[%s2950_s29 + $0x314] ss:$8 sps:$4 sm:$0xff]  }
  0x4e   : > { %1272 = vmatmul.mubr.bf16.gmra.mrb[4].mxu0 %v2681_v22  ;;  %1528 = vmatmul.mubr.bf16.gmra.mrb[4].mxu1 %v2732_v23  ;;  %v2735_v22 = vld [vmem:[%s2950_s29 + $0x110] ss:$8 sps:$4 sm:$0xff]  }
  0x4f   : > { %2560 = vmatprep.mubr.msk.bf16.mxu0 %vm1034_vm0, %v2682_v24  ;;  %2592 = vmatprep.mubr.msk.bf16.mxu1 %vm1034_vm0, %v2736_v25  ;;  %v2825_v23 = vld [vmem:[%s2950_s29 + $0x310] ss:$8 sps:$4 sm:$0xff]   ;;  %v2739_v24 = vld [vmem:[%s2950_s29 + $0x124] ss:$8 sps:$4 sm:$0xff]  }
  0x50   : > { %v2826_v25 = vld [vmem:[%s2950_s29 + $0x324] ss:$8 sps:$4 sm:$0xff]  }
  0x56   : > { %1280 = vmatmul.mubr.bf16.gmra.mrb[8].mxu0 %v2684_v26  ;;  %1536 = vmatmul.mubr.bf16.gmra.mrb[8].mxu1 %v2738_v27  ;;  %v2741_v26 = vld [vmem:[%s2950_s29 + $0x120] ss:$8 sps:$4 sm:$0xff]  }
  0x57   : > { %2561 = vmatprep.mubr.msk.bf16.mxu0 %vm1034_vm0, %v2685_v28  ;;  %2593 = vmatprep.mubr.msk.bf16.mxu1 %vm1034_vm0, %v2742_v29  ;;  %v2828_v27 = vld [vmem:[%s2950_s29 + $0x320] ss:$8 sps:$4 sm:$0xff]   ;;  %v2745_v28 = vld [vmem:[%s2950_s29 + $0x134] ss:$8 sps:$4 sm:$0xff]  }
  0x58   : > { %v2829_v29 = vld [vmem:[%s2950_s29 + $0x334] ss:$8 sps:$4 sm:$0xff]  }
  0x5e   : > { %1288 = vmatmul.mubr.bf16.gmra.mrb[12].mxu0 %v2687_v30  ;;  %1544 = vmatmul.mubr.bf16.gmra.mrb[12].mxu1 %v2744_v31  ;;  %v2747_v30 = vld [vmem:[%s2950_s29 + $0x130] ss:$8 sps:$4 sm:$0xff]  }
  0x5f   : > { %2562 = vmatprep.mubr.msk.bf16.mxu0 %vm1034_vm0, %v2688_v32  ;;  %2594 = vmatprep.mubr.msk.bf16.mxu1 %vm1034_vm0, %v2748_v33  ;;  %v2831_v31 = vld [vmem:[%s2950_s29 + $0x330] ss:$8 sps:$4 sm:$0xff]   ;;  %v2751_v32 = vld [vmem:[%s2950_s29 + $0x144] ss:$8 sps:$4 sm:$0xff]  }
  0x60   : > { %v2832_v33 = vld [vmem:[%s2950_s29 + $0x344] ss:$8 sps:$4 sm:$0xff]  }
  0x66   : > { %1296 = vmatmul.mubr.bf16.gmra.mrb[16].mxu0 %v2690_v34  ;;  %1552 = vmatmul.mubr.bf16.gmra.mrb[16].mxu1 %v2750_v35  ;;  %v2753_v34 = vld [vmem:[%s2950_s29 + $0x140] ss:$8 sps:$4 sm:$0xff]  }
  0x67   : > { %2563 = vmatprep.mubr.msk.bf16.mxu0 %vm1034_vm0, %v2691_v36  ;;  %2595 = vmatprep.mubr.msk.bf16.mxu1 %vm1034_vm0, %v2754_v37  ;;  %v2834_v35 = vld [vmem:[%s2950_s29 + $0x340] ss:$8 sps:$4 sm:$0xff]   ;;  %v2757_v36 = vld [vmem:[%s2950_s29 + $0x154] ss:$8 sps:$4 sm:$0xff]  }
  0x68   : > { %v2835_v37 = vld [vmem:[%s2950_s29 + $0x354] ss:$8 sps:$4 sm:$0xff]  }
  0x6e   : > { %1304 = vmatmul.mubr.bf16.gmra.mrb[20].mxu0 %v2693_v38  ;;  %1560 = vmatmul.mubr.bf16.gmra.mrb[20].mxu1 %v2756_v39  ;;  %v2759_v38 = vld [vmem:[%s2950_s29 + $0x150] ss:$8 sps:$4 sm:$0xff]  }
  0x6f   : > { %2564 = vmatprep.mubr.msk.bf16.mxu0 %vm1034_vm0, %v2694_v40  ;;  %2596 = vmatprep.mubr.msk.bf16.mxu1 %vm1034_vm0, %v2760_v41  ;;  %v2837_v39 = vld [vmem:[%s2950_s29 + $0x350] ss:$8 sps:$4 sm:$0xff]   ;;  %v2763_v40 = vld [vmem:[%s2950_s29 + $0x164] ss:$8 sps:$4 sm:$0xff]  }
  0x70   : > { %v2838_v41 = vld [vmem:[%s2950_s29 + $0x364] ss:$8 sps:$4 sm:$0xff]  }
  0x76   : > { %1312 = vmatmul.mubr.bf16.gmra.mrb[24].mxu0 %v2696_v42  ;;  %1568 = vmatmul.mubr.bf16.gmra.mrb[24].mxu1 %v2762_v43  ;;  %v2765_v42 = vld [vmem:[%s2950_s29 + $0x160] ss:$8 sps:$4 sm:$0xff]  }
  0x77   : > { %2565 = vmatprep.mubr.msk.bf16.mxu0 %vm1034_vm0, %v2697_v44  ;;  %2597 = vmatprep.mubr.msk.bf16.mxu1 %vm1034_vm0, %v2766_v45  ;;  %v2840_v43 = vld [vmem:[%s2950_s29 + $0x360] ss:$8 sps:$4 sm:$0xff]   ;;  %v2769_v44 = vld [vmem:[%s2950_s29 + $0x174] ss:$8 sps:$4 sm:$0xff]  }
  0x78   : > { %v2841_v45 = vld [vmem:[%s2950_s29 + $0x374] ss:$8 sps:$4 sm:$0xff]  }
  0x7e   : > { %1320 = vmatmul.mubr.bf16.gmra.mrb[28].mxu0 %v2699_v46  ;;  %1576 = vmatmul.mubr.bf16.gmra.mrb[28].mxu1 %v2768_v47  ;;  %v2771_v46 = vld [vmem:[%s2950_s29 + $0x170] ss:$8 sps:$4 sm:$0xff]  }
  0x7f   : > { %2566 = vmatprep.mubr.msk.bf16.mxu0 %vm1034_vm0, %v2700_v48  ;;  %2598 = vmatprep.mubr.msk.bf16.mxu1 %vm1034_vm0, %v2772_v49  ;;  %v2843_v47 = vld [vmem:[%s2950_s29 + $0x370] ss:$8 sps:$4 sm:$0xff]   ;;  %v2775_v48 = vld [vmem:[%s2950_s29 + $0x184] ss:$8 sps:$4 sm:$0xff]  }
  0x80   : > { %v2844_v49 = vld [vmem:[%s2950_s29 + $0x384] ss:$8 sps:$4 sm:$0xff]  }
  0x86   : > { %1328 = vmatmul.mubr.bf16.gmra.mrb[32].mxu0 %v2702_v50  ;;  %1584 = vmatmul.mubr.bf16.gmra.mrb[32].mxu1 %v2774_v51  ;;  %v2777_v50 = vld [vmem:[%s2950_s29 + $0x180] ss:$8 sps:$4 sm:$0xff]  }
  0x87   : > { %2567 = vmatprep.mubr.msk.bf16.mxu0 %vm1034_vm0, %v2703_v52  ;;  %2599 = vmatprep.mubr.msk.bf16.mxu1 %vm1034_vm0, %v2778_v53  ;;  %v2846_v51 = vld [vmem:[%s2950_s29 + $0x380] ss:$8 sps:$4 sm:$0xff]   ;;  %v2781_v52 = vld [vmem:[%s2950_s29 + $0x194] ss:$8 sps:$4 sm:$0xff]  }
  0x88   : > { %v2847_v53 = vld [vmem:[%s2950_s29 + $0x394] ss:$8 sps:$4 sm:$0xff]  }
  0x8e   : > { %1336 = vmatmul.mubr.bf16.gmra.mrb[36].mxu0 %v2705_v54  ;;  %1592 = vmatmul.mubr.bf16.gmra.mrb[36].mxu1 %v2780_v55  ;;  %v2783_v54 = vld [vmem:[%s2950_s29 + $0x190] ss:$8 sps:$4 sm:$0xff]  }
  0x8f   : > { %2568 = vmatprep.mubr.msk.bf16.mxu0 %vm1034_vm0, %v2706_v56  ;;  %2600 = vmatprep.mubr.msk.bf16.mxu1 %vm1034_vm0, %v2784_v57  ;;  %v2849_v55 = vld [vmem:[%s2950_s29 + $0x390] ss:$8 sps:$4 sm:$0xff]   ;;  %v2787_v56 = vld [vmem:[%s2950_s29 + $0x1a4] ss:$8 sps:$4 sm:$0xff]  }
  0x90   : > { %v2850_v57 = vld [vmem:[%s2950_s29 + $0x3a4] ss:$8 sps:$4 sm:$0xff]  }
  0x96   : > { %1344 = vmatmul.mubr.bf16.gmra.mrb[40].mxu0 %v2708_v58  ;;  %1600 = vmatmul.mubr.bf16.gmra.mrb[40].mxu1 %v2786_v59  ;;  %v2789_v58 = vld [vmem:[%s2950_s29 + $0x1a0] ss:$8 sps:$4 sm:$0xff]  }
  0x97   : > { %2569 = vmatprep.mubr.msk.bf16.mxu0 %vm1034_vm0, %v2709_v60  ;;  %2601 = vmatprep.mubr.msk.bf16.mxu1 %vm1034_vm0, %v2790_v61  ;;  %v2852_v59 = vld [vmem:[%s2950_s29 + $0x3a0] ss:$8 sps:$4 sm:$0xff]   ;;  %v2793_v60 = vld [vmem:[%s2950_s29 + $0x1b4] ss:$8 sps:$4 sm:$0xff]  }
  0x98   : > { %v2853_v61 = vld [vmem:[%s2950_s29 + $0x3b4] ss:$8 sps:$4 sm:$0xff]  }
  0x9e   : > { %1352 = vmatmul.mubr.bf16.gmra.mrb[44].mxu0 %v2711_v62  ;;  %1608 = vmatmul.mubr.bf16.gmra.mrb[44].mxu1 %v2792_v63 }
  0x9f   : > { %2570 = vmatprep.mubr.msk.bf16.mxu0 %vm1034_vm0, %v2712_v0  ;;  %2602 = vmatprep.mubr.msk.bf16.mxu1 %vm1034_vm0, %v2796_v1  ;;  %v2795_v1 = vld [vmem:[%s2950_s29 + $0x1b0] ss:$8 sps:$4 sm:$0xff]  }
  0xa6   : > { %1360 = vmatmul.mubr.bf16.gmra.mrb[48].mxu0 %v2714_v2  ;;  %1616 = vmatmul.mubr.bf16.gmra.mrb[48].mxu1 %v2798_v3  ;;  %v2855_v3 = vld [vmem:[%s2950_s29 + $0x3b0] ss:$8 sps:$4 sm:$0xff]  }
  0xa7   : > { %2571 = vmatprep.mubr.msk.bf16.mxu0 %vm1034_vm0, %v2715_v4  ;;  %2603 = vmatprep.mubr.msk.bf16.mxu1 %vm1034_vm0, %v2802_v5  ;;  %v2799_v5 = vld [vmem:[%s2950_s29 + $0x1c4] ss:$8 sps:$4 sm:$0xff]  }
  0xae   : > { %1368 = vmatmul.mubr.bf16.gmra.mrb[52].mxu0 %v2717_v6  ;;  %1624 = vmatmul.mubr.bf16.gmra.mrb[52].mxu1 %v2804_v7 }
  0xaf   : > { %2572 = vmatprep.mubr.msk.bf16.mxu0 %vm1034_vm0, %v2718_v8  ;;  %2604 = vmatprep.mubr.msk.bf16.mxu1 %vm1034_vm0, %v2808_v9 }
  0xb6   : > { %1376 = vmatmul.mubr.bf16.gmra.mrb[56].mxu0 %v2720_v10  ;;  %1632 = vmatmul.mubr.bf16.gmra.mrb[56].mxu1 %v2810_v11 }
  0xb7   : > { %2573 = vmatprep.mubr.msk.bf16.mxu0 %vm1034_vm0, %v2721_v12  ;;  %2605 = vmatprep.mubr.msk.bf16.mxu1 %vm1034_vm0, %v2814_v13  ;;  %v2856_v13 = vld [vmem:[%s2950_s29 + $0x3c4] ss:$8 sps:$4 sm:$0xff]  }
  0xbe   : > { %1384 = vmatmul.mubr.bf16.gmra.mrb[60].mxu0 %v2723_v14  ;;  %1640 = vmatmul.mubr.bf16.gmra.mrb[60].mxu1 %v2816_v15 }
  0xbf   : > { %2574 = vmatprep.mubr.msk.bf16.mxu0 %vm1034_vm0, %v2727_v16  ;;  %2606 = vmatprep.mubr.msk.bf16.mxu1 %vm1034_vm0, %v2820_v17 }
  0xc6   : > { %1392 = vmatmul.mubr.bf16.gmra.mrb[64].mxu0 %v2729_v18  ;;  %1648 = vmatmul.mubr.bf16.gmra.mrb[64].mxu1 %v2822_v19  ;;  %v2801_v19 = vld [vmem:[%s2950_s29 + $0x1c0] ss:$8 sps:$4 sm:$0xff]  }
  0xc7   : > { %2575 = vmatprep.mubr.msk.bf16.mxu0 %vm1034_vm0, %v2733_v20  ;;  %2607 = vmatprep.mubr.msk.bf16.mxu1 %vm1034_vm0, %v2823_v21  ;;  %v2858_v21 = vld [vmem:[%s2950_s29 + $0x3c0] ss:$8 sps:$4 sm:$0xff]  }
  0xce   : > { %1400 = vmatmul.mubr.bf16.gmra.mrb[68].mxu0 %v2735_v22  ;;  %1656 = vmatmul.mubr.bf16.gmra.mrb[68].mxu1 %v2825_v23  ;;  %v2805_v23 = vld [vmem:[%s2950_s29 + $0x1d4] ss:$8 sps:$4 sm:$0xff]  }
  0xcf   : > { %2576 = vmatprep.mubr.msk.bf16.mxu0 %vm1034_vm0, %v2739_v24  ;;  %2608 = vmatprep.mubr.msk.bf16.mxu1 %vm1034_vm0, %v2826_v25 }
  0xd6   : > { %1408 = vmatmul.mubr.bf16.gmra.mrb[72].mxu0 %v2741_v26  ;;  %1664 = vmatmul.mubr.bf16.gmra.mrb[72].mxu1 %v2828_v27 }
  0xd7   : > { %2577 = vmatprep.mubr.msk.bf16.mxu0 %vm1034_vm0, %v2745_v28  ;;  %2609 = vmatprep.mubr.msk.bf16.mxu1 %vm1034_vm0, %v2829_v29 }
  0xde   : > { %1416 = vmatmul.mubr.bf16.gmra.mrb[76].mxu0 %v2747_v30  ;;  %1672 = vmatmul.mubr.bf16.gmra.mrb[76].mxu1 %v2831_v31  ;;  %v2859_v31 = vld [vmem:[%s2950_s29 + $0x3d4] ss:$8 sps:$4 sm:$0xff]  }
  0xdf   : > { %2578 = vmatprep.mubr.msk.bf16.mxu0 %vm1034_vm0, %v2751_v32  ;;  %2610 = vmatprep.mubr.msk.bf16.mxu1 %vm1034_vm0, %v2832_v33 }
  0xe6   : > { %1424 = vmatmul.mubr.bf16.gmra.mrb[80].mxu0 %v2753_v34  ;;  %1680 = vmatmul.mubr.bf16.gmra.mrb[80].mxu1 %v2834_v35 }
  0xe7   : > { %2579 = vmatprep.mubr.msk.bf16.mxu0 %vm1034_vm0, %v2757_v36  ;;  %2611 = vmatprep.mubr.msk.bf16.mxu1 %vm1034_vm0, %v2835_v37  ;;  %v2807_v37 = vld [vmem:[%s2950_s29 + $0x1d0] ss:$8 sps:$4 sm:$0xff]  }
  0xee   : > { %1432 = vmatmul.mubr.bf16.gmra.mrb[84].mxu0 %v2759_v38  ;;  %1688 = vmatmul.mubr.bf16.gmra.mrb[84].mxu1 %v2837_v39  ;;  %v2861_v39 = vld [vmem:[%s2950_s29 + $0x3d0] ss:$8 sps:$4 sm:$0xff]  }
  0xef   : > { %2580 = vmatprep.mubr.msk.bf16.mxu0 %vm1034_vm0, %v2763_v40  ;;  %2612 = vmatprep.mubr.msk.bf16.mxu1 %vm1034_vm0, %v2838_v41  ;;  %v2811_v41 = vld [vmem:[%s2950_s29 + $0x1e4] ss:$8 sps:$4 sm:$0xff]  }
  0xf6   : > { %1440 = vmatmul.mubr.bf16.gmra.mrb[88].mxu0 %v2765_v42  ;;  %1696 = vmatmul.mubr.bf16.gmra.mrb[88].mxu1 %v2840_v43 }
  0xf7   : > { %2581 = vmatprep.mubr.msk.bf16.mxu0 %vm1034_vm0, %v2769_v44  ;;  %2613 = vmatprep.mubr.msk.bf16.mxu1 %vm1034_vm0, %v2841_v45 }
  0xfe   : > { %1448 = vmatmul.mubr.bf16.gmra.mrb[92].mxu0 %v2771_v46  ;;  %1704 = vmatmul.mubr.bf16.gmra.mrb[92].mxu1 %v2843_v47 }
  0xff   : > { %2582 = vmatprep.mubr.msk.bf16.mxu0 %vm1034_vm0, %v2775_v48  ;;  %2614 = vmatprep.mubr.msk.bf16.mxu1 %vm1034_vm0, %v2844_v49  ;;  %v2862_v49 = vld [vmem:[%s2950_s29 + $0x3e4] ss:$8 sps:$4 sm:$0xff]  }
 0x106   : > { %1456 = vmatmul.mubr.bf16.gmra.mrb[96].mxu0 %v2777_v50  ;;  %1712 = vmatmul.mubr.bf16.gmra.mrb[96].mxu1 %v2846_v51 }
 0x107   : > { %2583 = vmatprep.mubr.msk.bf16.mxu0 %vm1034_vm0, %v2781_v52  ;;  %2615 = vmatprep.mubr.msk.bf16.mxu1 %vm1034_vm0, %v2847_v53 }
 0x10e   : > { %1464 = vmatmul.mubr.bf16.gmra.mrb[100].mxu0 %v2783_v54  ;;  %1720 = vmatmul.mubr.bf16.gmra.mrb[100].mxu1 %v2849_v55  ;;  %v2813_v55 = vld [vmem:[%s2950_s29 + $0x1e0] ss:$8 sps:$4 sm:$0xff]  }
 0x10f   : > { %2584 = vmatprep.mubr.msk.bf16.mxu0 %vm1034_vm0, %v2787_v56  ;;  %2616 = vmatprep.mubr.msk.bf16.mxu1 %vm1034_vm0, %v2850_v57  ;;  %v2864_v57 = vld [vmem:[%s2950_s29 + $0x3e0] ss:$8 sps:$4 sm:$0xff]  }
 0x116   : > { %1472 = vmatmul.mubr.bf16.gmra.mrb[104].mxu0 %v2789_v58  ;;  %1728 = vmatmul.mubr.bf16.gmra.mrb[104].mxu1 %v2852_v59  ;;  %v2817_v59 = vld [vmem:[%s2950_s29 + $0x1f4] ss:$8 sps:$4 sm:$0xff]  }
 0x117   : > { %2585 = vmatprep.mubr.msk.bf16.mxu0 %vm1034_vm0, %v2793_v60  ;;  %2617 = vmatprep.mubr.msk.bf16.mxu1 %vm1034_vm0, %v2853_v61 }
 0x119   : > { %v1265_v62 = vpop.f32.mrb[0].mxu0  ;;  %v1521_v63 = vpop.f32.mrb[0].mxu1 }
 0x11a   : > { %1776 = vst [vmem:[%s3171_s5] sm:$0xff] %v1265_v62  ;;  %v1267_v0 = vpop.f32.mrb[1].mxu0  ;;  %1840 = vst [vmem:[%s3171_s5 + $0x200] sm:$0xff] %v1521_v63  ;;  %v1523_v2 = vpop.f32.mrb[1].mxu1  ;;  %v2038_v7 = vmul.f32 %v1265_v62, %v1265_v62 }
 0x11b   : > { %v1268_v4 = vpop.f32.mrb[2].mxu0  ;;  %v1524_v6 = vpop.f32.mrb[2].mxu1 }
 0x11c   : > { %1777 = vst [vmem:[%s3171_s5 + $0x8] sm:$0xff] %v1268_v4  ;;  %v1904_v8 = vadd.f32 %v1268_v4, %v1265_v62  ;;  %v2039_v9 = vmul.f32 %v1268_v4, %v1268_v4  ;;  %v1270_v10 = vpop.f32.mrb[3].mxu0  ;;  %1841 = vst [vmem:[%s3171_s5 + $0x208] sm:$0xff] %v1524_v6  ;;  %v1526_v11 = vpop.f32.mrb[3].mxu1 }
 0x11d   : > { %v2867_v11 = vld [vmem:[%s2950_s29 + $0x3f0] ss:$8 sps:$4 sm:$0xff]  }
 0x11e   : > { %v2166_v12 = vadd.f32 %v2039_v9, %v2038_v7  ;;  %1480 = vmatmul.mubr.bf16.gmra.mrb[108].mxu0 %v2795_v1  ;;  %1736 = vmatmul.mubr.bf16.gmra.mrb[108].mxu1 %v2855_v3  ;;  %v2865_v3 = vld [vmem:[%s2950_s29 + $0x3f4] ss:$8 sps:$4 sm:$0xff]   ;;  %v2819_v9 = vld [vmem:[%s2950_s29 + $0x1f0] ss:$8 sps:$4 sm:$0xff]   ;;  %s217_s29 = scalar_lea.vmem %s3678_s3, %s3739_s16 }
 0x11f   : > { %2586 = vmatprep.mubr.msk.bf16.mxu0 %vm1034_vm0, %v2799_v5  ;;  %2618 = vmatprep.mubr.msk.bf16.mxu1 %vm1034_vm0, %v2856_v13 }
 0x121   : > { %v1273_v14 = vpop.f32.mrb[4].mxu0  ;;  %v1529_v15 = vpop.f32.mrb[4].mxu1 }
 0x122   : > { %1778 = vst [vmem:[%s3171_s5 + $0x10] sm:$0xff] %v1273_v14  ;;  %v1905_v16 = vadd.f32 %v1904_v8, %v1273_v14  ;;  %v2040_v17 = vmul.f32 %v1273_v14, %v1273_v14  ;;  %v1275_v18 = vpop.f32.mrb[5].mxu0  ;;  %1842 = vst [vmem:[%s3171_s5 + $0x210] sm:$0xff] %v1529_v15  ;;  %v1531_v20 = vpop.f32.mrb[5].mxu1 }
 0x123   : > { %v1276_v22 = vpop.f32.mrb[6].mxu0  ;;  %v1532_v24 = vpop.f32.mrb[6].mxu1 }
 0x124   : > { %v2167_v25 = vadd.f32 %v2166_v12, %v2040_v17  ;;  %1779 = vst [vmem:[%s3171_s5 + $0x18] sm:$0xff] %v1276_v22  ;;  %v1906_v26 = vadd.f32 %v1905_v16, %v1276_v22  ;;  %v2041_v27 = vmul.f32 %v1276_v22, %v1276_v22  ;;  %v1278_v28 = vpop.f32.mrb[7].mxu0  ;;  %1843 = vst [vmem:[%s3171_s5 + $0x218] sm:$0xff] %v1532_v24  ;;  %v1534_v29 = vpop.f32.mrb[7].mxu1 }
 0x126   : > { %v2168_v30 = vadd.f32 %v2167_v25, %v2041_v27  ;;  %1488 = vmatmul.mubr.bf16.gmra.mrb[112].mxu0 %v2801_v19  ;;  %1744 = vmatmul.mubr.bf16.gmra.mrb[112].mxu1 %v2858_v21 }
 0x127   : > { %2587 = vmatprep.mubr.msk.bf16.mxu0 %vm1034_vm0, %v2805_v23  ;;  %2619 = vmatprep.mubr.msk.bf16.mxu1 %vm1034_vm0, %v2859_v31 }
 0x129   : > { %v1281_v32 = vpop.f32.mrb[8].mxu0  ;;  %v1537_v33 = vpop.f32.mrb[8].mxu1 }
 0x12a   : > { %1780 = vst [vmem:[%s3171_s5 + $0x20] sm:$0xff] %v1281_v32  ;;  %v1907_v34 = vadd.f32 %v1906_v26, %v1281_v32  ;;  %v2042_v35 = vmul.f32 %v1281_v32, %v1281_v32  ;;  %v1283_v36 = vpop.f32.mrb[9].mxu0  ;;  %1844 = vst [vmem:[%s3171_s5 + $0x220] sm:$0xff] %v1537_v33  ;;  %v1539_v38 = vpop.f32.mrb[9].mxu1 }
 0x12b   : > { %v1284_v40 = vpop.f32.mrb[10].mxu0  ;;  %v1540_v42 = vpop.f32.mrb[10].mxu1 }
 0x12c   : > { %v2169_v43 = vadd.f32 %v2168_v30, %v2042_v35  ;;  %1781 = vst [vmem:[%s3171_s5 + $0x28] sm:$0xff] %v1284_v40  ;;  %v1908_v44 = vadd.f32 %v1907_v34, %v1284_v40  ;;  %v2043_v45 = vmul.f32 %v1284_v40, %v1284_v40  ;;  %v1286_v46 = vpop.f32.mrb[11].mxu0  ;;  %1845 = vst [vmem:[%s3171_s5 + $0x228] sm:$0xff] %v1540_v42  ;;  %v1542_v47 = vpop.f32.mrb[11].mxu1 }
 0x12e   : > { %v2170_v48 = vadd.f32 %v2169_v43, %v2043_v45  ;;  %1496 = vmatmul.mubr.bf16.gmra.mrb[116].mxu0 %v2807_v37  ;;  %1752 = vmatmul.mubr.bf16.gmra.mrb[116].mxu1 %v2861_v39 }
 0x12f   : > { %2588 = vmatprep.mubr.msk.bf16.mxu0 %vm1034_vm0, %v2811_v41  ;;  %2620 = vmatprep.mubr.msk.bf16.mxu1 %vm1034_vm0, %v2862_v49 }
 0x131   : > { %v1289_v50 = vpop.f32.mrb[12].mxu0  ;;  %v1545_v51 = vpop.f32.mrb[12].mxu1 }
 0x132   : > { %1782 = vst [vmem:[%s3171_s5 + $0x30] sm:$0xff] %v1289_v50  ;;  %v1909_v52 = vadd.f32 %v1908_v44, %v1289_v50  ;;  %v2044_v53 = vmul.f32 %v1289_v50, %v1289_v50  ;;  %v1291_v54 = vpop.f32.mrb[13].mxu0  ;;  %1846 = vst [vmem:[%s3171_s5 + $0x230] sm:$0xff] %v1545_v51  ;;  %v1547_v56 = vpop.f32.mrb[13].mxu1 }
 0x133   : > { %v1292_v58 = vpop.f32.mrb[14].mxu0  ;;  %v1548_v60 = vpop.f32.mrb[14].mxu1 }
 0x134   : > { %v2171_v61 = vadd.f32 %v2170_v48, %v2044_v53  ;;  %1783 = vst [vmem:[%s3171_s5 + $0x38] sm:$0xff] %v1292_v58  ;;  %v1910_v62 = vadd.f32 %v1909_v52, %v1292_v58  ;;  %v2045_v63 = vmul.f32 %v1292_v58, %v1292_v58  ;;  %v1294_v0 = vpop.f32.mrb[15].mxu0  ;;  %1847 = vst [vmem:[%s3171_s5 + $0x238] sm:$0xff] %v1548_v60  ;;  %v1550_v1 = vpop.f32.mrb[15].mxu1 }
 0x136   : > { %v2172_v2 = vadd.f32 %v2171_v61, %v2045_v63  ;;  %1504 = vmatmul.mubr.bf16.gmra.mrb[120].mxu0 %v2813_v55  ;;  %1760 = vmatmul.mubr.bf16.gmra.mrb[120].mxu1 %v2864_v57 }
 0x137   : > { %2589 = vmatprep.mubr.msk.bf16.mxu0 %vm1034_vm0, %v2817_v59  ;;  %2621 = vmatprep.mubr.msk.bf16.mxu1 %vm1034_vm0, %v2865_v3 }
 0x139   : > { %v1297_v4 = vpop.f32.mrb[16].mxu0  ;;  %v1553_v5 = vpop.f32.mrb[16].mxu1 }
 0x13a   : > { %1784 = vst [vmem:[%s3171_s5 + $0x40] sm:$0xff] %v1297_v4  ;;  %v1911_v6 = vadd.f32 %v1910_v62, %v1297_v4  ;;  %v2046_v7 = vmul.f32 %v1297_v4, %v1297_v4  ;;  %v1299_v8 = vpop.f32.mrb[17].mxu0  ;;  %1848 = vst [vmem:[%s3171_s5 + $0x240] sm:$0xff] %v1553_v5  ;;  %v1555_v10 = vpop.f32.mrb[17].mxu1 }
 0x13b   : > { %v1300_v12 = vpop.f32.mrb[18].mxu0  ;;  %v1556_v13 = vpop.f32.mrb[18].mxu1 }
 0x13c   : > { %v2173_v14 = vadd.f32 %v2172_v2, %v2046_v7  ;;  %1785 = vst [vmem:[%s3171_s5 + $0x48] sm:$0xff] %v1300_v12  ;;  %v1912_v15 = vadd.f32 %v1911_v6, %v1300_v12  ;;  %v2047_v16 = vmul.f32 %v1300_v12, %v1300_v12  ;;  %v1302_v17 = vpop.f32.mrb[19].mxu0  ;;  %1849 = vst [vmem:[%s3171_s5 + $0x248] sm:$0xff] %v1556_v13  ;;  %v1558_v18 = vpop.f32.mrb[19].mxu1 }
 0x13e   : > { %v2174_v19 = vadd.f32 %v2173_v14, %v2047_v16  ;;  %1512 = vmatmul.mubr.bf16.gmra.mrb[124].mxu0 %v2819_v9  ;;  %1768 = vmatmul.mubr.bf16.gmra.mrb[124].mxu1 %v2867_v11 }
 0x141   : > { %v1305_v20 = vpop.f32.mrb[20].mxu0  ;;  %v3222_v21 = vpop.f32.mrb[20].mxu1 }
 0x142   : > { %1786 = vst [vmem:[%s3171_s5 + $0x50] sm:$0xff] %v1305_v20  ;;  %v1913_v22 = vadd.f32 %v1912_v15, %v1305_v20  ;;  %v2048_v23 = vmul.f32 %v1305_v20, %v1305_v20  ;;  %v1307_v24 = vpop.f32.mrb[21].mxu0  ;;  %1850 = vst [vmem:[%s3171_s5 + $0x250] sm:$0xff] %v3222_v21  ;;  %v1563_v25 = vpop.f32.mrb[21].mxu1 }
 0x143   : > { %v1308_v26 = vpop.f32.mrb[22].mxu0  ;;  %v3227_v27 = vpop.f32.mrb[22].mxu1 }
 0x144   : > { %v2175_v28 = vadd.f32 %v2174_v19, %v2048_v23  ;;  %1787 = vst [vmem:[%s3171_s5 + $0x58] sm:$0xff] %v1308_v26  ;;  %v1914_v29 = vadd.f32 %v1913_v22, %v1308_v26  ;;  %v2049_v30 = vmul.f32 %v1308_v26, %v1308_v26  ;;  %v1310_v31 = vpop.f32.mrb[23].mxu0  ;;  %1851 = vst [vmem:[%s3171_s5 + $0x258] sm:$0xff] %v3227_v27  ;;  %v1566_v32 = vpop.f32.mrb[23].mxu1 }
 0x146   : > { %v2176_v33 = vadd.f32 %v2175_v28, %v2049_v30 }
 0x149   : > { %v1313_v34 = vpop.f32.mrb[24].mxu0  ;;  %v3232_v35 = vpop.f32.mrb[24].mxu1 }
 0x14a   : > { %1788 = vst [vmem:[%s3171_s5 + $0x60] sm:$0xff] %v1313_v34  ;;  %v1915_v36 = vadd.f32 %v1914_v29, %v1313_v34  ;;  %v2050_v37 = vmul.f32 %v1313_v34, %v1313_v34  ;;  %v1315_v38 = vpop.f32.mrb[25].mxu0  ;;  %1852 = vst [vmem:[%s3171_s5 + $0x260] sm:$0xff] %v3232_v35  ;;  %v1571_v39 = vpop.f32.mrb[25].mxu1 }
 0x14b   : > { %v1316_v40 = vpop.f32.mrb[26].mxu0  ;;  %v3237_v41 = vpop.f32.mrb[26].mxu1 }
 0x14c   : > { %v2177_v42 = vadd.f32 %v2176_v33, %v2050_v37  ;;  %1789 = vst [vmem:[%s3171_s5 + $0x68] sm:$0xff] %v1316_v40  ;;  %v1916_v43 = vadd.f32 %v1915_v36, %v1316_v40  ;;  %v2051_v44 = vmul.f32 %v1316_v40, %v1316_v40  ;;  %v1318_v45 = vpop.f32.mrb[27].mxu0  ;;  %1853 = vst [vmem:[%s3171_s5 + $0x268] sm:$0xff] %v3237_v41  ;;  %v1574_v46 = vpop.f32.mrb[27].mxu1 }
 0x14e   : > { %v2178_v47 = vadd.f32 %v2177_v42, %v2051_v44 }
 0x151   : > { %v1321_v48 = vpop.f32.mrb[28].mxu0  ;;  %v3242_v49 = vpop.f32.mrb[28].mxu1 }
 0x152   : > { %1790 = vst [vmem:[%s3171_s5 + $0x70] sm:$0xff] %v1321_v48  ;;  %v1917_v50 = vadd.f32 %v1916_v43, %v1321_v48  ;;  %v2052_v51 = vmul.f32 %v1321_v48, %v1321_v48  ;;  %v1323_v52 = vpop.f32.mrb[29].mxu0  ;;  %1854 = vst [vmem:[%s3171_s5 + $0x270] sm:$0xff] %v3242_v49  ;;  %v1579_v53 = vpop.f32.mrb[29].mxu1 }
 0x153   : > { %v1324_v54 = vpop.f32.mrb[30].mxu0  ;;  %v3247_v55 = vpop.f32.mrb[30].mxu1 }
 0x154   : > { %v2179_v56 = vadd.f32 %v2178_v47, %v2052_v51  ;;  %1791 = vst [vmem:[%s3171_s5 + $0x78] sm:$0xff] %v1324_v54  ;;  %v1918_v57 = vadd.f32 %v1917_v50, %v1324_v54  ;;  %v2053_v58 = vmul.f32 %v1324_v54, %v1324_v54  ;;  %v1326_v59 = vpop.f32.mrb[31].mxu0  ;;  %1855 = vst [vmem:[%s3171_s5 + $0x278] sm:$0xff] %v3247_v55  ;;  %v1582_v60 = vpop.f32.mrb[31].mxu1 }
 0x156   : > { %v2180_v61 = vadd.f32 %v2179_v56, %v2053_v58 }
 0x159   : > { %v1329_v62 = vpop.f32.mrb[32].mxu0  ;;  %v3252_v63 = vpop.f32.mrb[32].mxu1 }
 0x15a   : > { %1792 = vst [vmem:[%s3171_s5 + $0x80] sm:$0xff] %v1329_v62  ;;  %v1919_v0 = vadd.f32 %v1918_v57, %v1329_v62  ;;  %v2054_v1 = vmul.f32 %v1329_v62, %v1329_v62  ;;  %v1331_v2 = vpop.f32.mrb[33].mxu0  ;;  %1856 = vst [vmem:[%s3171_s5 + $0x280] sm:$0xff] %v3252_v63  ;;  %v1587_v3 = vpop.f32.mrb[33].mxu1 }
 0x15b   : > { %v1332_v4 = vpop.f32.mrb[34].mxu0  ;;  %v3257_v5 = vpop.f32.mrb[34].mxu1 }
 0x15c   : > { %v2181_v6 = vadd.f32 %v2180_v61, %v2054_v1  ;;  %1793 = vst [vmem:[%s3171_s5 + $0x88] sm:$0xff] %v1332_v4  ;;  %v1920_v7 = vadd.f32 %v1919_v0, %v1332_v4  ;;  %v2055_v8 = vmul.f32 %v1332_v4, %v1332_v4  ;;  %v1334_v9 = vpop.f32.mrb[35].mxu0  ;;  %1857 = vst [vmem:[%s3171_s5 + $0x288] sm:$0xff] %v3257_v5  ;;  %v1590_v10 = vpop.f32.mrb[35].mxu1 }
 0x15e   : > { %v2182_v11 = vadd.f32 %v2181_v6, %v2055_v8 }
 0x161   : > { %v1337_v12 = vpop.f32.mrb[36].mxu0  ;;  %v3262_v13 = vpop.f32.mrb[36].mxu1 }
 0x162   : > { %1794 = vst [vmem:[%s3171_s5 + $0x90] sm:$0xff] %v1337_v12  ;;  %v1921_v14 = vadd.f32 %v1920_v7, %v1337_v12  ;;  %v2056_v15 = vmul.f32 %v1337_v12, %v1337_v12  ;;  %v1339_v16 = vpop.f32.mrb[37].mxu0  ;;  %1858 = vst [vmem:[%s3171_s5 + $0x290] sm:$0xff] %v3262_v13  ;;  %v1595_v17 = vpop.f32.mrb[37].mxu1 }
 0x163   : > { %v1340_v18 = vpop.f32.mrb[38].mxu0  ;;  %v3267_v19 = vpop.f32.mrb[38].mxu1 }
 0x164   : > { %v2183_v20 = vadd.f32 %v2182_v11, %v2056_v15  ;;  %1795 = vst [vmem:[%s3171_s5 + $0x98] sm:$0xff] %v1340_v18  ;;  %v1922_v22 = vadd.f32 %v1921_v14, %v1340_v18  ;;  %v2057_v23 = vmul.f32 %v1340_v18, %v1340_v18  ;;  %v1342_v24 = vpop.f32.mrb[39].mxu0  ;;  %1859 = vst [vmem:[%s3171_s5 + $0x298] sm:$0xff] %v3267_v19  ;;  %v1598_v25 = vpop.f32.mrb[39].mxu1 }
 0x166   : > { %v2184_v26 = vadd.f32 %v2183_v20, %v2057_v23 }
 0x169   : > { %v1345_v28 = vpop.f32.mrb[40].mxu0  ;;  %v3272_v29 = vpop.f32.mrb[40].mxu1 }
 0x16a   : > { %1796 = vst [vmem:[%s3171_s5 + $0xa0] sm:$0xff] %v1345_v28  ;;  %v1923_v30 = vadd.f32 %v1922_v22, %v1345_v28  ;;  %v2058_v31 = vmul.f32 %v1345_v28, %v1345_v28  ;;  %v1347_v32 = vpop.f32.mrb[41].mxu0  ;;  %1860 = vst [vmem:[%s3171_s5 + $0x2a0] sm:$0xff] %v3272_v29  ;;  %v1603_v33 = vpop.f32.mrb[41].mxu1 }
 0x16b   : > { %v1348_v34 = vpop.f32.mrb[42].mxu0  ;;  %v3277_v36 = vpop.f32.mrb[42].mxu1 }
 0x16c   : > { %v2185_v37 = vadd.f32 %v2184_v26, %v2058_v31  ;;  %1797 = vst [vmem:[%s3171_s5 + $0xa8] sm:$0xff] %v1348_v34  ;;  %v1924_v38 = vadd.f32 %v1923_v30, %v1348_v34  ;;  %v2059_v39 = vmul.f32 %v1348_v34, %v1348_v34  ;;  %v1350_v40 = vpop.f32.mrb[43].mxu0  ;;  %1861 = vst [vmem:[%s3171_s5 + $0x2a8] sm:$0xff] %v3277_v36  ;;  %v1606_v42 = vpop.f32.mrb[43].mxu1 }
 0x16e   : > { %v2186_v43 = vadd.f32 %v2185_v37, %v2059_v39 }
 0x171   : > { %v1353_v44 = vpop.f32.mrb[44].mxu0  ;;  %v3282_v45 = vpop.f32.mrb[44].mxu1 }
 0x172   : > { %1798 = vst [vmem:[%s3171_s5 + $0xb0] sm:$0xff] %v1353_v44  ;;  %v1925_v46 = vadd.f32 %v1924_v38, %v1353_v44  ;;  %v2060_v47 = vmul.f32 %v1353_v44, %v1353_v44  ;;  %v1355_v48 = vpop.f32.mrb[45].mxu0  ;;  %1862 = vst [vmem:[%s3171_s5 + $0x2b0] sm:$0xff] %v3282_v45  ;;  %v1611_v50 = vpop.f32.mrb[45].mxu1 }
 0x173   : > { %v1356_v51 = vpop.f32.mrb[46].mxu0  ;;  %v3287_v52 = vpop.f32.mrb[46].mxu1 }
 0x174   : > { %v2187_v53 = vadd.f32 %v2186_v43, %v2060_v47  ;;  %1799 = vst [vmem:[%s3171_s5 + $0xb8] sm:$0xff] %v1356_v51  ;;  %v1926_v54 = vadd.f32 %v1925_v46, %v1356_v51  ;;  %v2061_v56 = vmul.f32 %v1356_v51, %v1356_v51  ;;  %v1358_v57 = vpop.f32.mrb[47].mxu0  ;;  %1863 = vst [vmem:[%s3171_s5 + $0x2b8] sm:$0xff] %v3287_v52  ;;  %v1614_v58 = vpop.f32.mrb[47].mxu1 }
 0x176   : > { %v2188_v59 = vadd.f32 %v2187_v53, %v2061_v56 }
 0x179   : > { %v1361_v60 = vpop.f32.mrb[48].mxu0  ;;  %v3292_v61 = vpop.f32.mrb[48].mxu1 }
 0x17a   : > { %1800 = vst [vmem:[%s3171_s5 + $0xc0] sm:$0xff] %v1361_v60  ;;  %v1927_v62 = vadd.f32 %v1926_v54, %v1361_v60  ;;  %v2062_v0 = vmul.f32 %v1361_v60, %v1361_v60  ;;  %v1363_v1 = vpop.f32.mrb[49].mxu0  ;;  %1864 = vst [vmem:[%s3171_s5 + $0x2c0] sm:$0xff] %v3292_v61  ;;  %v1619_v2 = vpop.f32.mrb[49].mxu1 }
 0x17b   : > { %v1364_v3 = vpop.f32.mrb[50].mxu0  ;;  %v3297_v4 = vpop.f32.mrb[50].mxu1 }
 0x17c   : > { %v2189_v6 = vadd.f32 %v2188_v59, %v2062_v0  ;;  %1801 = vst [vmem:[%s3171_s5 + $0xc8] sm:$0xff] %v1364_v3  ;;  %v1928_v7 = vadd.f32 %v1927_v62, %v1364_v3  ;;  %v2063_v8 = vmul.f32 %v1364_v3, %v1364_v3  ;;  %v1366_v9 = vpop.f32.mrb[51].mxu0  ;;  %1865 = vst [vmem:[%s3171_s5 + $0x2c8] sm:$0xff] %v3297_v4  ;;  %v1622_v10 = vpop.f32.mrb[51].mxu1 }
 0x17e   : > { %v2190_v11 = vadd.f32 %v2189_v6, %v2063_v8 }
 0x181   : > { %v1369_v12 = vpop.f32.mrb[52].mxu0  ;;  %v3302_v14 = vpop.f32.mrb[52].mxu1 }
 0x182   : > { %1802 = vst [vmem:[%s3171_s5 + $0xd0] sm:$0xff] %v1369_v12  ;;  %v1929_v15 = vadd.f32 %v1928_v7, %v1369_v12  ;;  %v2064_v16 = vmul.f32 %v1369_v12, %v1369_v12  ;;  %v1371_v17 = vpop.f32.mrb[53].mxu0  ;;  %1866 = vst [vmem:[%s3171_s5 + $0x2d0] sm:$0xff] %v3302_v14  ;;  %v1627_v18 = vpop.f32.mrb[53].mxu1 }
 0x183   : > { %v1372_v20 = vpop.f32.mrb[54].mxu0  ;;  %v3307_v22 = vpop.f32.mrb[54].mxu1 }
 0x184   : > { %v2191_v23 = vadd.f32 %v2190_v11, %v2064_v16  ;;  %1803 = vst [vmem:[%s3171_s5 + $0xd8] sm:$0xff] %v1372_v20  ;;  %v1930_v24 = vadd.f32 %v1929_v15, %v1372_v20  ;;  %v2065_v25 = vmul.f32 %v1372_v20, %v1372_v20  ;;  %v1374_v26 = vpop.f32.mrb[55].mxu0  ;;  %1867 = vst [vmem:[%s3171_s5 + $0x2d8] sm:$0xff] %v3307_v22  ;;  %v1630_v28 = vpop.f32.mrb[55].mxu1 }
 0x186   : > { %v2192_v30 = vadd.f32 %v2191_v23, %v2065_v25 }
 0x189   : > { %v1377_v31 = vpop.f32.mrb[56].mxu0  ;;  %v3312_v32 = vpop.f32.mrb[56].mxu1 }
 0x18a   : > { %1804 = vst [vmem:[%s3171_s5 + $0xe0] sm:$0xff] %v1377_v31  ;;  %v1931_v33 = vadd.f32 %v1930_v24, %v1377_v31  ;;  %v2066_v34 = vmul.f32 %v1377_v31, %v1377_v31  ;;  %v1379_v37 = vpop.f32.mrb[57].mxu0  ;;  %1868 = vst [vmem:[%s3171_s5 + $0x2e0] sm:$0xff] %v3312_v32  ;;  %v1635_v38 = vpop.f32.mrb[57].mxu1 }
 0x18b   : > { %v1380_v39 = vpop.f32.mrb[58].mxu0  ;;  %v3317_v40 = vpop.f32.mrb[58].mxu1 }
 0x18c   : > { %v2193_v42 = vadd.f32 %v2192_v30, %v2066_v34  ;;  %1805 = vst [vmem:[%s3171_s5 + $0xe8] sm:$0xff] %v1380_v39  ;;  %v1932_v43 = vadd.f32 %v1931_v33, %v1380_v39  ;;  %v2067_v44 = vmul.f32 %v1380_v39, %v1380_v39  ;;  %v1382_v46 = vpop.f32.mrb[59].mxu0  ;;  %1869 = vst [vmem:[%s3171_s5 + $0x2e8] sm:$0xff] %v3317_v40  ;;  %v1638_v47 = vpop.f32.mrb[59].mxu1 }
 0x18e   : > { %v2194_v48 = vadd.f32 %v2193_v42, %v2067_v44 }
 0x191   : > { %v1385_v50 = vpop.f32.mrb[60].mxu0  ;;  %v3322_v51 = vpop.f32.mrb[60].mxu1 }
 0x192   : > { %1806 = vst [vmem:[%s3171_s5 + $0xf0] sm:$0xff] %v1385_v50  ;;  %v1933_v53 = vadd.f32 %v1932_v43, %v1385_v50  ;;  %v2068_v54 = vmul.f32 %v1385_v50, %v1385_v50  ;;  %v1387_v56 = vpop.f32.mrb[61].mxu0  ;;  %1870 = vst [vmem:[%s3171_s5 + $0x2f0] sm:$0xff] %v3322_v51  ;;  %v1643_v57 = vpop.f32.mrb[61].mxu1 }
 0x193   : > { %v1388_v58 = vpop.f32.mrb[62].mxu0  ;;  %v3327_v59 = vpop.f32.mrb[62].mxu1 }
 0x194   : > { %v2195_v60 = vadd.f32 %v2194_v48, %v2068_v54  ;;  %1807 = vst [vmem:[%s3171_s5 + $0xf8] sm:$0xff] %v1388_v58  ;;  %v1934_v62 = vadd.f32 %v1933_v53, %v1388_v58  ;;  %v2069_v0 = vmul.f32 %v1388_v58, %v1388_v58  ;;  %v1390_v1 = vpop.f32.mrb[63].mxu0  ;;  %1871 = vst [vmem:[%s3171_s5 + $0x2f8] sm:$0xff] %v3327_v59  ;;  %v1646_v2 = vpop.f32.mrb[63].mxu1 }
 0x196   : > { %v2196_v3 = vadd.f32 %v2195_v60, %v2069_v0 }
 0x199   : > { %v1393_v6 = vpop.f32.mrb[64].mxu0  ;;  %v3332_v7 = vpop.f32.mrb[64].mxu1 }
 0x19a   : > { %1808 = vst [vmem:[%s3171_s5 + $0x100] sm:$0xff] %v1393_v6  ;;  %v1935_v8 = vadd.f32 %v1934_v62, %v1393_v6  ;;  %v2070_v9 = vmul.f32 %v1393_v6, %v1393_v6  ;;  %v1395_v10 = vpop.f32.mrb[65].mxu0  ;;  %1872 = vst [vmem:[%s3171_s5 + $0x300] sm:$0xff] %v3332_v7  ;;  %v1651_v11 = vpop.f32.mrb[65].mxu1 }
 0x19b   : > { %v1396_v12 = vpop.f32.mrb[66].mxu0  ;;  %v3337_v15 = vpop.f32.mrb[66].mxu1 }
 0x19c   : > { %v2197_v16 = vadd.f32 %v2196_v3, %v2070_v9  ;;  %1809 = vst [vmem:[%s3171_s5 + $0x108] sm:$0xff] %v1396_v12  ;;  %v1936_v17 = vadd.f32 %v1935_v8, %v1396_v12  ;;  %v2071_v18 = vmul.f32 %v1396_v12, %v1396_v12  ;;  %v1398_v20 = vpop.f32.mrb[67].mxu0  ;;  %1873 = vst [vmem:[%s3171_s5 + $0x308] sm:$0xff] %v3337_v15  ;;  %v1654_v23 = vpop.f32.mrb[67].mxu1 }
 0x19e   : > { %v2198_v24 = vadd.f32 %v2197_v16, %v2071_v18 }
 0x1a1   : > { %v1401_v25 = vpop.f32.mrb[68].mxu0  ;;  %v3342_v26 = vpop.f32.mrb[68].mxu1 }
 0x1a2   : > { %1810 = vst [vmem:[%s3171_s5 + $0x110] sm:$0xff] %v1401_v25  ;;  %v1937_v28 = vadd.f32 %v1936_v17, %v1401_v25  ;;  %v2072_v30 = vmul.f32 %v1401_v25, %v1401_v25  ;;  %v1403_v31 = vpop.f32.mrb[69].mxu0  ;;  %1874 = vst [vmem:[%s3171_s5 + $0x310] sm:$0xff] %v3342_v26  ;;  %v1659_v33 = vpop.f32.mrb[69].mxu1 }
 0x1a3   : > { %v1404_v34 = vpop.f32.mrb[70].mxu0  ;;  %v3347_v37 = vpop.f32.mrb[70].mxu1 }
 0x1a4   : > { %v2199_v38 = vadd.f32 %v2198_v24, %v2072_v30  ;;  %1811 = vst [vmem:[%s3171_s5 + $0x118] sm:$0xff] %v1404_v34  ;;  %v1938_v39 = vadd.f32 %v1937_v28, %v1404_v34  ;;  %v2073_v42 = vmul.f32 %v1404_v34, %v1404_v34  ;;  %v1406_v43 = vpop.f32.mrb[71].mxu0  ;;  %1875 = vst [vmem:[%s3171_s5 + $0x318] sm:$0xff] %v3347_v37  ;;  %v1662_v44 = vpop.f32.mrb[71].mxu1 }
 0x1a6   : > { %v2200_v46 = vadd.f32 %v2199_v38, %v2073_v42 }
 0x1a9   : > { %v1409_v47 = vpop.f32.mrb[72].mxu0  ;;  %v3352_v48 = vpop.f32.mrb[72].mxu1 }
 0x1aa   : > { %1812 = vst [vmem:[%s3171_s5 + $0x120] sm:$0xff] %v1409_v47  ;;  %v1939_v50 = vadd.f32 %v1938_v39, %v1409_v47  ;;  %v2074_v53 = vmul.f32 %v1409_v47, %v1409_v47  ;;  %v1411_v54 = vpop.f32.mrb[73].mxu0  ;;  %1876 = vst [vmem:[%s3171_s5 + $0x320] sm:$0xff] %v3352_v48  ;;  %v1667_v56 = vpop.f32.mrb[73].mxu1 }
 0x1ab   : > { %v1412_v57 = vpop.f32.mrb[74].mxu0  ;;  %v3357_v58 = vpop.f32.mrb[74].mxu1 }
 0x1ac   : > { %v2201_v60 = vadd.f32 %v2200_v46, %v2074_v53  ;;  %1813 = vst [vmem:[%s3171_s5 + $0x128] sm:$0xff] %v1412_v57  ;;  %v1940_v62 = vadd.f32 %v1939_v50, %v1412_v57  ;;  %v2075_v0 = vmul.f32 %v1412_v57, %v1412_v57  ;;  %v1414_v1 = vpop.f32.mrb[75].mxu0  ;;  %1877 = vst [vmem:[%s3171_s5 + $0x328] sm:$0xff] %v3357_v58  ;;  %v1670_v2 = vpop.f32.mrb[75].mxu1 }
 0x1ae   : > { %v2202_v3 = vadd.f32 %v2201_v60, %v2075_v0 }
 0x1b1   : > { %v1417_v6 = vpop.f32.mrb[76].mxu0  ;;  %v3362_v8 = vpop.f32.mrb[76].mxu1 }
 0x1b2   : > { %1814 = vst [vmem:[%s3171_s5 + $0x130] sm:$0xff] %v1417_v6  ;;  %v1941_v9 = vadd.f32 %v1940_v62, %v1417_v6  ;;  %v2076_v10 = vmul.f32 %v1417_v6, %v1417_v6  ;;  %v1419_v11 = vpop.f32.mrb[77].mxu0  ;;  %1878 = vst [vmem:[%s3171_s5 + $0x330] sm:$0xff] %v3362_v8  ;;  %v1675_v12 = vpop.f32.mrb[77].mxu1 }
 0x1b3   : > { %v1420_v16 = vpop.f32.mrb[78].mxu0  ;;  %v3367_v17 = vpop.f32.mrb[78].mxu1 }
 0x1b4   : > { %v2203_v18 = vadd.f32 %v2202_v3, %v2076_v10  ;;  %1815 = vst [vmem:[%s3171_s5 + $0x138] sm:$0xff] %v1420_v16  ;;  %v1942_v20 = vadd.f32 %v1941_v9, %v1420_v16  ;;  %v2077_v23 = vmul.f32 %v1420_v16, %v1420_v16  ;;  %v1422_v24 = vpop.f32.mrb[79].mxu0  ;;  %1879 = vst [vmem:[%s3171_s5 + $0x338] sm:$0xff] %v3367_v17  ;;  %v1678_v25 = vpop.f32.mrb[79].mxu1 }
 0x1b6   : > { %v2204_v28 = vadd.f32 %v2203_v18, %v2077_v23 }
 0x1b9   : > { %v1425_v30 = vpop.f32.mrb[80].mxu0  ;;  %v3372_v31 = vpop.f32.mrb[80].mxu1 }
 0x1ba   : > { %1816 = vst [vmem:[%s3171_s5 + $0x140] sm:$0xff] %v1425_v30  ;;  %v1943_v33 = vadd.f32 %v1942_v20, %v1425_v30  ;;  %v2078_v34 = vmul.f32 %v1425_v30, %v1425_v30  ;;  %v1427_v38 = vpop.f32.mrb[81].mxu0  ;;  %1880 = vst [vmem:[%s3171_s5 + $0x340] sm:$0xff] %v3372_v31  ;;  %v1683_v39 = vpop.f32.mrb[81].mxu1 }
 0x1bb   : > { %v1428_v42 = vpop.f32.mrb[82].mxu0  ;;  %v3377_v43 = vpop.f32.mrb[82].mxu1 }
 0x1bc   : > { %v2205_v44 = vadd.f32 %v2204_v28, %v2078_v34  ;;  %1817 = vst [vmem:[%s3171_s5 + $0x148] sm:$0xff] %v1428_v42  ;;  %v1944_v46 = vadd.f32 %v1943_v33, %v1428_v42  ;;  %v2079_v47 = vmul.f32 %v1428_v42, %v1428_v42  ;;  %v1430_v50 = vpop.f32.mrb[83].mxu0  ;;  %1881 = vst [vmem:[%s3171_s5 + $0x348] sm:$0xff] %v3377_v43  ;;  %v1686_v53 = vpop.f32.mrb[83].mxu1 }
 0x1be   : > { %v2206_v54 = vadd.f32 %v2205_v44, %v2079_v47 }
 0x1c1   : > { %v1433_v56 = vpop.f32.mrb[84].mxu0  ;;  %v3382_v57 = vpop.f32.mrb[84].mxu1 }
 0x1c2   : > { %1818 = vst [vmem:[%s3171_s5 + $0x150] sm:$0xff] %v1433_v56  ;;  %v1945_v60 = vadd.f32 %v1944_v46, %v1433_v56  ;;  %v2080_v62 = vmul.f32 %v1433_v56, %v1433_v56  ;;  %v1435_v0 = vpop.f32.mrb[85].mxu0  ;;  %1882 = vst [vmem:[%s3171_s5 + $0x350] sm:$0xff] %v3382_v57  ;;  %v1691_v1 = vpop.f32.mrb[85].mxu1 }
 0x1c3   : > { %v1436_v2 = vpop.f32.mrb[86].mxu0  ;;  %v3387_v3 = vpop.f32.mrb[86].mxu1 }
 0x1c4   : > { %v2207_v6 = vadd.f32 %v2206_v54, %v2080_v62  ;;  %1819 = vst [vmem:[%s3171_s5 + $0x158] sm:$0xff] %v1436_v2  ;;  %v1946_v9 = vadd.f32 %v1945_v60, %v1436_v2  ;;  %v2081_v10 = vmul.f32 %v1436_v2, %v1436_v2  ;;  %v1438_v11 = vpop.f32.mrb[87].mxu0  ;;  %1883 = vst [vmem:[%s3171_s5 + $0x358] sm:$0xff] %v3387_v3  ;;  %v1694_v12 = vpop.f32.mrb[87].mxu1 }
 0x1c6   : > { %v2208_v16 = vadd.f32 %v2207_v6, %v2081_v10 }
 0x1c9   : > { %v1441_v18 = vpop.f32.mrb[88].mxu0  ;;  %v3392_v20 = vpop.f32.mrb[88].mxu1 }
 0x1ca   : > { %1820 = vst [vmem:[%s3171_s5 + $0x160] sm:$0xff] %v1441_v18  ;;  %v1947_v23 = vadd.f32 %v1946_v9, %v1441_v18  ;;  %v2082_v24 = vmul.f32 %v1441_v18, %v1441_v18  ;;  %v1443_v25 = vpop.f32.mrb[89].mxu0  ;;  %1884 = vst [vmem:[%s3171_s5 + $0x360] sm:$0xff] %v3392_v20  ;;  %v1699_v28 = vpop.f32.mrb[89].mxu1 }
 0x1cb   : > { %v1444_v30 = vpop.f32.mrb[90].mxu0  ;;  %v3397_v33 = vpop.f32.mrb[90].mxu1 }
 0x1cc   : > { %v2209_v34 = vadd.f32 %v2208_v16, %v2082_v24  ;;  %1821 = vst [vmem:[%s3171_s5 + $0x168] sm:$0xff] %v1444_v30  ;;  %v1948_v38 = vadd.f32 %v1947_v23, %v1444_v30  ;;  %v2083_v39 = vmul.f32 %v1444_v30, %v1444_v30  ;;  %v1446_v42 = vpop.f32.mrb[91].mxu0  ;;  %1885 = vst [vmem:[%s3171_s5 + $0x368] sm:$0xff] %v3397_v33  ;;  %v1702_v44 = vpop.f32.mrb[91].mxu1 }
 0x1ce   : > { %v2210_v46 = vadd.f32 %v2209_v34, %v2083_v39 }
 0x1d1   : > { %v1449_v47 = vpop.f32.mrb[92].mxu0  ;;  %v3402_v50 = vpop.f32.mrb[92].mxu1 }
 0x1d2   : > { %1822 = vst [vmem:[%s3171_s5 + $0x170] sm:$0xff] %v1449_v47  ;;  %v1949_v53 = vadd.f32 %v1948_v38, %v1449_v47  ;;  %v2084_v54 = vmul.f32 %v1449_v47, %v1449_v47  ;;  %v1451_v56 = vpop.f32.mrb[93].mxu0  ;;  %1886 = vst [vmem:[%s3171_s5 + $0x370] sm:$0xff] %v3402_v50  ;;  %v1707_v60 = vpop.f32.mrb[93].mxu1 }
 0x1d3   : > { %v1452_v62 = vpop.f32.mrb[94].mxu0  ;;  %v3407_v0 = vpop.f32.mrb[94].mxu1 }
 0x1d4   : > { %v2211_v1 = vadd.f32 %v2210_v46, %v2084_v54  ;;  %1823 = vst [vmem:[%s3171_s5 + $0x178] sm:$0xff] %v1452_v62  ;;  %v1950_v2 = vadd.f32 %v1949_v53, %v1452_v62  ;;  %v2085_v6 = vmul.f32 %v1452_v62, %v1452_v62  ;;  %v1454_v9 = vpop.f32.mrb[95].mxu0  ;;  %1887 = vst [vmem:[%s3171_s5 + $0x378] sm:$0xff] %v3407_v0  ;;  %v1710_v10 = vpop.f32.mrb[95].mxu1 }
 0x1d6   : > { %v2212_v11 = vadd.f32 %v2211_v1, %v2085_v6 }
 0x1d9   : > { %v1457_v12 = vpop.f32.mrb[96].mxu0  ;;  %v3412_v16 = vpop.f32.mrb[96].mxu1 }
 0x1da   : > { %1824 = vst [vmem:[%s3171_s5 + $0x180] sm:$0xff] %v1457_v12  ;;  %v1951_v18 = vadd.f32 %v1950_v2, %v1457_v12  ;;  %v2086_v23 = vmul.f32 %v1457_v12, %v1457_v12  ;;  %v1459_v24 = vpop.f32.mrb[97].mxu0  ;;  %1888 = vst [vmem:[%s3171_s5 + $0x380] sm:$0xff] %v3412_v16  ;;  %v1715_v25 = vpop.f32.mrb[97].mxu1 }
 0x1db   : > { %v1460_v28 = vpop.f32.mrb[98].mxu0  ;;  %v3417_v30 = vpop.f32.mrb[98].mxu1 }
 0x1dc   : > { %v2213_v34 = vadd.f32 %v2212_v11, %v2086_v23  ;;  %1825 = vst [vmem:[%s3171_s5 + $0x188] sm:$0xff] %v1460_v28  ;;  %v1952_v38 = vadd.f32 %v1951_v18, %v1460_v28  ;;  %v2087_v39 = vmul.f32 %v1460_v28, %v1460_v28  ;;  %v1462_v42 = vpop.f32.mrb[99].mxu0  ;;  %1889 = vst [vmem:[%s3171_s5 + $0x388] sm:$0xff] %v3417_v30  ;;  %v1718_v44 = vpop.f32.mrb[99].mxu1 }
 0x1de   : > { %v2214_v46 = vadd.f32 %v2213_v34, %v2087_v39 }
 0x1e1   : > { %v1465_v47 = vpop.f32.mrb[100].mxu0  ;;  %v3422_v53 = vpop.f32.mrb[100].mxu1 }
 0x1e2   : > { %3708 = vst [vmem:[#allocation2_spill] sm:$0xff] %v3422_v53  ;;  %1826 = vst [vmem:[%s3171_s5 + $0x190] sm:$0xff] %v1465_v47  ;;  %v1953_v54 = vadd.f32 %v1952_v38, %v1465_v47  ;;  %v2088_v56 = vmul.f32 %v1465_v47, %v1465_v47  ;;  %v1467_v60 = vpop.f32.mrb[101].mxu0  ;;  %v1723_v62 = vpop.f32.mrb[101].mxu1 }
 0x1e3   : > { %1890 = vst [vmem:[%s3171_s5 + $0x390] sm:$0xff] %v3422_v53  ;;  %v1468_v1 = vpop.f32.mrb[102].mxu0  ;;  %v3427_v2 = vpop.f32.mrb[102].mxu1  ;;  %v2877_v53 = vld [vmem:[%s3171_s5 + $0x248] sm:$0xff] }
 0x1e4   : > { %3709 = vst [vmem:[#allocation3_spill] sm:$0xff] %v3427_v2  ;;  %v2215_v6 = vadd.f32 %v2214_v46, %v2088_v56  ;;  %1827 = vst [vmem:[%s3171_s5 + $0x198] sm:$0xff] %v1468_v1  ;;  %v1954_v9 = vadd.f32 %v1953_v54, %v1468_v1  ;;  %v2089_v10 = vmul.f32 %v1468_v1, %v1468_v1  ;;  %v1470_v11 = vpop.f32.mrb[103].mxu0  ;;  %v1726_v12 = vpop.f32.mrb[103].mxu1 }
 0x1e5   : > { %1891 = vst [vmem:[%s3171_s5 + $0x398] sm:$0xff] %v3427_v2 }
 0x1e6   : > { %v2216_v18 = vadd.f32 %v2215_v6, %v2089_v10 }
 0x1e9   : > { %v1473_v23 = vpop.f32.mrb[104].mxu0  ;;  %v3432_v24 = vpop.f32.mrb[104].mxu1 }
 0x1ea   : > { %3710 = vst [vmem:[#allocation4_spill] sm:$0xff] %v3432_v24  ;;  %1828 = vst [vmem:[%s3171_s5 + $0x1a0] sm:$0xff] %v1473_v23  ;;  %v1955_v25 = vadd.f32 %v1954_v9, %v1473_v23  ;;  %v2090_v28 = vmul.f32 %v1473_v23, %v1473_v23  ;;  %v1475_v34 = vpop.f32.mrb[105].mxu0  ;;  %v1731_v38 = vpop.f32.mrb[105].mxu1 }
 0x1eb   : > { %1892 = vst [vmem:[%s3171_s5 + $0x3a0] sm:$0xff] %v3432_v24  ;;  %v1476_v39 = vpop.f32.mrb[106].mxu0  ;;  %v3437_v42 = vpop.f32.mrb[106].mxu1 }
 0x1ec   : > { %3711 = vst [vmem:[#allocation5_spill] sm:$0xff] %v3437_v42  ;;  %v2217_v44 = vadd.f32 %v2216_v18, %v2090_v28  ;;  %1829 = vst [vmem:[%s3171_s5 + $0x1a8] sm:$0xff] %v1476_v39  ;;  %v1956_v46 = vadd.f32 %v1955_v25, %v1476_v39  ;;  %v2091_v47 = vmul.f32 %v1476_v39, %v1476_v39  ;;  %v1478_v54 = vpop.f32.mrb[107].mxu0  ;;  %v1734_v56 = vpop.f32.mrb[107].mxu1 }
 0x1ed   : > { %1893 = vst [vmem:[%s3171_s5 + $0x3a8] sm:$0xff] %v3437_v42 }
 0x1ee   : > { %v2218_v60 = vadd.f32 %v2217_v44, %v2091_v47 }
 0x1f1   : > { %v1481_v62 = vpop.f32.mrb[108].mxu0  ;;  %v3442_v1 = vpop.f32.mrb[108].mxu1 }
 0x1f2   : > { %3712 = vst [vmem:[#allocation6_spill] sm:$0xff] %v3442_v1  ;;  %1830 = vst [vmem:[%s3171_s5 + $0x1b0] sm:$0xff] %v1481_v62  ;;  %v1957_v6 = vadd.f32 %v1956_v46, %v1481_v62  ;;  %v2092_v9 = vmul.f32 %v1481_v62, %v1481_v62  ;;  %v1483_v10 = vpop.f32.mrb[109].mxu0  ;;  %v1739_v11 = vpop.f32.mrb[109].mxu1 }
 0x1f3   : > { %1894 = vst [vmem:[%s3171_s5 + $0x3b0] sm:$0xff] %v3442_v1  ;;  %v1484_v12 = vpop.f32.mrb[110].mxu0  ;;  %v3447_v18 = vpop.f32.mrb[110].mxu1  ;;  %v2872_v1 = vld [vmem:[%s3171_s5 + $0x220] sm:$0xff] }
 0x1f4   : > { %3713 = vst [vmem:[#allocation7_spill] sm:$0xff] %v3447_v18  ;;  %v2219_v23 = vadd.f32 %v2218_v60, %v2092_v9  ;;  %1831 = vst [vmem:[%s3171_s5 + $0x1b8] sm:$0xff] %v1484_v12  ;;  %v1958_v25 = vadd.f32 %v1957_v6, %v1484_v12  ;;  %v2093_v28 = vmul.f32 %v1484_v12, %v1484_v12  ;;  %v1486_v34 = vpop.f32.mrb[111].mxu0  ;;  %v1742_v38 = vpop.f32.mrb[111].mxu1 }
 0x1f5   : > { %1895 = vst [vmem:[%s3171_s5 + $0x3b8] sm:$0xff] %v3447_v18  ;;  %v2870_v18 = vld [vmem:[%s3171_s5 + $0x210] sm:$0xff]  ;;  %v2106_v42 = vmul.f32 %v2872_v1, %v2872_v1 }
 0x1f6   : > { %v2220_v39 = vadd.f32 %v2219_v23, %v2093_v28 }
 0x1f9   : > { %v1489_v44 = vpop.f32.mrb[112].mxu0  ;;  %v3452_v46 = vpop.f32.mrb[112].mxu1 }
 0x1fa   : > { %3714 = vst [vmem:[#allocation8_spill] sm:$0xff] %v3452_v46  ;;  %1832 = vst [vmem:[%s3171_s5 + $0x1c0] sm:$0xff] %v1489_v44  ;;  %v1959_v47 = vadd.f32 %v1958_v25, %v1489_v44  ;;  %v2094_v54 = vmul.f32 %v1489_v44, %v1489_v44  ;;  %v1491_v56 = vpop.f32.mrb[113].mxu0  ;;  %v1747_v60 = vpop.f32.mrb[113].mxu1 }
 0x1fb   : > { %1896 = vst [vmem:[%s3171_s5 + $0x3c0] sm:$0xff] %v3452_v46  ;;  %v1492_v62 = vpop.f32.mrb[114].mxu0  ;;  %v3457_v6 = vpop.f32.mrb[114].mxu1 }
 0x1fc   : > { %3715 = vst [vmem:[#allocation9_spill] sm:$0xff] %v3457_v6  ;;  %v2221_v9 = vadd.f32 %v2220_v39, %v2094_v54  ;;  %1833 = vst [vmem:[%s3171_s5 + $0x1c8] sm:$0xff] %v1492_v62  ;;  %v1960_v10 = vadd.f32 %v1959_v47, %v1492_v62  ;;  %v2095_v11 = vmul.f32 %v1492_v62, %v1492_v62  ;;  %v1494_v12 = vpop.f32.mrb[115].mxu0  ;;  %v1750_v23 = vpop.f32.mrb[115].mxu1 }
 0x1fd   : > { %1897 = vst [vmem:[%s3171_s5 + $0x3c8] sm:$0xff] %v3457_v6 }
 0x1fe   : > { %v2222_v25 = vadd.f32 %v2221_v9, %v2095_v11 }
 0x201   : > { %v1497_v28 = vpop.f32.mrb[116].mxu0  ;;  %v3462_v34 = vpop.f32.mrb[116].mxu1 }
 0x202   : > { %3716 = vst [vmem:[#allocation10_spill] sm:$0xff] %v3462_v34  ;;  %1834 = vst [vmem:[%s3171_s5 + $0x1d0] sm:$0xff] %v1497_v28  ;;  %v1961_v38 = vadd.f32 %v1960_v10, %v1497_v28  ;;  %v2096_v44 = vmul.f32 %v1497_v28, %v1497_v28  ;;  %v1499_v56 = vpop.f32.mrb[117].mxu0  ;;  %v1755_v39 = vpop.f32.mrb[117].mxu1 }
 0x203   : > { %1898 = vst [vmem:[%s3171_s5 + $0x3d0] sm:$0xff] %v3462_v34  ;;  %v1500_v47 = vpop.f32.mrb[118].mxu0  ;;  %v3467_v54 = vpop.f32.mrb[118].mxu1 }
 0x204   : > { %3717 = vst [vmem:[#allocation11_spill] sm:$0xff] %v3467_v54  ;;  %v2223_v60 = vadd.f32 %v2222_v25, %v2096_v44  ;;  %1835 = vst [vmem:[%s3171_s5 + $0x1d8] sm:$0xff] %v1500_v47  ;;  %v1962_v62 = vadd.f32 %v1961_v38, %v1500_v47  ;;  %v2097_v9 = vmul.f32 %v1500_v47, %v1500_v47  ;;  %v1502_v11 = vpop.f32.mrb[119].mxu0  ;;  %v1758_v12 = vpop.f32.mrb[119].mxu1 }
 0x205   : > { %1899 = vst [vmem:[%s3171_s5 + $0x3d8] sm:$0xff] %v3467_v54 }
 0x206   : > { %v2224_v10 = vadd.f32 %v2223_v60, %v2097_v9 }
 0x209   : > { %v1505_v23 = vpop.f32.mrb[120].mxu0  ;;  %v3472_v28 = vpop.f32.mrb[120].mxu1 }
 0x20a   : > { %3718 = vst [vmem:[#allocation12_spill] sm:$0xff] %v3472_v28  ;;  %1836 = vst [vmem:[%s3171_s5 + $0x1e0] sm:$0xff] %v1505_v23  ;;  %v1963_v56 = vadd.f32 %v1962_v62, %v1505_v23  ;;  %v2098_v39 = vmul.f32 %v1505_v23, %v1505_v23  ;;  %v1507_v34 = vpop.f32.mrb[121].mxu0  ;;  %v1763_v25 = vpop.f32.mrb[121].mxu1 }
 0x20b   : > { %1900 = vst [vmem:[%s3171_s5 + $0x3e0] sm:$0xff] %v3472_v28  ;;  %v1508_v38 = vpop.f32.mrb[122].mxu0  ;;  %v3477_v44 = vpop.f32.mrb[122].mxu1 }
 0x20c   : > { %3719 = vst [vmem:[#allocation13_spill] sm:$0xff] %v3477_v44  ;;  %v2225_v47 = vadd.f32 %v2224_v10, %v2098_v39  ;;  %1837 = vst [vmem:[%s3171_s5 + $0x1e8] sm:$0xff] %v1508_v38  ;;  %v1964_v11 = vadd.f32 %v1963_v56, %v1508_v38  ;;  %v2099_v60 = vmul.f32 %v1508_v38, %v1508_v38  ;;  %v1510_v9 = vpop.f32.mrb[123].mxu0  ;;  %v1766_v12 = vpop.f32.mrb[123].mxu1 }
 0x20d   : > { %1901 = vst [vmem:[%s3171_s5 + $0x3e8] sm:$0xff] %v3477_v44 }
 0x20e   : > { %v2226_v62 = vadd.f32 %v2225_v47, %v2099_v60 }
 0x211   : > { %v1513_v23 = vpop.f32.mrb[124].mxu0  ;;  %v3482_v34 = vpop.f32.mrb[124].mxu1 }
 0x212   : > { %3720 = vst [vmem:[#allocation14_spill] sm:$0xff] %v3482_v34  ;;  %1838 = vst [vmem:[%s3171_s5 + $0x1f0] sm:$0xff] %v1513_v23  ;;  %v1965_v25 = vadd.f32 %v1964_v11, %v1513_v23  ;;  %v2100_v28 = vmul.f32 %v1513_v23, %v1513_v23  ;;  %v1515_v54 = vpop.f32.mrb[125].mxu0  ;;  %v1771_v10 = vpop.f32.mrb[125].mxu1  ;;  %v2868_v11 = vld [vmem:[%s3171_s5 + $0x200] sm:$0xff] }
 0x213   : > { %1902 = vst [vmem:[%s3171_s5 + $0x3f0] sm:$0xff] %v3482_v34  ;;  %v1516_v56 = vpop.f32.mrb[126].mxu0  ;;  %v3487_v39 = vpop.f32.mrb[126].mxu1  ;;  %v2102_v54 = vmul.f32 %v2868_v11, %v2868_v11  ;;  %v2869_v34 = vld [vmem:[%s3171_s5 + $0x208] sm:$0xff] }
 0x214   : > { %3721 = vst [vmem:[#allocation15_spill] sm:$0xff] %v3487_v39  ;;  %v2227_v38 = vadd.f32 %v2226_v62, %v2100_v28  ;;  %1839 = vst [vmem:[%s3171_s5 + $0x1f8] sm:$0xff] %v1516_v56  ;;  %v1966_v47 = vadd.f32 %v1965_v25, %v1516_v56  ;;  %v2101_v60 = vmul.f32 %v1516_v56, %v1516_v56  ;;  %v1518_v9 = vpop.f32.mrb[127].mxu0  ;;  %v1774_v12 = vpop.f32.mrb[127].mxu1  ;;  %v2871_v56 = vld [vmem:[%s3171_s5 + $0x218] sm:$0xff] }
 0x215   : > { %1903 = vst [vmem:[%s3171_s5 + $0x3f8] sm:$0xff] %v3487_v39  ;;  %v2103_v10 = vmul.f32 %v2869_v34, %v2869_v34  ;;  %v2104_v28 = vmul.f32 %v2870_v18, %v2870_v18  ;;  %v2105_v9 = vmul.f32 %v2871_v56, %v2871_v56 }
 0x216   : > { %v1967_v23 = vadd.f32 %v2868_v11, %v1966_v47  ;;  %v2228_v44 = vadd.f32 %v2227_v38, %v2101_v60  ;;  %v2873_v60 = vld [vmem:[%s3171_s5 + $0x228] sm:$0xff] }
 0x217   : > { %v2107_v11 = vmul.f32 %v2873_v60, %v2873_v60 }
 0x218   : > { %v1968_v6 = vadd.f32 %v2869_v34, %v1967_v23  ;;  %v2229_v46 = vadd.f32 %v2228_v44, %v2102_v54  ;;  %v2874_v54 = vld [vmem:[%s3171_s5 + $0x230] sm:$0xff] }
 0x219   : > { %v2108_v23 = vmul.f32 %v2874_v54, %v2874_v54 }
 0x21a   : > { %v1969_v62 = vadd.f32 %v2870_v18, %v1968_v6  ;;  %v2230_v25 = vadd.f32 %v2229_v46, %v2103_v10  ;;  %v2875_v46 = vld [vmem:[%s3171_s5 + $0x238] sm:$0xff] }
 0x21b   : > { %v2109_v6 = vmul.f32 %v2875_v46, %v2875_v46 }
 0x21c   : > { %v1970_v39 = vadd.f32 %v2871_v56, %v1969_v62  ;;  %v2231_v12 = vadd.f32 %v2230_v25, %v2104_v28  ;;  %v2876_v62 = vld [vmem:[%s3171_s5 + $0x240] sm:$0xff] }
 0x21d   : > { %v2110_v28 = vmul.f32 %v2876_v62, %v2876_v62 }
 0x21e   : > { %v1971_v47 = vadd.f32 %v2872_v1, %v1970_v39  ;;  %v2232_v38 = vadd.f32 %v2231_v12, %v2105_v9  ;;  %v2111_v1 = vmul.f32 %v2877_v53, %v2877_v53  ;;  %v2112_v12 = vmul.f32 %v3222_v21, %v3222_v21 }
 0x220   : > { %v1972_v34 = vadd.f32 %v2873_v60, %v1971_v47  ;;  %v2233_v44 = vadd.f32 %v2232_v38, %v2106_v42  ;;  %v2113_v38 = vmul.f32 %v3227_v27, %v3227_v27 }
 0x222   : > { %v1973_v24 = vadd.f32 %v2874_v54, %v1972_v34  ;;  %v2234_v18 = vadd.f32 %v2233_v44, %v2107_v11  ;;  %v2114_v11 = vmul.f32 %v3232_v35, %v3232_v35 }
 0x224   : > { %v1974_v10 = vadd.f32 %v2875_v46, %v1973_v24  ;;  %v2235_v2 = vadd.f32 %v2234_v18, %v2108_v23 }
 0x226   : > { %v1975_v25 = vadd.f32 %v2876_v62, %v1974_v10  ;;  %v2236_v56 = vadd.f32 %v2235_v2, %v2109_v6 }
 0x228   : > { %v1976_v39 = vadd.f32 %v2877_v53, %v1975_v25  ;;  %v2237_v9 = vadd.f32 %v2236_v56, %v2110_v28  ;;  %v2115_v53 = vmul.f32 %v3237_v41, %v3237_v41 }
 0x22a   : > { %v1977_v42 = vadd.f32 %v1976_v39, %v3222_v21  ;;  %v2238_v47 = vadd.f32 %v2237_v9, %v2111_v1  ;;  %v2116_v21 = vmul.f32 %v3242_v49, %v3242_v49 }
 0x22c   : > { %v1978_v24 = vadd.f32 %v1977_v42, %v3227_v27  ;;  %v2239_v60 = vadd.f32 %v2238_v47, %v2112_v12  ;;  %v2117_v27 = vmul.f32 %v3247_v55, %v3247_v55 }
 0x22e   : > { %v1979_v2 = vadd.f32 %v1978_v24, %v3232_v35  ;;  %v2240_v34 = vadd.f32 %v2239_v60, %v2113_v38  ;;  %v2118_v35 = vmul.f32 %v3252_v63, %v3252_v63 }
 0x230   : > { %v1980_v44 = vadd.f32 %v1979_v2, %v3237_v41  ;;  %v2241_v54 = vadd.f32 %v2240_v34, %v2114_v11  ;;  %v2119_v41 = vmul.f32 %v3257_v5, %v3257_v5 }
 0x232   : > { %v1981_v23 = vadd.f32 %v1980_v44, %v3242_v49  ;;  %v2242_v18 = vadd.f32 %v2241_v54, %v2115_v53  ;;  %v2120_v49 = vmul.f32 %v3262_v13, %v3262_v13 }
 0x234   : > { %v1982_v46 = vadd.f32 %v1981_v23, %v3247_v55  ;;  %v2243_v6 = vadd.f32 %v2242_v18, %v2116_v21  ;;  %v2121_v55 = vmul.f32 %v3267_v19, %v3267_v19 }
 0x236   : > { %v1983_v10 = vadd.f32 %v1982_v46, %v3252_v63  ;;  %v2244_v62 = vadd.f32 %v2243_v6, %v2117_v27  ;;  %v2122_v63 = vmul.f32 %v3272_v29, %v3272_v29 }
 0x238   : > { %v2245_v28 = vadd.f32 %v2244_v62, %v2118_v35  ;;  %v1984_v25 = vadd.f32 %v1983_v10, %v3257_v5  ;;  %v2123_v5 = vmul.f32 %v3277_v36, %v3277_v36 }
 0x23a   : > { %v1985_v56 = vadd.f32 %v1984_v25, %v3262_v13  ;;  %v2246_v1 = vadd.f32 %v2245_v28, %v2119_v41  ;;  %v2124_v13 = vmul.f32 %v3282_v45, %v3282_v45 }
 0x23c   : > { %v1986_v39 = vadd.f32 %v1985_v56, %v3267_v19  ;;  %v2247_v9 = vadd.f32 %v2246_v1, %v2120_v49  ;;  %v2125_v19 = vmul.f32 %v3287_v52, %v3287_v52  ;;  %v2134_v49 = vmul.f32 %v3332_v7, %v3332_v7 }
 0x23e   : > { %v1987_v12 = vadd.f32 %v1986_v39, %v3272_v29  ;;  %v2248_v42 = vadd.f32 %v2247_v9, %v2121_v55  ;;  %v2126_v29 = vmul.f32 %v3292_v61, %v3292_v61  ;;  %v2135_v55 = vmul.f32 %v3337_v15, %v3337_v15 }
 0x23f   : > { %v2136_v9 = vmul.f32 %v3342_v26, %v3342_v26 }
 0x240   : > { %v1988_v47 = vadd.f32 %v1987_v12, %v3277_v36  ;;  %v2249_v38 = vadd.f32 %v2248_v42, %v2122_v63  ;;  %v2127_v36 = vmul.f32 %v3297_v4, %v3297_v4  ;;  %v2137_v12 = vmul.f32 %v3347_v37, %v3347_v37 }
 0x242   : > { %v1989_v24 = vadd.f32 %v1988_v47, %v3282_v45  ;;  %v2250_v60 = vadd.f32 %v2249_v38, %v2123_v5  ;;  %v2128_v45 = vmul.f32 %v3302_v14, %v3302_v14  ;;  %v2138_v5 = vmul.f32 %v3352_v48, %v3352_v48 }
 0x243   : > { %v2139_v38 = vmul.f32 %v3357_v58, %v3357_v58 }
 0x244   : > { %v1990_v11 = vadd.f32 %v1989_v24, %v3287_v52  ;;  %v2251_v2 = vadd.f32 %v2250_v60, %v2124_v13  ;;  %v2129_v52 = vmul.f32 %v3307_v22, %v3307_v22  ;;  %v2140_v24 = vmul.f32 %v3362_v8, %v3362_v8 }
 0x246   : > { %v1991_v34 = vadd.f32 %v1990_v11, %v3292_v61  ;;  %v2252_v53 = vadd.f32 %v2251_v2, %v2125_v19  ;;  %v2130_v61 = vmul.f32 %v3312_v32, %v3312_v32  ;;  %v2141_v19 = vmul.f32 %v3367_v17, %v3367_v17 }
 0x247   : > { %v2142_v2 = vmul.f32 %v3372_v31, %v3372_v31 }
 0x248   : > { %v1992_v44 = vadd.f32 %v1991_v34, %v3297_v4  ;;  %v2253_v54 = vadd.f32 %v2252_v53, %v2126_v29  ;;  %v2131_v4 = vmul.f32 %v3317_v40, %v3317_v40  ;;  %v2143_v34 = vmul.f32 %v3377_v43, %v3377_v43 }
 0x24a   : > { %v1993_v21 = vadd.f32 %v1992_v44, %v3302_v14  ;;  %v2254_v23 = vadd.f32 %v2253_v54, %v2127_v36  ;;  %v2132_v14 = vmul.f32 %v3322_v51, %v3322_v51  ;;  %v2144_v36 = vmul.f32 %v3382_v57, %v3382_v57 }
 0x24b   : > { %v2145_v54 = vmul.f32 %v3387_v3, %v3387_v3 }
 0x24c   : > { %v1994_v18 = vadd.f32 %v1993_v21, %v3307_v22  ;;  %v2255_v27 = vadd.f32 %v2254_v23, %v2128_v45  ;;  %v2133_v22 = vmul.f32 %v3327_v59, %v3327_v59  ;;  %v2146_v21 = vmul.f32 %v3392_v20, %v3392_v20 }
 0x24e   : > { %v1995_v46 = vadd.f32 %v1994_v18, %v3312_v32  ;;  %v2256_v6 = vadd.f32 %v2255_v27, %v2129_v52  ;;  %v2147_v52 = vmul.f32 %v3397_v33, %v3397_v33  ;;  %v2148_v27 = vmul.f32 %v3402_v50, %v3402_v50 }
 0x250   : > { %v1996_v35 = vadd.f32 %v1995_v46, %v3317_v40  ;;  %v2257_v10 = vadd.f32 %v2256_v6, %v2130_v61  ;;  %v2149_v46 = vmul.f32 %v3407_v0, %v3407_v0 }
 0x252   : > { %v1997_v62 = vadd.f32 %v1996_v35, %v3322_v51  ;;  %v2258_v41 = vadd.f32 %v2257_v10, %v2131_v4  ;;  %v2150_v4 = vmul.f32 %v3412_v16, %v3412_v16  ;;  %v2151_v10 = vmul.f32 %v3417_v30, %v3417_v30 }
 0x254   : > { %v1998_v28 = vadd.f32 %v1997_v62, %v3327_v59  ;;  %v2259_v25 = vadd.f32 %v2258_v41, %v2132_v14 }
 0x256   : > { %v1999_v32 = vadd.f32 %v1998_v28, %v3332_v7  ;;  %v2260_v56 = vadd.f32 %v2259_v25, %v2133_v22 }
 0x258   : > { %v2261_v40 = vadd.f32 %v2260_v56, %v2134_v49  ;;  %v2000_v1 = vadd.f32 %v1999_v32, %v3337_v15 }
 0x25a   : > { %v2262_v51 = vadd.f32 %v2261_v40, %v2135_v55  ;;  %v2001_v39 = vadd.f32 %v2000_v1, %v3342_v26 }
 0x25c   : > { %v2263_v59 = vadd.f32 %v2262_v51, %v2136_v9  ;;  %v2002_v63 = vadd.f32 %v2001_v39, %v3347_v37  ;;  %v3726_v39 = vld [vmem:[#allocation6_spill] sm:$0xff] }
 0x25e   : > { %v2264_v7 = vadd.f32 %v2263_v59, %v2137_v12  ;;  %v2003_v42 = vadd.f32 %v2002_v63, %v3352_v48  ;;  %v2156_v59 = vmul.f32 %v3726_v39, %v3726_v39  ;;  %v3727_v12 = vld [vmem:[#allocation7_spill] sm:$0xff] }
 0x260   : > { %v2265_v47 = vadd.f32 %v2264_v7, %v2138_v5  ;;  %v2004_v15 = vadd.f32 %v2003_v42, %v3357_v58  ;;  %v2157_v42 = vmul.f32 %v3727_v12, %v3727_v12 }
 0x262   : > { %v2266_v13 = vadd.f32 %v2265_v47, %v2139_v38  ;;  %v2005_v26 = vadd.f32 %v2004_v15, %v3362_v8  ;;  %v3728_v47 = vld [vmem:[#allocation8_spill] sm:$0xff] }
 0x263   : > { %v2158_v38 = vmul.f32 %v3728_v47, %v3728_v47 }
 0x264   : > { %v2267_v60 = vadd.f32 %v2266_v13, %v2140_v24  ;;  %v2006_v37 = vadd.f32 %v2005_v26, %v3367_v17  ;;  %v3729_v26 = vld [vmem:[#allocation9_spill] sm:$0xff] }
 0x266   : > { %v2268_v11 = vadd.f32 %v2267_v60, %v2141_v19  ;;  %v2007_v48 = vadd.f32 %v2006_v37, %v3372_v31  ;;  %v2159_v60 = vmul.f32 %v3729_v26, %v3729_v26  ;;  %v3730_v19 = vld [vmem:[#allocation10_spill] sm:$0xff] }
 0x268   : > { %v2269_v29 = vadd.f32 %v2268_v11, %v2142_v2  ;;  %v2008_v58 = vadd.f32 %v2007_v48, %v3377_v43  ;;  %v2160_v48 = vmul.f32 %v3730_v19, %v3730_v19 }
 0x26a   : > { %v2270_v53 = vadd.f32 %v2269_v29, %v2143_v34  ;;  %v2009_v8 = vadd.f32 %v2008_v58, %v3382_v57  ;;  %v3731_v29 = vld [vmem:[#allocation11_spill] sm:$0xff] }
 0x26b   : > { %v2161_v34 = vmul.f32 %v3731_v29, %v3731_v29 }
 0x26c   : > { %v2271_v44 = vadd.f32 %v2270_v53, %v2144_v36  ;;  %v2010_v17 = vadd.f32 %v2009_v8, %v3387_v3  ;;  %v3732_v8 = vld [vmem:[#allocation12_spill] sm:$0xff] }
 0x26e   : > { %v2272_v45 = vadd.f32 %v2271_v44, %v2145_v54  ;;  %v2011_v31 = vadd.f32 %v2010_v17, %v3392_v20  ;;  %v2162_v44 = vmul.f32 %v3732_v8, %v3732_v8  ;;  %v3733_v54 = vld [vmem:[#allocation13_spill] sm:$0xff] }
 0x270   : > { %v2273_v23 = vadd.f32 %v2272_v45, %v2146_v21  ;;  %v2012_v43 = vadd.f32 %v2011_v31, %v3397_v33  ;;  %v2163_v31 = vmul.f32 %v3733_v54, %v3733_v54  ;;  %v3734_v21 = vld [vmem:[#allocation14_spill] sm:$0xff] }
 0x272   : > { %v2274_v18 = vadd.f32 %v2273_v23, %v2147_v52  ;;  %v2013_v57 = vadd.f32 %v2012_v43, %v3402_v50  ;;  %v3722_v50 = vld [vmem:[#allocation2_spill] sm:$0xff]  ;;  %v2164_v23 = vmul.f32 %v3734_v21, %v3734_v21 }
 0x273   : > { %v2152_v41 = vmul.f32 %v3722_v50, %v3722_v50 }
 0x274   : > { %v2275_v61 = vadd.f32 %v2274_v18, %v2148_v27  ;;  %v2014_v3 = vadd.f32 %v2013_v57, %v3407_v0  ;;  %v3723_v0 = vld [vmem:[#allocation3_spill] sm:$0xff] }
 0x275   : > { %v2153_v25 = vmul.f32 %v3723_v0, %v3723_v0  ;;  %v3735_v57 = vld [vmem:[#allocation15_spill] sm:$0xff] }
 0x276   : > { %v2276_v6 = vadd.f32 %v2275_v61, %v2149_v46  ;;  %v2015_v20 = vadd.f32 %v2014_v3, %v3412_v16  ;;  %v3724_v16 = vld [vmem:[#allocation4_spill] sm:$0xff]  ;;  %v2165_v61 = vmul.f32 %v3735_v57, %v3735_v57 }
 0x277   : > { %v2154_v56 = vmul.f32 %v3724_v16, %v3724_v16 }
 0x278   : > { %v2277_v35 = vadd.f32 %v2276_v6, %v2150_v4  ;;  %v2016_v33 = vadd.f32 %v2015_v20, %v3417_v30  ;;  %v3725_v30 = vld [vmem:[#allocation5_spill] sm:$0xff] }
 0x279   : > { %v2155_v55 = vmul.f32 %v3725_v30, %v3725_v30 }
 0x27a   : > { %v2278_v14 = vadd.f32 %v2277_v35, %v2151_v10  ;;  %v2017_v62 = vadd.f32 %v2016_v33, %v3722_v50 }
 0x27c   : > { %v2279_v22 = vadd.f32 %v2278_v14, %v2152_v41  ;;  %v2018_v28 = vadd.f32 %v2017_v62, %v3723_v0 }
 0x27e   : > { %v2280_v32 = vadd.f32 %v2279_v22, %v2153_v25  ;;  %v2019_v49 = vadd.f32 %v2018_v28, %v3724_v16 }
 0x280   : > { %v2281_v40 = vadd.f32 %v2280_v32, %v2154_v56  ;;  %v2020_v1 = vadd.f32 %v2019_v49, %v3725_v30 }
 0x282   : > { %v2282_v51 = vadd.f32 %v2281_v40, %v2155_v55  ;;  %v2021_v9 = vadd.f32 %v2020_v1, %v3726_v39 }
 0x284   : > { %v2283_v63 = vadd.f32 %v2282_v51, %v2156_v59  ;;  %v2022_v7 = vadd.f32 %v2021_v9, %v3727_v12 }
 0x286   : > { %v2284_v5 = vadd.f32 %v2283_v63, %v2157_v42  ;;  %v2023_v15 = vadd.f32 %v2022_v7, %v3728_v47 }
 0x288   : > { %v2285_v13 = vadd.f32 %v2284_v5, %v2158_v38  ;;  %v2024_v24 = vadd.f32 %v2023_v15, %v3729_v26 }
 0x28a   : > { %v2286_v37 = vadd.f32 %v2285_v13, %v2159_v60  ;;  %v2025_v11 = vadd.f32 %v2024_v24, %v3730_v19 }
 0x28c   : > { %v2287_v2 = vadd.f32 %v2286_v37, %v2160_v48  ;;  %v2026_v58 = vadd.f32 %v2025_v11, %v3731_v29 }
 0x28e   : > { %v2288_v53 = vadd.f32 %v2287_v2, %v2161_v34  ;;  %v2027_v36 = vadd.f32 %v2026_v58, %v3732_v8 }
 0x290   : > { %v2289_v17 = vadd.f32 %v2288_v53, %v2162_v44  ;;  %v2028_v45 = vadd.f32 %v2027_v36, %v3733_v54 }
 0x292   : > { %v2290_v43 = vadd.f32 %v2289_v17, %v2163_v31  ;;  %v2029_v52 = vadd.f32 %v2028_v45, %v3734_v21 }
 0x294   : > { %v2291_v18 = vadd.f32 %v2290_v43, %v2164_v23  ;;  %v2030_v27 = vadd.f32 %v2029_v52, %v3735_v57 }
 0x296   : > { %v2031_v3 = vrot.slane %v2030_v27, 4  ;;  %v2292_v46 = vadd.f32 %v2291_v18, %v2165_v61 }
 0x298   : > { %v2032_v6 = vadd.f32 %v2031_v3, %v2030_v27  ;;  %v2293_v20 = vrot.slane %v2292_v46, 4 }
 0x29a   : > { %v2033_v4 = vrot.slane %v2032_v6, 2  ;;  %v2294_v35 = vadd.f32 %v2293_v20, %v2292_v46 }
 0x29c   : > { %v2034_v33 = vadd.f32 %v2033_v4, %v2032_v6  ;;  %v2295_v10 = vrot.slane %v2294_v35, 2 }
 0x29e   : > { %v2035_v14 = vrot.slane %v2034_v33, 1  ;;  %v2296_v50 = vadd.f32 %v2295_v10, %v2294_v35 }
 0x2a0   : > { %v2036_v62 = vadd.f32 %v2035_v14, %v2034_v33  ;;  %v2297_v41 = vrot.slane %v2296_v50, 1 }
 0x2a2   : > { %2037 = vst [vmem:[%s217_s29] sm:$0x1] %v2036_v62  ;;  %v2298_v22 = vadd.f32 %v2297_v41, %v2296_v50 }
 0x2a4   : > { %2299 = vst [vmem:[%s220_s8] sm:$0x1] %v2298_v22 }
 0x2a5 PF: > { %s15_s15 = sadd.s32 1, %s2884_s15  }
 0x2a6   : > { %p12_p5 = scmp.ge.s32.totalorder %s15_s15, 4  }
 0x2a8   :  { %14 = sbr.rel (!%p12_p5) target bundleno = 1 (0x1), region = 82 }

// kernel: decoder_block_forward.7
= control target key start
LH: loop header
LB: loop body
LE: loop exit
PB: predicated region body
PF: predicated region fallthrough
CT: control target
= control target key end

     0   :  { %s935_s12 = smov 0   ;;  %s1488_s0 = inlined_call_operand.vmem [shape: f32[2048,128], index: 0, kind: input, shape index: {}]   ;;  %s1489_s1 = inlined_call_operand.vmem [shape: f32[1,128], index: 1, kind: input, shape index: {}]   ;;  %s1490_s2 = inlined_call_operand.vmem [shape: f32[1,128], index: 2, kind: input, shape index: {}]   ;;  %s1491_s3 = inlined_call_operand.vmem [shape: f32[2048,128], index: 3, kind: output, shape index: {}]  }
   0x1 LB: > { %s884_s13 = sadd.s32 4294967295, %s913_s12   ;;  %p888_p0 = scmp.ge.s32.totalorder %s913_s12, 1  ;;  %s913_s12 = sphi %s935_s12, %s13_s12  }
   0x2   : > { %p138_p1 = scmp.lt.s32.totalorder %s913_s12, 3 }
   0x4   : > { %p139_p2 = pnand %p888_p0, %p138_p1 }
   0x5   : > { %s889_s14 = sshll.u32 (!%p139_p2), %s884_s13, 7  ;;  %v946_v0 = vld [vmem:[%s1489_s1] ss:$0 sm:$0xff] (!%p139_p2) }
   0x6   : > { %142 = sbr.rel (%p139_p2) target bundleno = 118 (0x76), region = 32  ;;  %p163_p3 = scmp.lt.s32.totalorder (!%p139_p2), %s889_s14, 255  ;;  %v956_v1 = vld [vmem:[%s1490_s2] ss:$0 sm:$0xff] (!%p139_p2) }
   0xd   : > { %s1493_s14 = smov (!%p163_p3, %s889_s14), 255 }
   0xe   : > { %s890_s15 = sshll.u32 %s1493_s14, 3 }
   0xf   : > { %s951_s20 = scalar_lea.vmem %s1488_s0, %s890_s15  ;;  %s979_s25 = scalar_lea.vmem %s1491_s3, %s890_s15 }
  0x10   : > { %v174_v2 = vld [vmem:[%s951_s20] sm:$0xff]  ;;  %v175_v3 = vld [vmem:[%s951_s20 + $0x8] sm:$0xff]  ;;  %v176_v4 = vld [vmem:[%s951_s20 + $0x10] sm:$0xff] }
  0x11   : > { %v309_v5 = vmul.f32 %v946_v0, %v174_v2  ;;  %v310_v6 = vmul.f32 %v946_v0, %v175_v3  ;;  %v311_v7 = vmul.f32 %v946_v0, %v176_v4  ;;  %v177_v8 = vld [vmem:[%s951_s20 + $0x18] sm:$0xff]  ;;  %v178_v9 = vld [vmem:[%s951_s20 + $0x20] sm:$0xff]  ;;  %v179_v10 = vld [vmem:[%s951_s20 + $0x28] sm:$0xff] }
  0x12   : > { %v312_v11 = vmul.f32 %v946_v0, %v177_v8  ;;  %v313_v12 = vmul.f32 %v946_v0, %v178_v9  ;;  %v314_v13 = vmul.f32 %v946_v0, %v179_v10  ;;  %v180_v14 = vld [vmem:[%s951_s20 + $0x30] sm:$0xff]  ;;  %v181_v15 = vld [vmem:[%s951_s20 + $0x38] sm:$0xff]  ;;  %v182_v24 = vld [vmem:[%s951_s20 + $0x40] sm:$0xff] }
  0x13   : > { %v444_v16 = vadd.f32 %v956_v1, %v309_v5  ;;  %v445_v17 = vadd.f32 %v956_v1, %v310_v6  ;;  %v446_v18 = vadd.f32 %v956_v1, %v311_v7  ;;  %v315_v19 = vmul.f32 %v946_v0, %v180_v14  ;;  %v183_v25 = vld [vmem:[%s951_s20 + $0x48] sm:$0xff]  ;;  %v184_v26 = vld [vmem:[%s951_s20 + $0x50] sm:$0xff]  ;;  %v185_v31 = vld [vmem:[%s951_s20 + $0x58] sm:$0xff] }
  0x14   : > { %v447_v20 = vadd.f32 %v956_v1, %v312_v11  ;;  %v448_v21 = vadd.f32 %v956_v1, %v313_v12  ;;  %v449_v22 = vadd.f32 %v956_v1, %v314_v13  ;;  %v316_v23 = vmul.f32 %v946_v0, %v181_v15  ;;  %v186_v32 = vld [vmem:[%s951_s20 + $0x60] sm:$0xff]  ;;  %v187_v33 = vld [vmem:[%s951_s20 + $0x68] sm:$0xff]  ;;  %v188_v38 = vld [vmem:[%s951_s20 + $0x70] sm:$0xff] }
  0x15   : > { %v572_v27 = vmax.f32 %v444_v16, 0.0  ;;  %v573_v28 = vmax.f32 %v445_v17, 0.0  ;;  %v574_v29 = vmax.f32 %v446_v18, 0.0  ;;  %v450_v30 = vadd.f32 %v956_v1, %v315_v19  ;;  %v189_v43 = vld [vmem:[%s951_s20 + $0x78] sm:$0xff]  ;;  %v190_v56 = vld [vmem:[%s951_s20 + $0x80] sm:$0xff]  ;;  %v191_v57 = vld [vmem:[%s951_s20 + $0x88] sm:$0xff] }
  0x16   : > { %v575_v34 = vmax.f32 %v447_v20, 0.0  ;;  %v576_v35 = vmax.f32 %v448_v21, 0.0  ;;  %v577_v36 = vmax.f32 %v449_v22, 0.0  ;;  %v451_v37 = vadd.f32 %v956_v1, %v316_v23  ;;  %v192_v58 = vld [vmem:[%s951_s20 + $0x90] sm:$0xff]  ;;  %v193_v63 = vld [vmem:[%s951_s20 + $0x98] sm:$0xff]  ;;  %v194_v2 = vld [vmem:[%s951_s20 + $0xa0] sm:$0xff] }
  0x17   : > { %700 = vst [vmem:[%s979_s25] sm:$0xff] %v572_v27  ;;  %701 = vst [vmem:[%s979_s25 + $0x8] sm:$0xff] %v573_v28  ;;  %v578_v39 = vmax.f32 %v450_v30, 0.0  ;;  %v317_v40 = vmul.f32 %v946_v0, %v182_v24  ;;  %v318_v41 = vmul.f32 %v946_v0, %v183_v25  ;;  %v319_v42 = vmul.f32 %v946_v0, %v184_v26  ;;  %v195_v3 = vld [vmem:[%s951_s20 + $0xa8] sm:$0xff]  ;;  %v196_v8 = vld [vmem:[%s951_s20 + $0xb0] sm:$0xff] }
  0x18   : > { %702 = vst [vmem:[%s979_s25 + $0x10] sm:$0xff] %v574_v29  ;;  %703 = vst [vmem:[%s979_s25 + $0x18] sm:$0xff] %v575_v34  ;;  %v579_v44 = vmax.f32 %v451_v37, 0.0  ;;  %v320_v45 = vmul.f32 %v946_v0, %v185_v31  ;;  %v321_v46 = vmul.f32 %v946_v0, %v186_v32  ;;  %v322_v47 = vmul.f32 %v946_v0, %v187_v33  ;;  %v197_v13 = vld [vmem:[%s951_s20 + $0xb8] sm:$0xff]  ;;  %v198_v26 = vld [vmem:[%s951_s20 + $0xc0] sm:$0xff] }
  0x19   : > { %704 = vst [vmem:[%s979_s25 + $0x20] sm:$0xff] %v576_v35  ;;  %705 = vst [vmem:[%s979_s25 + $0x28] sm:$0xff] %v577_v36  ;;  %v452_v48 = vadd.f32 %v956_v1, %v317_v40  ;;  %v453_v49 = vadd.f32 %v956_v1, %v318_v41  ;;  %v454_v50 = vadd.f32 %v956_v1, %v319_v42  ;;  %v199_v27 = vld [vmem:[%s951_s20 + $0xc8] sm:$0xff]  ;;  %v200_v28 = vld [vmem:[%s951_s20 + $0xd0] sm:$0xff] }
  0x1a   : > { %706 = vst [vmem:[%s979_s25 + $0x30] sm:$0xff] %v578_v39  ;;  %v323_v51 = vmul.f32 %v946_v0, %v188_v38  ;;  %707 = vst [vmem:[%s979_s25 + $0x38] sm:$0xff] %v579_v44  ;;  %v455_v52 = vadd.f32 %v956_v1, %v320_v45  ;;  %v456_v53 = vadd.f32 %v956_v1, %v321_v46  ;;  %v201_v33 = vld [vmem:[%s951_s20 + $0xd8] sm:$0xff]  ;;  %v202_v34 = vld [vmem:[%s951_s20 + $0xe0] sm:$0xff] }
  0x1b   : > { %v457_v54 = vadd.f32 %v956_v1, %v322_v47  ;;  %v324_v55 = vmul.f32 %v946_v0, %v189_v43  ;;  %v580_v59 = vmax.f32 %v452_v48, 0.0  ;;  %v581_v60 = vmax.f32 %v453_v49, 0.0  ;;  %v203_v35 = vld [vmem:[%s951_s20 + $0xe8] sm:$0xff]  ;;  %v204_v40 = vld [vmem:[%s951_s20 + $0xf0] sm:$0xff]  ;;  %v205_v45 = vld [vmem:[%s951_s20 + $0xf8] sm:$0xff] }
  0x1c   : > { %v582_v61 = vmax.f32 %v454_v50, 0.0  ;;  %v458_v62 = vadd.f32 %v956_v1, %v323_v51  ;;  %v583_v4 = vmax.f32 %v455_v52, 0.0  ;;  %v584_v5 = vmax.f32 %v456_v53, 0.0 }
  0x1d   : > { %v585_v6 = vmax.f32 %v457_v54, 0.0  ;;  %v459_v7 = vadd.f32 %v956_v1, %v324_v55  ;;  %708 = vst [vmem:[%s979_s25 + $0x40] sm:$0xff] %v580_v59  ;;  %709 = vst [vmem:[%s979_s25 + $0x48] sm:$0xff] %v581_v60  ;;  %v325_v10 = vmul.f32 %v946_v0, %v190_v56  ;;  %v326_v11 = vmul.f32 %v946_v0, %v191_v57  ;;  %v207_v59 = vld [vmem:[%s951_s20 + $0x108] sm:$0xff]  ;;  %v208_v60 = vld [vmem:[%s951_s20 + $0x110] sm:$0xff] }
  0x1e   : > { %710 = vst [vmem:[%s979_s25 + $0x50] sm:$0xff] %v582_v61  ;;  %v586_v9 = vmax.f32 %v458_v62, 0.0  ;;  %v327_v12 = vmul.f32 %v946_v0, %v192_v58  ;;  %711 = vst [vmem:[%s979_s25 + $0x58] sm:$0xff] %v583_v4  ;;  %v328_v15 = vmul.f32 %v946_v0, %v193_v63  ;;  %v329_v16 = vmul.f32 %v946_v0, %v194_v2  ;;  %v206_v58 = vld [vmem:[%s951_s20 + $0x100] sm:$0xff] }
  0x1f   : > { %712 = vst [vmem:[%s979_s25 + $0x60] sm:$0xff] %v584_v5  ;;  %713 = vst [vmem:[%s979_s25 + $0x68] sm:$0xff] %v585_v6  ;;  %v587_v14 = vmax.f32 %v459_v7, 0.0  ;;  %v330_v17 = vmul.f32 %v946_v0, %v195_v3  ;;  %v460_v18 = vadd.f32 %v956_v1, %v325_v10  ;;  %v461_v19 = vadd.f32 %v956_v1, %v326_v11  ;;  %v209_v3 = vld [vmem:[%s951_s20 + $0x118] sm:$0xff]  ;;  %v210_v4 = vld [vmem:[%s951_s20 + $0x120] sm:$0xff] }
  0x20   : > { %714 = vst [vmem:[%s979_s25 + $0x70] sm:$0xff] %v586_v9  ;;  %v462_v20 = vadd.f32 %v956_v1, %v327_v12  ;;  %v331_v21 = vmul.f32 %v946_v0, %v196_v8  ;;  %v463_v22 = vadd.f32 %v956_v1, %v328_v15  ;;  %v464_v23 = vadd.f32 %v956_v1, %v329_v16  ;;  %v211_v5 = vld [vmem:[%s951_s20 + $0x128] sm:$0xff]  ;;  %v212_v10 = vld [vmem:[%s951_s20 + $0x130] sm:$0xff]  ;;  %v213_v15 = vld [vmem:[%s951_s20 + $0x138] sm:$0xff] }
  0x21   : > { %715 = vst [vmem:[%s979_s25 + $0x78] sm:$0xff] %v587_v14  ;;  %v465_v24 = vadd.f32 %v956_v1, %v330_v17  ;;  %v332_v25 = vmul.f32 %v946_v0, %v197_v13  ;;  %v588_v29 = vmax.f32 %v460_v18, 0.0  ;;  %v589_v30 = vmax.f32 %v461_v19, 0.0 }
  0x22   : > { %v590_v31 = vmax.f32 %v462_v20, 0.0  ;;  %v466_v32 = vadd.f32 %v956_v1, %v331_v21  ;;  %v591_v36 = vmax.f32 %v463_v22, 0.0  ;;  %v592_v37 = vmax.f32 %v464_v23, 0.0 }
  0x23   : > { %v593_v38 = vmax.f32 %v465_v24, 0.0  ;;  %v467_v39 = vadd.f32 %v956_v1, %v332_v25  ;;  %716 = vst [vmem:[%s979_s25 + $0x80] sm:$0xff] %v588_v29  ;;  %717 = vst [vmem:[%s979_s25 + $0x88] sm:$0xff] %v589_v30  ;;  %v333_v42 = vmul.f32 %v946_v0, %v198_v26  ;;  %v334_v43 = vmul.f32 %v946_v0, %v199_v27  ;;  %v215_v29 = vld [vmem:[%s951_s20 + $0x148] sm:$0xff]  ;;  %v216_v30 = vld [vmem:[%s951_s20 + $0x150] sm:$0xff] }
  0x24   : > { %718 = vst [vmem:[%s979_s25 + $0x90] sm:$0xff] %v590_v31  ;;  %v594_v41 = vmax.f32 %v466_v32, 0.0  ;;  %v335_v44 = vmul.f32 %v946_v0, %v200_v28  ;;  %719 = vst [vmem:[%s979_s25 + $0x98] sm:$0xff] %v591_v36  ;;  %v336_v47 = vmul.f32 %v946_v0, %v201_v33  ;;  %v337_v48 = vmul.f32 %v946_v0, %v202_v34  ;;  %v214_v28 = vld [vmem:[%s951_s20 + $0x140] sm:$0xff] }
  0x25   : > { %720 = vst [vmem:[%s979_s25 + $0xa0] sm:$0xff] %v592_v37  ;;  %721 = vst [vmem:[%s979_s25 + $0xa8] sm:$0xff] %v593_v38  ;;  %v595_v46 = vmax.f32 %v467_v39, 0.0  ;;  %v338_v49 = vmul.f32 %v946_v0, %v203_v35  ;;  %v468_v50 = vadd.f32 %v956_v1, %v333_v42  ;;  %v469_v51 = vadd.f32 %v956_v1, %v334_v43  ;;  %v217_v35 = vld [vmem:[%s951_s20 + $0x158] sm:$0xff]  ;;  %v218_v36 = vld [vmem:[%s951_s20 + $0x160] sm:$0xff] }
  0x26   : > { %722 = vst [vmem:[%s979_s25 + $0xb0] sm:$0xff] %v594_v41  ;;  %v470_v52 = vadd.f32 %v956_v1, %v335_v44  ;;  %v339_v53 = vmul.f32 %v946_v0, %v204_v40  ;;  %v471_v54 = vadd.f32 %v956_v1, %v336_v47  ;;  %v472_v55 = vadd.f32 %v956_v1, %v337_v48  ;;  %v219_v37 = vld [vmem:[%s951_s20 + $0x168] sm:$0xff]  ;;  %v220_v42 = vld [vmem:[%s951_s20 + $0x170] sm:$0xff]  ;;  %v221_v47 = vld [vmem:[%s951_s20 + $0x178] sm:$0xff] }
  0x27   : > { %723 = vst [vmem:[%s979_s25 + $0xb8] sm:$0xff] %v595_v46  ;;  %v473_v56 = vadd.f32 %v956_v1, %v338_v49  ;;  %v340_v57 = vmul.f32 %v946_v0, %v205_v45  ;;  %v596_v61 = vmax.f32 %v468_v50, 0.0  ;;  %v597_v62 = vmax.f32 %v469_v51, 0.0 }
  0x28   : > { %v598_v63 = vmax.f32 %v470_v52, 0.0  ;;  %v474_v2 = vadd.f32 %v956_v1, %v339_v53  ;;  %v599_v6 = vmax.f32 %v471_v54, 0.0  ;;  %v600_v7 = vmax.f32 %v472_v55, 0.0 }
  0x29   : > { %v601_v8 = vmax.f32 %v473_v56, 0.0  ;;  %v475_v9 = vadd.f32 %v956_v1, %v340_v57  ;;  %724 = vst [vmem:[%s979_s25 + $0xc0] sm:$0xff] %v596_v61  ;;  %725 = vst [vmem:[%s979_s25 + $0xc8] sm:$0xff] %v597_v62  ;;  %v341_v12 = vmul.f32 %v946_v0, %v206_v58  ;;  %v342_v13 = vmul.f32 %v946_v0, %v207_v59  ;;  %v223_v61 = vld [vmem:[%s951_s20 + $0x188] sm:$0xff]  ;;  %v224_v62 = vld [vmem:[%s951_s20 + $0x190] sm:$0xff] }
  0x2a   : > { %726 = vst [vmem:[%s979_s25 + $0xd0] sm:$0xff] %v598_v63  ;;  %v602_v11 = vmax.f32 %v474_v2, 0.0  ;;  %v343_v14 = vmul.f32 %v946_v0, %v208_v60  ;;  %727 = vst [vmem:[%s979_s25 + $0xd8] sm:$0xff] %v599_v6  ;;  %v344_v17 = vmul.f32 %v946_v0, %v209_v3  ;;  %v345_v18 = vmul.f32 %v946_v0, %v210_v4  ;;  %v222_v60 = vld [vmem:[%s951_s20 + $0x180] sm:$0xff] }
  0x2b   : > { %728 = vst [vmem:[%s979_s25 + $0xe0] sm:$0xff] %v600_v7  ;;  %729 = vst [vmem:[%s979_s25 + $0xe8] sm:$0xff] %v601_v8  ;;  %v603_v16 = vmax.f32 %v475_v9, 0.0  ;;  %v346_v19 = vmul.f32 %v946_v0, %v211_v5  ;;  %v476_v20 = vadd.f32 %v956_v1, %v341_v12  ;;  %v477_v21 = vadd.f32 %v956_v1, %v342_v13  ;;  %v225_v5 = vld [vmem:[%s951_s20 + $0x198] sm:$0xff]  ;;  %v226_v6 = vld [vmem:[%s951_s20 + $0x1a0] sm:$0xff] }
  0x2c   : > { %730 = vst [vmem:[%s979_s25 + $0xf0] sm:$0xff] %v602_v11  ;;  %v478_v22 = vadd.f32 %v956_v1, %v343_v14  ;;  %v347_v23 = vmul.f32 %v946_v0, %v212_v10  ;;  %v479_v24 = vadd.f32 %v956_v1, %v344_v17  ;;  %v480_v25 = vadd.f32 %v956_v1, %v345_v18  ;;  %v227_v7 = vld [vmem:[%s951_s20 + $0x1a8] sm:$0xff]  ;;  %v228_v12 = vld [vmem:[%s951_s20 + $0x1b0] sm:$0xff]  ;;  %v229_v17 = vld [vmem:[%s951_s20 + $0x1b8] sm:$0xff] }
  0x2d   : > { %731 = vst [vmem:[%s979_s25 + $0xf8] sm:$0xff] %v603_v16  ;;  %v481_v26 = vadd.f32 %v956_v1, %v346_v19  ;;  %v348_v27 = vmul.f32 %v946_v0, %v213_v15  ;;  %v604_v31 = vmax.f32 %v476_v20, 0.0  ;;  %v605_v32 = vmax.f32 %v477_v21, 0.0 }
  0x2e   : > { %v606_v33 = vmax.f32 %v478_v22, 0.0  ;;  %v482_v34 = vadd.f32 %v956_v1, %v347_v23  ;;  %v607_v38 = vmax.f32 %v479_v24, 0.0  ;;  %v608_v39 = vmax.f32 %v480_v25, 0.0 }
  0x2f   : > { %v609_v40 = vmax.f32 %v481_v26, 0.0  ;;  %v483_v41 = vadd.f32 %v956_v1, %v348_v27  ;;  %732 = vst [vmem:[%s979_s25 + $0x100] sm:$0xff] %v604_v31  ;;  %733 = vst [vmem:[%s979_s25 + $0x108] sm:$0xff] %v605_v32  ;;  %v349_v44 = vmul.f32 %v946_v0, %v214_v28  ;;  %v350_v45 = vmul.f32 %v946_v0, %v215_v29  ;;  %v231_v31 = vld [vmem:[%s951_s20 + $0x1c8] sm:$0xff]  ;;  %v232_v32 = vld [vmem:[%s951_s20 + $0x1d0] sm:$0xff] }
  0x30   : > { %734 = vst [vmem:[%s979_s25 + $0x110] sm:$0xff] %v606_v33  ;;  %v610_v43 = vmax.f32 %v482_v34, 0.0  ;;  %v351_v46 = vmul.f32 %v946_v0, %v216_v30  ;;  %735 = vst [vmem:[%s979_s25 + $0x118] sm:$0xff] %v607_v38  ;;  %v352_v49 = vmul.f32 %v946_v0, %v217_v35  ;;  %v353_v50 = vmul.f32 %v946_v0, %v218_v36  ;;  %v230_v30 = vld [vmem:[%s951_s20 + $0x1c0] sm:$0xff] }
  0x31   : > { %736 = vst [vmem:[%s979_s25 + $0x120] sm:$0xff] %v608_v39  ;;  %737 = vst [vmem:[%s979_s25 + $0x128] sm:$0xff] %v609_v40  ;;  %v611_v48 = vmax.f32 %v483_v41, 0.0  ;;  %v354_v51 = vmul.f32 %v946_v0, %v219_v37  ;;  %v484_v52 = vadd.f32 %v956_v1, %v349_v44  ;;  %v485_v53 = vadd.f32 %v956_v1, %v350_v45  ;;  %v233_v37 = vld [vmem:[%s951_s20 + $0x1d8] sm:$0xff]  ;;  %v234_v38 = vld [vmem:[%s951_s20 + $0x1e0] sm:$0xff] }
  0x32   : > { %738 = vst [vmem:[%s979_s25 + $0x130] sm:$0xff] %v610_v43  ;;  %v486_v54 = vadd.f32 %v956_v1, %v351_v46  ;;  %v355_v55 = vmul.f32 %v946_v0, %v220_v42  ;;  %v487_v56 = vadd.f32 %v956_v1, %v352_v49  ;;  %v488_v57 = vadd.f32 %v956_v1, %v353_v50  ;;  %v235_v39 = vld [vmem:[%s951_s20 + $0x1e8] sm:$0xff]  ;;  %v236_v44 = vld [vmem:[%s951_s20 + $0x1f0] sm:$0xff]  ;;  %v237_v49 = vld [vmem:[%s951_s20 + $0x1f8] sm:$0xff] }
  0x33   : > { %739 = vst [vmem:[%s979_s25 + $0x138] sm:$0xff] %v611_v48  ;;  %v489_v58 = vadd.f32 %v956_v1, %v354_v51  ;;  %v356_v59 = vmul.f32 %v946_v0, %v221_v47  ;;  %v612_v63 = vmax.f32 %v484_v52, 0.0  ;;  %v613_v2 = vmax.f32 %v485_v53, 0.0 }
  0x34   : > { %v614_v3 = vmax.f32 %v486_v54, 0.0  ;;  %v490_v4 = vadd.f32 %v956_v1, %v355_v55  ;;  %v615_v8 = vmax.f32 %v487_v56, 0.0  ;;  %v616_v9 = vmax.f32 %v488_v57, 0.0 }
  0x35   : > { %v617_v10 = vmax.f32 %v489_v58, 0.0  ;;  %v491_v11 = vadd.f32 %v956_v1, %v356_v59  ;;  %740 = vst [vmem:[%s979_s25 + $0x140] sm:$0xff] %v612_v63  ;;  %741 = vst [vmem:[%s979_s25 + $0x148] sm:$0xff] %v613_v2  ;;  %v357_v14 = vmul.f32 %v946_v0, %v222_v60  ;;  %v358_v15 = vmul.f32 %v946_v0, %v223_v61  ;;  %v239_v63 = vld [vmem:[%s951_s20 + $0x208] sm:$0xff]  ;;  %v240_v2 = vld [vmem:[%s951_s20 + $0x210] sm:$0xff] }
  0x36   : > { %742 = vst [vmem:[%s979_s25 + $0x150] sm:$0xff] %v614_v3  ;;  %v618_v13 = vmax.f32 %v490_v4, 0.0  ;;  %v359_v16 = vmul.f32 %v946_v0, %v224_v62  ;;  %743 = vst [vmem:[%s979_s25 + $0x158] sm:$0xff] %v615_v8  ;;  %v360_v19 = vmul.f32 %v946_v0, %v225_v5  ;;  %v361_v20 = vmul.f32 %v946_v0, %v226_v6  ;;  %v238_v62 = vld [vmem:[%s951_s20 + $0x200] sm:$0xff] }
  0x37   : > { %744 = vst [vmem:[%s979_s25 + $0x160] sm:$0xff] %v616_v9  ;;  %745 = vst [vmem:[%s979_s25 + $0x168] sm:$0xff] %v617_v10  ;;  %v619_v18 = vmax.f32 %v491_v11, 0.0  ;;  %v362_v21 = vmul.f32 %v946_v0, %v227_v7  ;;  %v492_v22 = vadd.f32 %v956_v1, %v357_v14  ;;  %v493_v23 = vadd.f32 %v956_v1, %v358_v15  ;;  %v241_v7 = vld [vmem:[%s951_s20 + $0x218] sm:$0xff]  ;;  %v242_v8 = vld [vmem:[%s951_s20 + $0x220] sm:$0xff] }
  0x38   : > { %746 = vst [vmem:[%s979_s25 + $0x170] sm:$0xff] %v618_v13  ;;  %v494_v24 = vadd.f32 %v956_v1, %v359_v16  ;;  %v363_v25 = vmul.f32 %v946_v0, %v228_v12  ;;  %v495_v26 = vadd.f32 %v956_v1, %v360_v19  ;;  %v496_v27 = vadd.f32 %v956_v1, %v361_v20  ;;  %v243_v9 = vld [vmem:[%s951_s20 + $0x228] sm:$0xff]  ;;  %v244_v14 = vld [vmem:[%s951_s20 + $0x230] sm:$0xff]  ;;  %v245_v19 = vld [vmem:[%s951_s20 + $0x238] sm:$0xff] }
  0x39   : > { %747 = vst [vmem:[%s979_s25 + $0x178] sm:$0xff] %v619_v18  ;;  %v497_v28 = vadd.f32 %v956_v1, %v362_v21  ;;  %v364_v29 = vmul.f32 %v946_v0, %v229_v17  ;;  %v620_v33 = vmax.f32 %v492_v22, 0.0  ;;  %v621_v34 = vmax.f32 %v493_v23, 0.0 }
  0x3a   : > { %v622_v35 = vmax.f32 %v494_v24, 0.0  ;;  %v498_v36 = vadd.f32 %v956_v1, %v363_v25  ;;  %v623_v40 = vmax.f32 %v495_v26, 0.0  ;;  %v624_v41 = vmax.f32 %v496_v27, 0.0 }
  0x3b   : > { %v625_v42 = vmax.f32 %v497_v28, 0.0  ;;  %v499_v43 = vadd.f32 %v956_v1, %v364_v29  ;;  %748 = vst [vmem:[%s979_s25 + $0x180] sm:$0xff] %v620_v33  ;;  %749 = vst [vmem:[%s979_s25 + $0x188] sm:$0xff] %v621_v34  ;;  %v365_v46 = vmul.f32 %v946_v0, %v230_v30  ;;  %v366_v47 = vmul.f32 %v946_v0, %v231_v31  ;;  %v247_v33 = vld [vmem:[%s951_s20 + $0x248] sm:$0xff]  ;;  %v248_v34 = vld [vmem:[%s951_s20 + $0x250] sm:$0xff] }
  0x3c   : > { %750 = vst [vmem:[%s979_s25 + $0x190] sm:$0xff] %v622_v35  ;;  %v626_v45 = vmax.f32 %v498_v36, 0.0  ;;  %v367_v48 = vmul.f32 %v946_v0, %v232_v32  ;;  %751 = vst [vmem:[%s979_s25 + $0x198] sm:$0xff] %v623_v40  ;;  %v368_v51 = vmul.f32 %v946_v0, %v233_v37  ;;  %v369_v52 = vmul.f32 %v946_v0, %v234_v38  ;;  %v246_v32 = vld [vmem:[%s951_s20 + $0x240] sm:$0xff] }
  0x3d   : > { %752 = vst [vmem:[%s979_s25 + $0x1a0] sm:$0xff] %v624_v41  ;;  %753 = vst [vmem:[%s979_s25 + $0x1a8] sm:$0xff] %v625_v42  ;;  %v627_v50 = vmax.f32 %v499_v43, 0.0  ;;  %v370_v53 = vmul.f32 %v946_v0, %v235_v39  ;;  %v500_v54 = vadd.f32 %v956_v1, %v365_v46  ;;  %v501_v55 = vadd.f32 %v956_v1, %v366_v47  ;;  %v249_v39 = vld [vmem:[%s951_s20 + $0x258] sm:$0xff]  ;;  %v250_v40 = vld [vmem:[%s951_s20 + $0x260] sm:$0xff] }
  0x3e   : > { %754 = vst [vmem:[%s979_s25 + $0x1b0] sm:$0xff] %v626_v45  ;;  %v502_v56 = vadd.f32 %v956_v1, %v367_v48  ;;  %v371_v57 = vmul.f32 %v946_v0, %v236_v44  ;;  %v503_v58 = vadd.f32 %v956_v1, %v368_v51  ;;  %v504_v59 = vadd.f32 %v956_v1, %v369_v52  ;;  %v251_v41 = vld [vmem:[%s951_s20 + $0x268] sm:$0xff]  ;;  %v252_v46 = vld [vmem:[%s951_s20 + $0x270] sm:$0xff]  ;;  %v253_v51 = vld [vmem:[%s951_s20 + $0x278] sm:$0xff] }
  0x3f   : > { %755 = vst [vmem:[%s979_s25 + $0x1b8] sm:$0xff] %v627_v50  ;;  %v505_v60 = vadd.f32 %v956_v1, %v370_v53  ;;  %v372_v61 = vmul.f32 %v946_v0, %v237_v49  ;;  %v628_v3 = vmax.f32 %v500_v54, 0.0  ;;  %v629_v4 = vmax.f32 %v501_v55, 0.0 }
  0x40   : > { %v630_v5 = vmax.f32 %v502_v56, 0.0  ;;  %v506_v6 = vadd.f32 %v956_v1, %v371_v57  ;;  %v631_v10 = vmax.f32 %v503_v58, 0.0  ;;  %v632_v11 = vmax.f32 %v504_v59, 0.0 }
  0x41   : > { %v633_v12 = vmax.f32 %v505_v60, 0.0  ;;  %v507_v13 = vadd.f32 %v956_v1, %v372_v61  ;;  %756 = vst [vmem:[%s979_s25 + $0x1c0] sm:$0xff] %v628_v3  ;;  %757 = vst [vmem:[%s979_s25 + $0x1c8] sm:$0xff] %v629_v4  ;;  %v373_v16 = vmul.f32 %v946_v0, %v238_v62  ;;  %v374_v17 = vmul.f32 %v946_v0, %v239_v63  ;;  %v255_v3 = vld [vmem:[%s951_s20 + $0x288] sm:$0xff]  ;;  %v256_v4 = vld [vmem:[%s951_s20 + $0x290] sm:$0xff] }
  0x42   : > { %758 = vst [vmem:[%s979_s25 + $0x1d0] sm:$0xff] %v630_v5  ;;  %v634_v15 = vmax.f32 %v506_v6, 0.0  ;;  %v375_v18 = vmul.f32 %v946_v0, %v240_v2  ;;  %759 = vst [vmem:[%s979_s25 + $0x1d8] sm:$0xff] %v631_v10  ;;  %v376_v21 = vmul.f32 %v946_v0, %v241_v7  ;;  %v377_v22 = vmul.f32 %v946_v0, %v242_v8  ;;  %v254_v2 = vld [vmem:[%s951_s20 + $0x280] sm:$0xff] }
  0x43   : > { %760 = vst [vmem:[%s979_s25 + $0x1e0] sm:$0xff] %v632_v11  ;;  %761 = vst [vmem:[%s979_s25 + $0x1e8] sm:$0xff] %v633_v12  ;;  %v635_v20 = vmax.f32 %v507_v13, 0.0  ;;  %v378_v23 = vmul.f32 %v946_v0, %v243_v9  ;;  %v508_v24 = vadd.f32 %v956_v1, %v373_v16  ;;  %v509_v25 = vadd.f32 %v956_v1, %v374_v17  ;;  %v257_v9 = vld [vmem:[%s951_s20 + $0x298] sm:$0xff]  ;;  %v258_v10 = vld [vmem:[%s951_s20 + $0x2a0] sm:$0xff] }
  0x44   : > { %762 = vst [vmem:[%s979_s25 + $0x1f0] sm:$0xff] %v634_v15  ;;  %v510_v26 = vadd.f32 %v956_v1, %v375_v18  ;;  %v379_v27 = vmul.f32 %v946_v0, %v244_v14  ;;  %v511_v28 = vadd.f32 %v956_v1, %v376_v21  ;;  %v512_v29 = vadd.f32 %v956_v1, %v377_v22  ;;  %v259_v11 = vld [vmem:[%s951_s20 + $0x2a8] sm:$0xff]  ;;  %v260_v16 = vld [vmem:[%s951_s20 + $0x2b0] sm:$0xff]  ;;  %v261_v21 = vld [vmem:[%s951_s20 + $0x2b8] sm:$0xff] }
  0x45   : > { %763 = vst [vmem:[%s979_s25 + $0x1f8] sm:$0xff] %v635_v20  ;;  %v513_v30 = vadd.f32 %v956_v1, %v378_v23  ;;  %v380_v31 = vmul.f32 %v946_v0, %v245_v19  ;;  %v636_v35 = vmax.f32 %v508_v24, 0.0  ;;  %v637_v36 = vmax.f32 %v509_v25, 0.0 }
  0x46   : > { %v638_v37 = vmax.f32 %v510_v26, 0.0  ;;  %v514_v38 = vadd.f32 %v956_v1, %v379_v27  ;;  %v639_v42 = vmax.f32 %v511_v28, 0.0  ;;  %v640_v43 = vmax.f32 %v512_v29, 0.0 }
  0x47   : > { %v641_v44 = vmax.f32 %v513_v30, 0.0  ;;  %v515_v45 = vadd.f32 %v956_v1, %v380_v31  ;;  %764 = vst [vmem:[%s979_s25 + $0x200] sm:$0xff] %v636_v35  ;;  %765 = vst [vmem:[%s979_s25 + $0x208] sm:$0xff] %v637_v36  ;;  %v381_v48 = vmul.f32 %v946_v0, %v246_v32  ;;  %v382_v49 = vmul.f32 %v946_v0, %v247_v33  ;;  %v263_v35 = vld [vmem:[%s951_s20 + $0x2c8] sm:$0xff]  ;;  %v264_v36 = vld [vmem:[%s951_s20 + $0x2d0] sm:$0xff] }
  0x48   : > { %766 = vst [vmem:[%s979_s25 + $0x210] sm:$0xff] %v638_v37  ;;  %v642_v47 = vmax.f32 %v514_v38, 0.0  ;;  %v383_v50 = vmul.f32 %v946_v0, %v248_v34  ;;  %767 = vst [vmem:[%s979_s25 + $0x218] sm:$0xff] %v639_v42  ;;  %v384_v53 = vmul.f32 %v946_v0, %v249_v39  ;;  %v385_v54 = vmul.f32 %v946_v0, %v250_v40  ;;  %v262_v34 = vld [vmem:[%s951_s20 + $0x2c0] sm:$0xff] }
  0x49   : > { %768 = vst [vmem:[%s979_s25 + $0x220] sm:$0xff] %v640_v43  ;;  %769 = vst [vmem:[%s979_s25 + $0x228] sm:$0xff] %v641_v44  ;;  %v643_v52 = vmax.f32 %v515_v45, 0.0  ;;  %v386_v55 = vmul.f32 %v946_v0, %v251_v41  ;;  %v516_v56 = vadd.f32 %v956_v1, %v381_v48  ;;  %v517_v57 = vadd.f32 %v956_v1, %v382_v49  ;;  %v265_v41 = vld [vmem:[%s951_s20 + $0x2d8] sm:$0xff]  ;;  %v266_v42 = vld [vmem:[%s951_s20 + $0x2e0] sm:$0xff] }
  0x4a   : > { %770 = vst [vmem:[%s979_s25 + $0x230] sm:$0xff] %v642_v47  ;;  %v518_v58 = vadd.f32 %v956_v1, %v383_v50  ;;  %v387_v59 = vmul.f32 %v946_v0, %v252_v46  ;;  %v519_v60 = vadd.f32 %v956_v1, %v384_v53  ;;  %v520_v61 = vadd.f32 %v956_v1, %v385_v54  ;;  %v267_v43 = vld [vmem:[%s951_s20 + $0x2e8] sm:$0xff]  ;;  %v268_v48 = vld [vmem:[%s951_s20 + $0x2f0] sm:$0xff]  ;;  %v269_v53 = vld [vmem:[%s951_s20 + $0x2f8] sm:$0xff] }
  0x4b   : > { %771 = vst [vmem:[%s979_s25 + $0x238] sm:$0xff] %v643_v52  ;;  %v521_v62 = vadd.f32 %v956_v1, %v386_v55  ;;  %v388_v63 = vmul.f32 %v946_v0, %v253_v51  ;;  %v644_v5 = vmax.f32 %v516_v56, 0.0  ;;  %v645_v6 = vmax.f32 %v517_v57, 0.0 }
  0x4c   : > { %v646_v7 = vmax.f32 %v518_v58, 0.0  ;;  %v522_v8 = vadd.f32 %v956_v1, %v387_v59  ;;  %v647_v12 = vmax.f32 %v519_v60, 0.0  ;;  %v648_v13 = vmax.f32 %v520_v61, 0.0 }
  0x4d   : > { %v649_v14 = vmax.f32 %v521_v62, 0.0  ;;  %v523_v15 = vadd.f32 %v956_v1, %v388_v63  ;;  %772 = vst [vmem:[%s979_s25 + $0x240] sm:$0xff] %v644_v5  ;;  %773 = vst [vmem:[%s979_s25 + $0x248] sm:$0xff] %v645_v6  ;;  %v389_v18 = vmul.f32 %v946_v0, %v254_v2  ;;  %v390_v19 = vmul.f32 %v946_v0, %v255_v3  ;;  %v271_v5 = vld [vmem:[%s951_s20 + $0x308] sm:$0xff]  ;;  %v272_v6 = vld [vmem:[%s951_s20 + $0x310] sm:$0xff] }
  0x4e   : > { %774 = vst [vmem:[%s979_s25 + $0x250] sm:$0xff] %v646_v7  ;;  %v650_v17 = vmax.f32 %v522_v8, 0.0  ;;  %v391_v20 = vmul.f32 %v946_v0, %v256_v4  ;;  %775 = vst [vmem:[%s979_s25 + $0x258] sm:$0xff] %v647_v12  ;;  %v392_v23 = vmul.f32 %v946_v0, %v257_v9  ;;  %v393_v24 = vmul.f32 %v946_v0, %v258_v10  ;;  %v270_v4 = vld [vmem:[%s951_s20 + $0x300] sm:$0xff] }
  0x4f   : > { %776 = vst [vmem:[%s979_s25 + $0x260] sm:$0xff] %v648_v13  ;;  %777 = vst [vmem:[%s979_s25 + $0x268] sm:$0xff] %v649_v14  ;;  %v651_v22 = vmax.f32 %v523_v15, 0.0  ;;  %v394_v25 = vmul.f32 %v946_v0, %v259_v11  ;;  %v524_v26 = vadd.f32 %v956_v1, %v389_v18  ;;  %v525_v27 = vadd.f32 %v956_v1, %v390_v19  ;;  %v273_v11 = vld [vmem:[%s951_s20 + $0x318] sm:$0xff]  ;;  %v274_v12 = vld [vmem:[%s951_s20 + $0x320] sm:$0xff] }
  0x50   : > { %778 = vst [vmem:[%s979_s25 + $0x270] sm:$0xff] %v650_v17  ;;  %v526_v28 = vadd.f32 %v956_v1, %v391_v20  ;;  %v395_v29 = vmul.f32 %v946_v0, %v260_v16  ;;  %v527_v30 = vadd.f32 %v956_v1, %v392_v23  ;;  %v528_v31 = vadd.f32 %v956_v1, %v393_v24  ;;  %v275_v13 = vld [vmem:[%s951_s20 + $0x328] sm:$0xff]  ;;  %v276_v18 = vld [vmem:[%s951_s20 + $0x330] sm:$0xff]  ;;  %v277_v23 = vld [vmem:[%s951_s20 + $0x338] sm:$0xff] }
  0x51   : > { %779 = vst [vmem:[%s979_s25 + $0x278] sm:$0xff] %v651_v22  ;;  %v529_v32 = vadd.f32 %v956_v1, %v394_v25  ;;  %v396_v33 = vmul.f32 %v946_v0, %v261_v21  ;;  %v652_v37 = vmax.f32 %v524_v26, 0.0  ;;  %v653_v38 = vmax.f32 %v525_v27, 0.0 }
  0x52   : > { %v654_v39 = vmax.f32 %v526_v28, 0.0  ;;  %v530_v40 = vadd.f32 %v956_v1, %v395_v29  ;;  %v655_v44 = vmax.f32 %v527_v30, 0.0  ;;  %v656_v45 = vmax.f32 %v528_v31, 0.0 }
  0x53   : > { %v657_v46 = vmax.f32 %v529_v32, 0.0  ;;  %v531_v47 = vadd.f32 %v956_v1, %v396_v33  ;;  %780 = vst [vmem:[%s979_s25 + $0x280] sm:$0xff] %v652_v37  ;;  %781 = vst [vmem:[%s979_s25 + $0x288] sm:$0xff] %v653_v38  ;;  %v397_v50 = vmul.f32 %v946_v0, %v262_v34  ;;  %v398_v51 = vmul.f32 %v946_v0, %v263_v35  ;;  %v279_v37 = vld [vmem:[%s951_s20 + $0x348] sm:$0xff]  ;;  %v280_v38 = vld [vmem:[%s951_s20 + $0x350] sm:$0xff] }
  0x54   : > { %782 = vst [vmem:[%s979_s25 + $0x290] sm:$0xff] %v654_v39  ;;  %v658_v49 = vmax.f32 %v530_v40, 0.0  ;;  %v399_v52 = vmul.f32 %v946_v0, %v264_v36  ;;  %783 = vst [vmem:[%s979_s25 + $0x298] sm:$0xff] %v655_v44  ;;  %v400_v55 = vmul.f32 %v946_v0, %v265_v41  ;;  %v401_v56 = vmul.f32 %v946_v0, %v266_v42  ;;  %v278_v36 = vld [vmem:[%s951_s20 + $0x340] sm:$0xff] }
  0x55   : > { %784 = vst [vmem:[%s979_s25 + $0x2a0] sm:$0xff] %v656_v45  ;;  %785 = vst [vmem:[%s979_s25 + $0x2a8] sm:$0xff] %v657_v46  ;;  %v659_v54 = vmax.f32 %v531_v47, 0.0  ;;  %v402_v57 = vmul.f32 %v946_v0, %v267_v43  ;;  %v532_v58 = vadd.f32 %v956_v1, %v397_v50  ;;  %v533_v59 = vadd.f32 %v956_v1, %v398_v51  ;;  %v281_v43 = vld [vmem:[%s951_s20 + $0x358] sm:$0xff]  ;;  %v282_v44 = vld [vmem:[%s951_s20 + $0x360] sm:$0xff] }
  0x56   : > { %786 = vst [vmem:[%s979_s25 + $0x2b0] sm:$0xff] %v658_v49  ;;  %v534_v60 = vadd.f32 %v956_v1, %v399_v52  ;;  %v403_v61 = vmul.f32 %v946_v0, %v268_v48  ;;  %v535_v62 = vadd.f32 %v956_v1, %v400_v55  ;;  %v536_v63 = vadd.f32 %v956_v1, %v401_v56  ;;  %v283_v45 = vld [vmem:[%s951_s20 + $0x368] sm:$0xff]  ;;  %v1379_v48 = vld [vmem:[%s1490_s2] ss:$0 sm:$0xff]  ;;  %v284_v50 = vld [vmem:[%s951_s20 + $0x370] sm:$0xff] }
  0x57   : > { %787 = vst [vmem:[%s979_s25 + $0x2b8] sm:$0xff] %v659_v54  ;;  %v537_v2 = vadd.f32 %v956_v1, %v402_v57  ;;  %v404_v3 = vmul.f32 %v946_v0, %v269_v53  ;;  %v660_v7 = vmax.f32 %v532_v58, 0.0  ;;  %v661_v8 = vmax.f32 %v533_v59, 0.0  ;;  %v1389_v51 = vld [vmem:[%s1489_s1] ss:$0 sm:$0xff]  ;;  %v285_v55 = vld [vmem:[%s951_s20 + $0x378] sm:$0xff] }
  0x58   : > { %v662_v9 = vmax.f32 %v534_v60, 0.0  ;;  %v538_v10 = vadd.f32 %v956_v1, %v403_v61  ;;  %v663_v14 = vmax.f32 %v535_v62, 0.0  ;;  %v664_v15 = vmax.f32 %v536_v63, 0.0 }
  0x59   : > { %v665_v16 = vmax.f32 %v537_v2, 0.0  ;;  %v539_v17 = vadd.f32 %v956_v1, %v404_v3  ;;  %788 = vst [vmem:[%s979_s25 + $0x2c0] sm:$0xff] %v660_v7  ;;  %789 = vst [vmem:[%s979_s25 + $0x2c8] sm:$0xff] %v661_v8  ;;  %v405_v20 = vmul.f32 %v946_v0, %v270_v4  ;;  %v406_v21 = vmul.f32 %v946_v0, %v271_v5  ;;  %v287_v7 = vld [vmem:[%s951_s20 + $0x388] sm:$0xff]  ;;  %v288_v8 = vld [vmem:[%s951_s20 + $0x390] sm:$0xff] }
  0x5a   : > { %790 = vst [vmem:[%s979_s25 + $0x2d0] sm:$0xff] %v662_v9  ;;  %v666_v19 = vmax.f32 %v538_v10, 0.0  ;;  %v407_v22 = vmul.f32 %v946_v0, %v272_v6  ;;  %791 = vst [vmem:[%s979_s25 + $0x2d8] sm:$0xff] %v663_v14  ;;  %v408_v25 = vmul.f32 %v946_v0, %v273_v11  ;;  %v409_v26 = vmul.f32 %v946_v0, %v274_v12  ;;  %v286_v6 = vld [vmem:[%s951_s20 + $0x380] sm:$0xff] }
  0x5b   : > { %792 = vst [vmem:[%s979_s25 + $0x2e0] sm:$0xff] %v664_v15  ;;  %793 = vst [vmem:[%s979_s25 + $0x2e8] sm:$0xff] %v665_v16  ;;  %v667_v24 = vmax.f32 %v539_v17, 0.0  ;;  %v410_v27 = vmul.f32 %v946_v0, %v275_v13  ;;  %v540_v28 = vadd.f32 %v956_v1, %v405_v20  ;;  %v541_v29 = vadd.f32 %v956_v1, %v406_v21  ;;  %v289_v13 = vld [vmem:[%s951_s20 + $0x398] sm:$0xff]  ;;  %v290_v14 = vld [vmem:[%s951_s20 + $0x3a0] sm:$0xff] }
  0x5c   : > { %794 = vst [vmem:[%s979_s25 + $0x2f0] sm:$0xff] %v666_v19  ;;  %v542_v30 = vadd.f32 %v956_v1, %v407_v22  ;;  %v411_v31 = vmul.f32 %v946_v0, %v276_v18  ;;  %v543_v32 = vadd.f32 %v956_v1, %v408_v25  ;;  %v544_v33 = vadd.f32 %v956_v1, %v409_v26  ;;  %v291_v15 = vld [vmem:[%s951_s20 + $0x3a8] sm:$0xff]  ;;  %v292_v20 = vld [vmem:[%s951_s20 + $0x3b0] sm:$0xff]  ;;  %v293_v25 = vld [vmem:[%s951_s20 + $0x3b8] sm:$0xff] }
  0x5d   : > { %795 = vst [vmem:[%s979_s25 + $0x2f8] sm:$0xff] %v667_v24  ;;  %v545_v34 = vadd.f32 %v956_v1, %v410_v27  ;;  %v412_v35 = vmul.f32 %v946_v0, %v277_v23  ;;  %v668_v39 = vmax.f32 %v540_v28, 0.0  ;;  %v669_v40 = vmax.f32 %v541_v29, 0.0 }
  0x5e   : > { %v670_v41 = vmax.f32 %v542_v30, 0.0  ;;  %v546_v42 = vadd.f32 %v956_v1, %v411_v31  ;;  %v671_v46 = vmax.f32 %v543_v32, 0.0  ;;  %v672_v0 = vmax.f32 %v544_v33, 0.0 }
  0x5f   : > { %v673_v47 = vmax.f32 %v545_v34, 0.0  ;;  %v547_v49 = vadd.f32 %v1379_v48, %v412_v35  ;;  %796 = vst [vmem:[%s979_s25 + $0x300] sm:$0xff] %v668_v39  ;;  %797 = vst [vmem:[%s979_s25 + $0x308] sm:$0xff] %v669_v40  ;;  %v413_v52 = vmul.f32 %v1389_v51, %v278_v36  ;;  %v414_v53 = vmul.f32 %v1389_v51, %v279_v37  ;;  %v295_v39 = vld [vmem:[%s951_s20 + $0x3c8] sm:$0xff]  ;;  %v296_v40 = vld [vmem:[%s951_s20 + $0x3d0] sm:$0xff] }
  0x60   : > { %798 = vst [vmem:[%s979_s25 + $0x310] sm:$0xff] %v670_v41  ;;  %v674_v1 = vmax.f32 %v546_v42, 0.0  ;;  %v415_v54 = vmul.f32 %v1389_v51, %v280_v38  ;;  %799 = vst [vmem:[%s979_s25 + $0x318] sm:$0xff] %v671_v46  ;;  %v416_v57 = vmul.f32 %v1389_v51, %v281_v43  ;;  %v417_v58 = vmul.f32 %v1389_v51, %v282_v44  ;;  %v294_v38 = vld [vmem:[%s951_s20 + $0x3c0] sm:$0xff] }
  0x61   : > { %800 = vst [vmem:[%s979_s25 + $0x320] sm:$0xff] %v672_v0  ;;  %801 = vst [vmem:[%s979_s25 + $0x328] sm:$0xff] %v673_v47  ;;  %v675_v56 = vmax.f32 %v547_v49, 0.0  ;;  %v418_v59 = vmul.f32 %v1389_v51, %v283_v45  ;;  %v548_v60 = vadd.f32 %v1379_v48, %v413_v52  ;;  %v549_v61 = vadd.f32 %v1379_v48, %v414_v53  ;;  %v297_v45 = vld [vmem:[%s951_s20 + $0x3d8] sm:$0xff]  ;;  %v298_v46 = vld [vmem:[%s951_s20 + $0x3e0] sm:$0xff] }
  0x62   : > { %802 = vst [vmem:[%s979_s25 + $0x330] sm:$0xff] %v674_v1  ;;  %v550_v62 = vadd.f32 %v1379_v48, %v415_v54  ;;  %v419_v63 = vmul.f32 %v1389_v51, %v284_v50  ;;  %v551_v2 = vadd.f32 %v1379_v48, %v416_v57  ;;  %v552_v3 = vadd.f32 %v1379_v48, %v417_v58  ;;  %v299_v0 = vld [vmem:[%s951_s20 + $0x3e8] sm:$0xff]  ;;  %v300_v52 = vld [vmem:[%s951_s20 + $0x3f0] sm:$0xff]  ;;  %v301_v57 = vld [vmem:[%s951_s20 + $0x3f8] sm:$0xff] }
  0x63   : > { %803 = vst [vmem:[%s979_s25 + $0x338] sm:$0xff] %v675_v56  ;;  %v553_v4 = vadd.f32 %v1379_v48, %v418_v59  ;;  %v420_v5 = vmul.f32 %v1389_v51, %v285_v55  ;;  %v676_v9 = vmax.f32 %v548_v60, 0.0  ;;  %v677_v10 = vmax.f32 %v549_v61, 0.0 }
  0x64   : > { %v678_v11 = vmax.f32 %v550_v62, 0.0  ;;  %v554_v12 = vadd.f32 %v1379_v48, %v419_v63  ;;  %v679_v16 = vmax.f32 %v551_v2, 0.0  ;;  %v680_v17 = vmax.f32 %v552_v3, 0.0 }
  0x65   : > { %v681_v18 = vmax.f32 %v553_v4, 0.0  ;;  %v555_v19 = vadd.f32 %v1379_v48, %v420_v5  ;;  %804 = vst [vmem:[%s979_s25 + $0x340] sm:$0xff] %v676_v9  ;;  %805 = vst [vmem:[%s979_s25 + $0x348] sm:$0xff] %v677_v10  ;;  %v421_v22 = vmul.f32 %v1389_v51, %v286_v6  ;;  %v422_v23 = vmul.f32 %v1389_v51, %v287_v7 }
  0x66   : > { %806 = vst [vmem:[%s979_s25 + $0x350] sm:$0xff] %v678_v11  ;;  %v682_v21 = vmax.f32 %v554_v12, 0.0  ;;  %v423_v24 = vmul.f32 %v1389_v51, %v288_v8  ;;  %807 = vst [vmem:[%s979_s25 + $0x358] sm:$0xff] %v679_v16  ;;  %v424_v27 = vmul.f32 %v1389_v51, %v289_v13  ;;  %v425_v28 = vmul.f32 %v1389_v51, %v290_v14 }
  0x67   : > { %808 = vst [vmem:[%s979_s25 + $0x360] sm:$0xff] %v680_v17  ;;  %809 = vst [vmem:[%s979_s25 + $0x368] sm:$0xff] %v681_v18  ;;  %v683_v26 = vmax.f32 %v555_v19, 0.0  ;;  %v426_v29 = vmul.f32 %v1389_v51, %v291_v15  ;;  %v556_v30 = vadd.f32 %v1379_v48, %v421_v22  ;;  %v557_v31 = vadd.f32 %v1379_v48, %v422_v23 }
  0x68   : > { %810 = vst [vmem:[%s979_s25 + $0x370] sm:$0xff] %v682_v21  ;;  %v558_v32 = vadd.f32 %v1379_v48, %v423_v24  ;;  %v427_v33 = vmul.f32 %v1389_v51, %v292_v20  ;;  %v559_v34 = vadd.f32 %v1379_v48, %v424_v27  ;;  %v560_v35 = vadd.f32 %v1379_v48, %v425_v28 }
  0x69   : > { %811 = vst [vmem:[%s979_s25 + $0x378] sm:$0xff] %v683_v26  ;;  %v561_v36 = vadd.f32 %v1379_v48, %v426_v29  ;;  %v428_v37 = vmul.f32 %v1389_v51, %v293_v25  ;;  %v684_v41 = vmax.f32 %v556_v30, 0.0  ;;  %v685_v42 = vmax.f32 %v557_v31, 0.0 }
  0x6a   : > { %v686_v43 = vmax.f32 %v558_v32, 0.0  ;;  %v562_v44 = vadd.f32 %v1379_v48, %v427_v33  ;;  %v687_v47 = vmax.f32 %v559_v34, 0.0  ;;  %v688_v49 = vmax.f32 %v560_v35, 0.0 }
  0x6b   : > { %v689_v50 = vmax.f32 %v561_v36, 0.0  ;;  %v563_v1 = vadd.f32 %v1379_v48, %v428_v37  ;;  %812 = vst [vmem:[%s979_s25 + $0x380] sm:$0xff] %v684_v41  ;;  %813 = vst [vmem:[%s979_s25 + $0x388] sm:$0xff] %v685_v42  ;;  %v429_v54 = vmul.f32 %v1389_v51, %v294_v38  ;;  %v430_v55 = vmul.f32 %v1389_v51, %v295_v39 }
  0x6c   : > { %814 = vst [vmem:[%s979_s25 + $0x390] sm:$0xff] %v686_v43  ;;  %v690_v53 = vmax.f32 %v562_v44, 0.0  ;;  %v431_v56 = vmul.f32 %v1389_v51, %v296_v40  ;;  %815 = vst [vmem:[%s979_s25 + $0x398] sm:$0xff] %v687_v47  ;;  %v432_v59 = vmul.f32 %v1389_v51, %v297_v45  ;;  %v433_v60 = vmul.f32 %v1389_v51, %v298_v46 }
  0x6d   : > { %816 = vst [vmem:[%s979_s25 + $0x3a0] sm:$0xff] %v688_v49  ;;  %817 = vst [vmem:[%s979_s25 + $0x3a8] sm:$0xff] %v689_v50  ;;  %v691_v58 = vmax.f32 %v563_v1, 0.0  ;;  %v434_v61 = vmul.f32 %v1389_v51, %v299_v0  ;;  %v564_v62 = vadd.f32 %v1379_v48, %v429_v54  ;;  %v565_v63 = vadd.f32 %v1379_v48, %v430_v55 }
  0x6e   : > { %818 = vst [vmem:[%s979_s25 + $0x3b0] sm:$0xff] %v690_v53  ;;  %v566_v2 = vadd.f32 %v1379_v48, %v431_v56  ;;  %v435_v3 = vmul.f32 %v1389_v51, %v300_v52  ;;  %v567_v4 = vadd.f32 %v1379_v48, %v432_v59  ;;  %v568_v5 = vadd.f32 %v1379_v48, %v433_v60 }
  0x6f   : > { %819 = vst [vmem:[%s979_s25 + $0x3b8] sm:$0xff] %v691_v58  ;;  %v569_v6 = vadd.f32 %v1379_v48, %v434_v61  ;;  %v436_v7 = vmul.f32 %v1389_v51, %v301_v57  ;;  %v692_v8 = vmax.f32 %v564_v62, 0.0  ;;  %v693_v9 = vmax.f32 %v565_v63, 0.0 }
  0x70   : > { %v694_v10 = vmax.f32 %v566_v2, 0.0  ;;  %v570_v11 = vadd.f32 %v1379_v48, %v435_v3  ;;  %v695_v12 = vmax.f32 %v567_v4, 0.0  ;;  %v696_v13 = vmax.f32 %v568_v5, 0.0 }
  0x71   : > { %v697_v14 = vmax.f32 %v569_v6, 0.0  ;;  %v571_v15 = vadd.f32 %v1379_v48, %v436_v7  ;;  %820 = vst [vmem:[%s979_s25 + $0x3c0] sm:$0xff] %v692_v8  ;;  %821 = vst [vmem:[%s979_s25 + $0x3c8] sm:$0xff] %v693_v9 }
  0x72   : > { %822 = vst [vmem:[%s979_s25 + $0x3d0] sm:$0xff] %v694_v10  ;;  %v698_v16 = vmax.f32 %v570_v11, 0.0  ;;  %823 = vst [vmem:[%s979_s25 + $0x3d8] sm:$0xff] %v695_v12 }
  0x73   : > { %824 = vst [vmem:[%s979_s25 + $0x3e0] sm:$0xff] %v696_v13  ;;  %825 = vst [vmem:[%s979_s25 + $0x3e8] sm:$0xff] %v697_v14  ;;  %v699_v51 = vmax.f32 %v571_v15, 0.0 }
  0x74   : > { %826 = vst [vmem:[%s979_s25 + $0x3f0] sm:$0xff] %v698_v16 }
  0x75   : > { %827 = vst [vmem:[%s979_s25 + $0x3f8] sm:$0xff] %v699_v51 }
  0x76 PF: > { %s13_s12 = sadd.s32 1, %s913_s12  }
  0x77   : > { %p10_p4 = scmp.ge.s32.totalorder %s13_s12, 4  }
  0x79   :  { %12 = sbr.rel (!%p10_p4) target bundleno = 1 (0x1), region = 62 }

</bundles_post_ra>
